<compile_context>
chip_gen: v5e
topology: v5e:2x2
jax: 0.10.0
libtpu: 0.0.40
codegen_flags: <defaults>
</compile_context>

<pallas_src>
import functools
import math

import numpy as np
import jax
import jax.numpy as jnp
from jax.experimental import pallas as pl
from jax.experimental.pallas import tpu as pltpu

_EPS = 1e-5


def _erf(x):
    # Abramowitz & Stegun 7.1.26 (|err| < 1.5e-7): exp/mul/add/select only; matches
    # torch.nn.GELU (exact, erf-based) far below the test tolerance.
    a1, a2, a3, a4, a5 = (0.254829592, -0.284496736, 1.421413741,
                          -1.453152027, 1.061405429)
    p = 0.3275911
    s = jnp.where(x >= 0.0, 1.0, -1.0)
    ax = jnp.abs(x)
    t = 1.0 / (1.0 + p * ax)      # exact divide on purpose: keeps the accuracy margin
    poly = ((((a5 * t + a4) * t + a3) * t + a2) * t + a1) * t
    return s * (1.0 - poly * jnp.exp(-ax * ax))


def _gelu_exact(x):
    return 0.5 * x * (1.0 + _erf(x * (1.0 / math.sqrt(2.0))))


def _layer_norm(z, gamma, beta, eps):
    mu = jnp.mean(z, axis=-1, keepdims=True)
    var = jnp.mean(jnp.square(z - mu), axis=-1, keepdims=True)
    return (z - mu) * jax.lax.rsqrt(var + eps) * gamma + beta


# ----------------------------- fused Block2 kernel --------------------------------------

def block2_kernel(x_ref, y_ref, g1_ref, b1_ref, wq_ref, wkv_ref, wpr_ref, bp_ref,
                  perm_ref, g2_ref, b2_ref, w1_ref, bb1_ref, w2_ref, bb2_ref,
                  o_ref, *, B, N, H, eps, mxu_dtype):
    """norm1 -> cross-attention -> proj (+interleave) -> residual -> norm2 -> MLP -> residual.

    x_ref, y_ref : (B*N, C)   token rows (k,v come from x, q from y)
    wq_ref       : (C, C)     q projection, attention scale folded in (host-side)
    wkv_ref      : (C, 2C)    fused [k | v] projection
    wpr_ref      : (H, hd, C) proj weight reshaped so head-dim chunks index dim 0
    perm_ref     : (B*N, B*N) 0/1 row permutation realizing torch's (h,b,n,d) reshape
    o_ref        : (B*N, C)
    """
    RB, C = x_ref.shape
    hd = C // H
    G = H * B              # attention groups, (head, batch) major order
    jrows = N // H         # output rows produced per group by torch's reshape

    def mm(a, b):
        if mxu_dtype is not None:
            a, b = a.astype(mxu_dtype), b.astype(mxu_dtype)
        return jnp.dot(a, b, preferred_element_type=jnp.float32)

    def bmm(eq, a, b):
        if mxu_dtype is not None:
            a, b = a.astype(mxu_dtype), b.astype(mxu_dtype)
        return jnp.einsum(eq, a, b, preferred_element_type=jnp.float32)

    # ---- norm1 on both inputs ----
    xn = _layer_norm(x_ref[...], g1_ref[0], b1_ref[0], eps)   # key / value source
    yn = _layer_norm(y_ref[...], g1_ref[0], b1_ref[0], eps)   # query source

    # ---- fused projections: two lane-dense MXU matmuls ----
    q_all = mm(yn, wq_ref[...])       # (RB, C)   scale already folded into wq
    kv_all = mm(xn, wkv_ref[...])     # (RB, 2C)  k cols [0,C), v cols [C,2C)

    # ---- split heads (static lane slices); head axis lands on the MAJOR dim ----
    qs, ks, vs = [], [], []
    for h in range(H):
        lo, hi = h * hd, (h + 1) * hd
        qs.append(q_all[:, lo:hi].reshape(B, N, hd))
        ks.append(kv_all[:, lo:hi].reshape(B, N, hd))
        vs.append(kv_all[:, C + lo:C + hi].reshape(B, N, hd))
    qg = jnp.concatenate(qs, axis=0)  # (G, N, hd), g = h*B + b
    kg = jnp.concatenate(ks, axis=0)
    vg = jnp.concatenate(vs, axis=0)

    # ---- batched attention over merged (head, batch) groups ----
    s = bmm('gqd,gkd->gqk', qg, kg)                         # (G, N, N)
    s = s - jnp.max(s, axis=-1, keepdims=True)              # stable softmax
    p = jnp.exp(s)
    p = p * pl.reciprocal(jnp.sum(p, axis=-1, keepdims=True), approx=True)
    ctx = bmm('gqk,gkd->gqd', p, vg)                        # (G, N, hd)

    # ---- proj folded with torch's (head, batch, n, d) interleave ----
    # Output row-slot j of group g takes queries n = j*H + k, k = 0..H-1, and channel
    # chunk k multiplies Wproj rows [k*hd, (k+1)*hd).
    parts = []
    for j in range(jrows):
        acc = None
        for k in range(H):
            t = mm(ctx[:, j * H + k, :], wpr_ref[k])        # (G, C)
            acc = t if acc is None else acc + t
        parts.append(acc)
    cat = jnp.concatenate(parts, axis=0)                    # (jrows*G, C) in (j, g) order
    # Restore torch row order r = g*jrows + j with one tiny exact 0/1 matmul.
    proj = jnp.dot(perm_ref[...], cat, preferred_element_type=jnp.float32)

    x1 = x_ref[...] + proj + bp_ref[0]                      # DropPath/Dropout identity

    # ---- norm2 + MLP (exact GELU) + residual ----
    xn2 = _layer_norm(x1, g2_ref[0], b2_ref[0], eps)
    h1 = mm(xn2, w1_ref[...]) + bb1_ref[0]
    h1 = _gelu_exact(h1)
    h2 = mm(h1, w2_ref[...]) + bb2_ref[0]

    o_ref[...] = (x1 + h2).astype(o_ref.dtype)


# ------------------------------------- wrappers ------------------------------------------

def prepare_kernel_params(params, num_heads):
    """One-time host-side weight prep: fold the attention scale into wq, fuse k|v into a
    single (C, 2C) slab, and reshape Wproj so its head-dim chunks index dim 0."""
    C = params["wq"].shape[0]
    hd = C // num_heads
    scale = hd ** (-0.5)
    kp = dict(params)
    kp["wq_s"] = params["wq"] * scale
    kp["wkv"] = jnp.concatenate([params["wk"], params["wv"]], axis=1)
    kp["wprojR"] = params["wproj"].reshape(num_heads, hd, C)
    return kp


def _interleave_perm(RB, G, jrows):
    """0/1 matrix P with (P @ cat)[r] = cat[(r % jrows) * G + r // jrows]; realizes the
    torch (head, batch, n, d) -> (b*N + n, c) row interleave.  Built with numpy at trace
    time, so it is a baked-in constant (no runtime cost outside the kernel)."""
    r = np.arange(RB)
    src = (r % jrows) * G + (r // jrows)
    P = np.zeros((RB, RB), np.float32)
    P[r, src] = 1.0
    return jnp.asarray(P)


def block2_forward(x, y, kp, *, mxu_dtype=None):
    B, N, C = x.shape
    H, hd, _ = kp["wprojR"].shape
    assert C == H * hd
    # The fused in-kernel interleave needs whole-row groups; true for transformer-typical
    # shapes.  (The general case would fall back to a two-call form.)
    assert N % H == 0, "fused Block2 kernel requires N % num_heads == 0"
    RB = B * N

    x2 = x.reshape(RB, C)
    y2 = y.reshape(RB, C)
    perm = _interleave_perm(RB, H * B, N // H)

    kernel = functools.partial(block2_kernel, B=B, N=N, H=H, eps=_EPS,
                               mxu_dtype=mxu_dtype)

    # Single fused invocation: no grid, whole problem resident in VMEM (<< 32 MiB scoped
    # default; well under v7x's 64 MiB).  For much larger B*N, tile the batch with a
    # ("parallel",) grid / the two-call form instead.
    out = pl.pallas_call(
        kernel,
        out_shape=jax.ShapeDtypeStruct((RB, C), x.dtype),
        compiler_params=pltpu.CompilerParams(vmem_limit_bytes=32 * 1024 * 1024),
    )(x2, y2, kp["g1"], kp["b1"], kp["wq_s"], kp["wkv"], kp["wprojR"], kp["bproj"],
      perm, kp["g2"], kp["b2"], kp["w1"], kp["bb1"], kp["w2"], kp["bb2"])

    return out.reshape(B, N, C)


def block2_reference(x, y, params, num_heads):
    """Pure-JAX mirror of the PyTorch Block2.forward (including its transpose(1, 2))."""
    B, N, C = x.shape
    H = num_heads
    hd = C // H
    scale = hd ** (-0.5)

    def ln(z, g, b):
        mu = z.mean(-1, keepdims=True)
        var = ((z - mu) ** 2).mean(-1, keepdims=True)
        return (z - mu) / jnp.sqrt(var + _EPS) * g + b

    xn = ln(x, params["g1"][0], params["b1"][0])
    yn = ln(y, params["g1"][0], params["b1"][0])

    def split_heads(t):                            # (B, N, C) -> (B, H, N, hd)
        return jnp.transpose(t.reshape(B, N, H, hd), (0, 2, 1, 3))

    k = split_heads(xn @ params["wk"])
    v = split_heads(xn @ params["wv"])
    q = split_heads(yn @ params["wq"])[None]       # (1, B, H, N, hd): torch keeps dim 0

    attn = (q @ jnp.swapaxes(k, -2, -1)) * scale   # (1, B, H, N, N)
    attn = jax.nn.softmax(attn, axis=-1)
    r = attn @ v                                   # (1, B, H, N, hd)
    r = jnp.swapaxes(r, 1, 2)                      # (1, H, B, N, hd)  == .transpose(1, 2)
    a = r.reshape(B, 1, N, C)[:, 0]                # == .reshape(B, S, N, C); squeeze(1)

    a = a @ params["wproj"] + params["bproj"][0]
    x1 = x + a
    xn2 = ln(x1, params["g2"][0], params["b2"][0])
    h = xn2 @ params["w1"] + params["bb1"][0]
    h = jax.nn.gelu(h, approximate=False)
    h = h @ params["w2"] + params["bb2"][0]
    return x1 + h


if __name__ == "__main__":
    B, N, C = 8, 8, 32          # batch, tokens, channels
    num_heads = 4
    mlp_ratio = 4.0
    hidden = int(C * mlp_ratio)

    key = jax.random.PRNGKey(0)
    ks = jax.random.split(key, 14)

    x = jax.random.normal(ks[0], (B, N, C), jnp.float32)
    y = jax.random.normal(ks[1], (B, N, C), jnp.float32)

    params = {
        "g1":    1.0 + 0.1 * jax.random.normal(ks[2], (1, C), jnp.float32),
        "b1":    0.05 * jax.random.normal(ks[3], (1, C), jnp.float32),
        "wq":    0.08 * jax.random.normal(ks[4], (C, C), jnp.float32),
        "wk":    0.08 * jax.random.normal(ks[5], (C, C), jnp.float32),
        "wv":    0.08 * jax.random.normal(ks[6], (C, C), jnp.float32),
        "wproj": 0.08 * jax.random.normal(ks[7], (C, C), jnp.float32),
        "bproj": 0.02 * jax.random.normal(ks[8], (1, C), jnp.float32),
        "g2":    1.0 + 0.1 * jax.random.normal(ks[9], (1, C), jnp.float32),
        "b2":    0.05 * jax.random.normal(ks[10], (1, C), jnp.float32),
        "w1":    0.08 * jax.random.normal(ks[11], (C, hidden), jnp.float32),
        "bb1":   0.02 * jax.random.normal(ks[12], (1, hidden), jnp.float32),
        "w2":    0.08 * jax.random.normal(ks[13], (hidden, C), jnp.float32),
        "bb2":   jnp.zeros((1, C), jnp.float32),
    }

    kparams = prepare_kernel_params(params, num_heads)   # one-time host-side weight prep

    fwd = jax.jit(block2_forward)                         # single fused kernel, grid = ()
    out = jax.block_until_ready(fwd(x, y, kparams))

    ref = jax.block_until_ready(block2_reference(x, y, params, num_heads))

    assert out.shape == (B, N, C)
    max_diff = float(jnp.max(jnp.abs(out - ref)))
    assert jnp.allclose(out, ref, atol=2e-3, rtol=2e-3), f"max abs diff {max_diff}"

    print("KERNEL_OK")
</pallas_src>

<mosaic_0001>
module attributes {stable_mosaic.version = 11 : i64} {
  func.func @block2_kernel(%arg0: memref<64x32xf32, #tpu.memory_space<vmem>>, %arg1: memref<64x32xf32, #tpu.memory_space<vmem>>, %arg2: memref<1x32xf32, #tpu.memory_space<vmem>>, %arg3: memref<1x32xf32, #tpu.memory_space<vmem>>, %arg4: memref<32x32xf32, #tpu.memory_space<vmem>>, %arg5: memref<32x64xf32, #tpu.memory_space<vmem>>, %arg6: memref<4x8x32xf32, #tpu.memory_space<vmem>>, %arg7: memref<1x32xf32, #tpu.memory_space<vmem>>, %arg8: memref<64x64xf32, #tpu.memory_space<vmem>>, %arg9: memref<1x32xf32, #tpu.memory_space<vmem>>, %arg10: memref<1x32xf32, #tpu.memory_space<vmem>>, %arg11: memref<32x128xf32, #tpu.memory_space<vmem>>, %arg12: memref<1x128xf32, #tpu.memory_space<vmem>>, %arg13: memref<128x32xf32, #tpu.memory_space<vmem>>, %arg14: memref<1x32xf32, #tpu.memory_space<vmem>>, %arg15: memref<64x32xf32, #tpu.memory_space<vmem>>) attributes {dimension_semantics = [], scalar_prefetch = 0 : i64, scratch_operands = 0 : i64, tpu.core_type = #tpu.core_type<tc>} {
    %c0 = arith.constant 0 : index
    %c0_0 = arith.constant 0 : index
    %0 = vector.load %arg0[%c0, %c0_0] : memref<64x32xf32, #tpu.memory_space<vmem>>, vector<64x32xf32>
    %c0_1 = arith.constant 0 : index
    %c0_2 = arith.constant 0 : index
    %1 = vector.load %arg2[%c0_1, %c0_2] : memref<1x32xf32, #tpu.memory_space<vmem>>, vector<1x32xf32>
    %2 = vector.shape_cast %1 : vector<1x32xf32> to vector<32xf32>
    %c0_3 = arith.constant 0 : index
    %c0_4 = arith.constant 0 : index
    %3 = vector.load %arg3[%c0_3, %c0_4] : memref<1x32xf32, #tpu.memory_space<vmem>>, vector<1x32xf32>
    %4 = vector.shape_cast %3 : vector<1x32xf32> to vector<32xf32>
    %cst = arith.constant dense<0.000000e+00> : vector<64xf32>
    %5 = vector.multi_reduction <add>, %0, %cst [1] : vector<64x32xf32> to vector<64xf32>
    %6 = vector.shape_cast %5 : vector<64xf32> to vector<64x1xf32>
    %cst_5 = arith.constant 3.200000e+01 : f32
    %7 = vector.broadcast %cst_5 : f32 to vector<64x1xf32>
    %8 = arith.divf %6, %7 : vector<64x1xf32>
    %9 = vector.broadcast %8 : vector<64x1xf32> to vector<64x32xf32>
    %10 = arith.subf %0, %9 : vector<64x32xf32>
    %11 = arith.mulf %10, %10 : vector<64x32xf32>
    %cst_6 = arith.constant dense<0.000000e+00> : vector<64xf32>
    %12 = vector.multi_reduction <add>, %11, %cst_6 [1] : vector<64x32xf32> to vector<64xf32>
    %13 = vector.shape_cast %12 : vector<64xf32> to vector<64x1xf32>
    %cst_7 = arith.constant 3.200000e+01 : f32
    %14 = vector.broadcast %cst_7 : f32 to vector<64x1xf32>
    %15 = arith.divf %13, %14 : vector<64x1xf32>
    %16 = vector.broadcast %8 : vector<64x1xf32> to vector<64x32xf32>
    %17 = arith.subf %0, %16 : vector<64x32xf32>
    %cst_8 = arith.constant 9.99999974E-6 : f32
    %18 = vector.broadcast %cst_8 : f32 to vector<64x1xf32>
    %19 = arith.addf %15, %18 : vector<64x1xf32>
    %20 = math.rsqrt %19 : vector<64x1xf32>
    %21 = vector.broadcast %20 : vector<64x1xf32> to vector<64x32xf32>
    %22 = arith.mulf %17, %21 : vector<64x32xf32>
    %23 = vector.shape_cast %2 : vector<32xf32> to vector<1x32xf32>
    %24 = vector.broadcast %23 : vector<1x32xf32> to vector<64x32xf32>
    %25 = arith.mulf %22, %24 : vector<64x32xf32>
    %26 = vector.shape_cast %4 : vector<32xf32> to vector<1x32xf32>
    %27 = vector.broadcast %26 : vector<1x32xf32> to vector<64x32xf32>
    %28 = arith.addf %25, %27 : vector<64x32xf32>
    %c0_9 = arith.constant 0 : index
    %c0_10 = arith.constant 0 : index
    %29 = vector.load %arg1[%c0_9, %c0_10] : memref<64x32xf32, #tpu.memory_space<vmem>>, vector<64x32xf32>
    %c0_11 = arith.constant 0 : index
    %c0_12 = arith.constant 0 : index
    %30 = vector.load %arg2[%c0_11, %c0_12] : memref<1x32xf32, #tpu.memory_space<vmem>>, vector<1x32xf32>
    %31 = vector.shape_cast %30 : vector<1x32xf32> to vector<32xf32>
    %c0_13 = arith.constant 0 : index
    %c0_14 = arith.constant 0 : index
    %32 = vector.load %arg3[%c0_13, %c0_14] : memref<1x32xf32, #tpu.memory_space<vmem>>, vector<1x32xf32>
    %33 = vector.shape_cast %32 : vector<1x32xf32> to vector<32xf32>
    %cst_15 = arith.constant dense<0.000000e+00> : vector<64xf32>
    %34 = vector.multi_reduction <add>, %29, %cst_15 [1] : vector<64x32xf32> to vector<64xf32>
    %35 = vector.shape_cast %34 : vector<64xf32> to vector<64x1xf32>
    %cst_16 = arith.constant 3.200000e+01 : f32
    %36 = vector.broadcast %cst_16 : f32 to vector<64x1xf32>
    %37 = arith.divf %35, %36 : vector<64x1xf32>
    %38 = vector.broadcast %37 : vector<64x1xf32> to vector<64x32xf32>
    %39 = arith.subf %29, %38 : vector<64x32xf32>
    %40 = arith.mulf %39, %39 : vector<64x32xf32>
    %cst_17 = arith.constant dense<0.000000e+00> : vector<64xf32>
    %41 = vector.multi_reduction <add>, %40, %cst_17 [1] : vector<64x32xf32> to vector<64xf32>
    %42 = vector.shape_cast %41 : vector<64xf32> to vector<64x1xf32>
    %cst_18 = arith.constant 3.200000e+01 : f32
    %43 = vector.broadcast %cst_18 : f32 to vector<64x1xf32>
    %44 = arith.divf %42, %43 : vector<64x1xf32>
    %45 = vector.broadcast %37 : vector<64x1xf32> to vector<64x32xf32>
    %46 = arith.subf %29, %45 : vector<64x32xf32>
    %cst_19 = arith.constant 9.99999974E-6 : f32
    %47 = vector.broadcast %cst_19 : f32 to vector<64x1xf32>
    %48 = arith.addf %44, %47 : vector<64x1xf32>
    %49 = math.rsqrt %48 : vector<64x1xf32>
    %50 = vector.broadcast %49 : vector<64x1xf32> to vector<64x32xf32>
    %51 = arith.mulf %46, %50 : vector<64x32xf32>
    %52 = vector.shape_cast %31 : vector<32xf32> to vector<1x32xf32>
    %53 = vector.broadcast %52 : vector<1x32xf32> to vector<64x32xf32>
    %54 = arith.mulf %51, %53 : vector<64x32xf32>
    %55 = vector.shape_cast %33 : vector<32xf32> to vector<1x32xf32>
    %56 = vector.broadcast %55 : vector<1x32xf32> to vector<64x32xf32>
    %57 = arith.addf %54, %56 : vector<64x32xf32>
    %c0_20 = arith.constant 0 : index
    %c0_21 = arith.constant 0 : index
    %58 = vector.load %arg4[%c0_20, %c0_21] : memref<32x32xf32, #tpu.memory_space<vmem>>, vector<32x32xf32>
    %cst_22 = arith.constant dense<0.000000e+00> : vector<64x32xf32>
    %59 = tpu.matmul %57, %58, %cst_22 {dimension_numbers = #tpu.dot_dimension_numbers<[1], [0], [0], [1], [0, 0, 1, 1], [], []>} : vector<64x32xf32>, vector<32x32xf32>, vector<64x32xf32> -> vector<64x32xf32>
    %c0_23 = arith.constant 0 : index
    %c0_24 = arith.constant 0 : index
    %60 = vector.load %arg5[%c0_23, %c0_24] : memref<32x64xf32, #tpu.memory_space<vmem>>, vector<32x64xf32>
    %cst_25 = arith.constant dense<0.000000e+00> : vector<64x64xf32>
    %61 = tpu.matmul %28, %60, %cst_25 {dimension_numbers = #tpu.dot_dimension_numbers<[1], [0], [0], [1], [0, 0, 1, 1], [], []>} : vector<64x32xf32>, vector<32x64xf32>, vector<64x64xf32> -> vector<64x64xf32>
    %62 = vector.extract_strided_slice %59 {offsets = [0, 0], sizes = [64, 8], strides = [1, 1]} : vector<64x32xf32> to vector<64x8xf32>
    %63 = vector.shape_cast %62 : vector<64x8xf32> to vector<8x8x8xf32>
    %64 = vector.extract_strided_slice %61 {offsets = [0, 0], sizes = [64, 8], strides = [1, 1]} : vector<64x64xf32> to vector<64x8xf32>
    %65 = vector.shape_cast %64 : vector<64x8xf32> to vector<8x8x8xf32>
    %66 = vector.extract_strided_slice %61 {offsets = [0, 32], sizes = [64, 8], strides = [1, 1]} : vector<64x64xf32> to vector<64x8xf32>
    %67 = vector.shape_cast %66 : vector<64x8xf32> to vector<8x8x8xf32>
    %68 = vector.extract_strided_slice %59 {offsets = [0, 8], sizes = [64, 8], strides = [1, 1]} : vector<64x32xf32> to vector<64x8xf32>
    %69 = vector.shape_cast %68 : vector<64x8xf32> to vector<8x8x8xf32>
    %70 = vector.extract_strided_slice %61 {offsets = [0, 8], sizes = [64, 8], strides = [1, 1]} : vector<64x64xf32> to vector<64x8xf32>
    %71 = vector.shape_cast %70 : vector<64x8xf32> to vector<8x8x8xf32>
    %72 = vector.extract_strided_slice %61 {offsets = [0, 40], sizes = [64, 8], strides = [1, 1]} : vector<64x64xf32> to vector<64x8xf32>
    %73 = vector.shape_cast %72 : vector<64x8xf32> to vector<8x8x8xf32>
    %74 = vector.extract_strided_slice %59 {offsets = [0, 16], sizes = [64, 8], strides = [1, 1]} : vector<64x32xf32> to vector<64x8xf32>
    %75 = vector.shape_cast %74 : vector<64x8xf32> to vector<8x8x8xf32>
    %76 = vector.extract_strided_slice %61 {offsets = [0, 16], sizes = [64, 8], strides = [1, 1]} : vector<64x64xf32> to vector<64x8xf32>
    %77 = vector.shape_cast %76 : vector<64x8xf32> to vector<8x8x8xf32>
    %78 = vector.extract_strided_slice %61 {offsets = [0, 48], sizes = [64, 8], strides = [1, 1]} : vector<64x64xf32> to vector<64x8xf32>
    %79 = vector.shape_cast %78 : vector<64x8xf32> to vector<8x8x8xf32>
    %80 = vector.extract_strided_slice %59 {offsets = [0, 24], sizes = [64, 8], strides = [1, 1]} : vector<64x32xf32> to vector<64x8xf32>
    %81 = vector.shape_cast %80 : vector<64x8xf32> to vector<8x8x8xf32>
    %82 = vector.extract_strided_slice %61 {offsets = [0, 24], sizes = [64, 8], strides = [1, 1]} : vector<64x64xf32> to vector<64x8xf32>
    %83 = vector.shape_cast %82 : vector<64x8xf32> to vector<8x8x8xf32>
    %84 = vector.extract_strided_slice %61 {offsets = [0, 56], sizes = [64, 8], strides = [1, 1]} : vector<64x64xf32> to vector<64x8xf32>
    %85 = vector.shape_cast %84 : vector<64x8xf32> to vector<8x8x8xf32>
    %86 = tpu.concatenate %63, %69, %75, %81 in 0 : vector<8x8x8xf32>, vector<8x8x8xf32>, vector<8x8x8xf32>, vector<8x8x8xf32> -> vector<32x8x8xf32>
    %87 = tpu.concatenate %65, %71, %77, %83 in 0 : vector<8x8x8xf32>, vector<8x8x8xf32>, vector<8x8x8xf32>, vector<8x8x8xf32> -> vector<32x8x8xf32>
    %88 = tpu.concatenate %67, %73, %79, %85 in 0 : vector<8x8x8xf32>, vector<8x8x8xf32>, vector<8x8x8xf32>, vector<8x8x8xf32> -> vector<32x8x8xf32>
    "tpu.trace_start"() <{level = 10 : i32, message = "gqd,gkd->gqk"}> : () -> ()
    %cst_26 = arith.constant dense<0.000000e+00> : vector<32x8x8xf32>
    %89 = tpu.matmul %86, %87, %cst_26 {dimension_numbers = #tpu.dot_dimension_numbers<[2], [2], [1], [1], [0, 0, 0, 1, 1, 1], [0], [0]>} : vector<32x8x8xf32>, vector<32x8x8xf32>, vector<32x8x8xf32> -> vector<32x8x8xf32>
    "tpu.trace_stop"() : () -> ()
    %cst_27 = arith.constant dense<0xFF800000> : vector<32x8xf32>
    %90 = vector.multi_reduction <maximumf>, %89, %cst_27 [2] : vector<32x8x8xf32> to vector<32x8xf32>
    %91 = vector.shape_cast %90 : vector<32x8xf32> to vector<32x8x1xf32>
    %92 = vector.broadcast %91 : vector<32x8x1xf32> to vector<32x8x8xf32>
    %93 = arith.subf %89, %92 : vector<32x8x8xf32>
    %94 = math.exp %93 : vector<32x8x8xf32>
    %cst_28 = arith.constant dense<0.000000e+00> : vector<32x8xf32>
    %95 = vector.multi_reduction <add>, %94, %cst_28 [2] : vector<32x8x8xf32> to vector<32x8xf32>
    %96 = vector.shape_cast %95 : vector<32x8xf32> to vector<32x8x1xf32>
    %97 = tpu.reciprocal %96 {approx = true} : vector<32x8x1xf32> -> vector<32x8x1xf32>
    %98 = vector.broadcast %97 : vector<32x8x1xf32> to vector<32x8x8xf32>
    %99 = arith.mulf %94, %98 : vector<32x8x8xf32>
    "tpu.trace_start"() <{level = 10 : i32, message = "gqk,gkd->gqd"}> : () -> ()
    %cst_29 = arith.constant dense<0.000000e+00> : vector<32x8x8xf32>
    %100 = tpu.matmul %99, %88, %cst_29 {dimension_numbers = #tpu.dot_dimension_numbers<[2], [1], [1], [2], [0, 0, 0, 1, 1, 2], [0], [0]>} : vector<32x8x8xf32>, vector<32x8x8xf32>, vector<32x8x8xf32> -> vector<32x8x8xf32>
    "tpu.trace_stop"() : () -> ()
    %101 = vector.extract_strided_slice %100 {offsets = [0, 0, 0], sizes = [32, 1, 8], strides = [1, 1, 1]} : vector<32x8x8xf32> to vector<32x1x8xf32>
    %102 = vector.shape_cast %101 : vector<32x1x8xf32> to vector<32x8xf32>
    %c0_30 = arith.constant 0 : index
    %c0_31 = arith.constant 0 : index
    %c0_32 = arith.constant 0 : index
    %103 = vector.load %arg6[%c0_30, %c0_31, %c0_32] : memref<4x8x32xf32, #tpu.memory_space<vmem>>, vector<1x8x32xf32>
    %104 = vector.shape_cast %103 : vector<1x8x32xf32> to vector<8x32xf32>
    %cst_33 = arith.constant dense<0.000000e+00> : vector<32x32xf32>
    %105 = tpu.matmul %102, %104, %cst_33 {dimension_numbers = #tpu.dot_dimension_numbers<[1], [0], [0], [1], [0, 0, 1, 1], [], []>} : vector<32x8xf32>, vector<8x32xf32>, vector<32x32xf32> -> vector<32x32xf32>
    %106 = vector.extract_strided_slice %100 {offsets = [0, 1, 0], sizes = [32, 1, 8], strides = [1, 1, 1]} : vector<32x8x8xf32> to vector<32x1x8xf32>
    %107 = vector.shape_cast %106 : vector<32x1x8xf32> to vector<32x8xf32>
    %c1 = arith.constant 1 : index
    %c0_34 = arith.constant 0 : index
    %c0_35 = arith.constant 0 : index
    %108 = vector.load %arg6[%c1, %c0_34, %c0_35] : memref<4x8x32xf32, #tpu.memory_space<vmem>>, vector<1x8x32xf32>
    %109 = vector.shape_cast %108 : vector<1x8x32xf32> to vector<8x32xf32>
    %cst_36 = arith.constant dense<0.000000e+00> : vector<32x32xf32>
    %110 = tpu.matmul %107, %109, %cst_36 {dimension_numbers = #tpu.dot_dimension_numbers<[1], [0], [0], [1], [0, 0, 1, 1], [], []>} : vector<32x8xf32>, vector<8x32xf32>, vector<32x32xf32> -> vector<32x32xf32>
    %111 = arith.addf %105, %110 : vector<32x32xf32>
    %112 = vector.extract_strided_slice %100 {offsets = [0, 2, 0], sizes = [32, 1, 8], strides = [1, 1, 1]} : vector<32x8x8xf32> to vector<32x1x8xf32>
    %113 = vector.shape_cast %112 : vector<32x1x8xf32> to vector<32x8xf32>
    %c2 = arith.constant 2 : index
    %c0_37 = arith.constant 0 : index
    %c0_38 = arith.constant 0 : index
    %114 = vector.load %arg6[%c2, %c0_37, %c0_38] : memref<4x8x32xf32, #tpu.memory_space<vmem>>, vector<1x8x32xf32>
    %115 = vector.shape_cast %114 : vector<1x8x32xf32> to vector<8x32xf32>
    %cst_39 = arith.constant dense<0.000000e+00> : vector<32x32xf32>
    %116 = tpu.matmul %113, %115, %cst_39 {dimension_numbers = #tpu.dot_dimension_numbers<[1], [0], [0], [1], [0, 0, 1, 1], [], []>} : vector<32x8xf32>, vector<8x32xf32>, vector<32x32xf32> -> vector<32x32xf32>
    %117 = arith.addf %111, %116 : vector<32x32xf32>
    %118 = vector.extract_strided_slice %100 {offsets = [0, 3, 0], sizes = [32, 1, 8], strides = [1, 1, 1]} : vector<32x8x8xf32> to vector<32x1x8xf32>
    %119 = vector.shape_cast %118 : vector<32x1x8xf32> to vector<32x8xf32>
    %c3 = arith.constant 3 : index
    %c0_40 = arith.constant 0 : index
    %c0_41 = arith.constant 0 : index
    %120 = vector.load %arg6[%c3, %c0_40, %c0_41] : memref<4x8x32xf32, #tpu.memory_space<vmem>>, vector<1x8x32xf32>
    %121 = vector.shape_cast %120 : vector<1x8x32xf32> to vector<8x32xf32>
    %cst_42 = arith.constant dense<0.000000e+00> : vector<32x32xf32>
    %122 = tpu.matmul %119, %121, %cst_42 {dimension_numbers = #tpu.dot_dimension_numbers<[1], [0], [0], [1], [0, 0, 1, 1], [], []>} : vector<32x8xf32>, vector<8x32xf32>, vector<32x32xf32> -> vector<32x32xf32>
    %123 = arith.addf %117, %122 : vector<32x32xf32>
    %124 = vector.extract_strided_slice %100 {offsets = [0, 4, 0], sizes = [32, 1, 8], strides = [1, 1, 1]} : vector<32x8x8xf32> to vector<32x1x8xf32>
    %125 = vector.shape_cast %124 : vector<32x1x8xf32> to vector<32x8xf32>
    %c0_43 = arith.constant 0 : index
    %c0_44 = arith.constant 0 : index
    %c0_45 = arith.constant 0 : index
    %126 = vector.load %arg6[%c0_43, %c0_44, %c0_45] : memref<4x8x32xf32, #tpu.memory_space<vmem>>, vector<1x8x32xf32>
    %127 = vector.shape_cast %126 : vector<1x8x32xf32> to vector<8x32xf32>
    %cst_46 = arith.constant dense<0.000000e+00> : vector<32x32xf32>
    %128 = tpu.matmul %125, %127, %cst_46 {dimension_numbers = #tpu.dot_dimension_numbers<[1], [0], [0], [1], [0, 0, 1, 1], [], []>} : vector<32x8xf32>, vector<8x32xf32>, vector<32x32xf32> -> vector<32x32xf32>
    %129 = vector.extract_strided_slice %100 {offsets = [0, 5, 0], sizes = [32, 1, 8], strides = [1, 1, 1]} : vector<32x8x8xf32> to vector<32x1x8xf32>
    %130 = vector.shape_cast %129 : vector<32x1x8xf32> to vector<32x8xf32>
    %c1_47 = arith.constant 1 : index
    %c0_48 = arith.constant 0 : index
    %c0_49 = arith.constant 0 : index
    %131 = vector.load %arg6[%c1_47, %c0_48, %c0_49] : memref<4x8x32xf32, #tpu.memory_space<vmem>>, vector<1x8x32xf32>
    %132 = vector.shape_cast %131 : vector<1x8x32xf32> to vector<8x32xf32>
    %cst_50 = arith.constant dense<0.000000e+00> : vector<32x32xf32>
    %133 = tpu.matmul %130, %132, %cst_50 {dimension_numbers = #tpu.dot_dimension_numbers<[1], [0], [0], [1], [0, 0, 1, 1], [], []>} : vector<32x8xf32>, vector<8x32xf32>, vector<32x32xf32> -> vector<32x32xf32>
    %134 = arith.addf %128, %133 : vector<32x32xf32>
    %135 = vector.extract_strided_slice %100 {offsets = [0, 6, 0], sizes = [32, 1, 8], strides = [1, 1, 1]} : vector<32x8x8xf32> to vector<32x1x8xf32>
    %136 = vector.shape_cast %135 : vector<32x1x8xf32> to vector<32x8xf32>
    %c2_51 = arith.constant 2 : index
    %c0_52 = arith.constant 0 : index
    %c0_53 = arith.constant 0 : index
    %137 = vector.load %arg6[%c2_51, %c0_52, %c0_53] : memref<4x8x32xf32, #tpu.memory_space<vmem>>, vector<1x8x32xf32>
    %138 = vector.shape_cast %137 : vector<1x8x32xf32> to vector<8x32xf32>
    %cst_54 = arith.constant dense<0.000000e+00> : vector<32x32xf32>
    %139 = tpu.matmul %136, %138, %cst_54 {dimension_numbers = #tpu.dot_dimension_numbers<[1], [0], [0], [1], [0, 0, 1, 1], [], []>} : vector<32x8xf32>, vector<8x32xf32>, vector<32x32xf32> -> vector<32x32xf32>
    %140 = arith.addf %134, %139 : vector<32x32xf32>
    %141 = vector.extract_strided_slice %100 {offsets = [0, 7, 0], sizes = [32, 1, 8], strides = [1, 1, 1]} : vector<32x8x8xf32> to vector<32x1x8xf32>
    %142 = vector.shape_cast %141 : vector<32x1x8xf32> to vector<32x8xf32>
    %c3_55 = arith.constant 3 : index
    %c0_56 = arith.constant 0 : index
    %c0_57 = arith.constant 0 : index
    %143 = vector.load %arg6[%c3_55, %c0_56, %c0_57] : memref<4x8x32xf32, #tpu.memory_space<vmem>>, vector<1x8x32xf32>
    %144 = vector.shape_cast %143 : vector<1x8x32xf32> to vector<8x32xf32>
    %cst_58 = arith.constant dense<0.000000e+00> : vector<32x32xf32>
    %145 = tpu.matmul %142, %144, %cst_58 {dimension_numbers = #tpu.dot_dimension_numbers<[1], [0], [0], [1], [0, 0, 1, 1], [], []>} : vector<32x8xf32>, vector<8x32xf32>, vector<32x32xf32> -> vector<32x32xf32>
    %146 = arith.addf %140, %145 : vector<32x32xf32>
    %147 = tpu.concatenate %123, %146 in 0 : vector<32x32xf32>, vector<32x32xf32> -> vector<64x32xf32>
    %c0_59 = arith.constant 0 : index
    %c0_60 = arith.constant 0 : index
    %148 = vector.load %arg8[%c0_59, %c0_60] : memref<64x64xf32, #tpu.memory_space<vmem>>, vector<64x64xf32>
    %cst_61 = arith.constant dense<0.000000e+00> : vector<64x32xf32>
    %149 = tpu.matmul %148, %147, %cst_61 {dimension_numbers = #tpu.dot_dimension_numbers<[1], [0], [0], [1], [0, 0, 1, 1], [], []>} : vector<64x64xf32>, vector<64x32xf32>, vector<64x32xf32> -> vector<64x32xf32>
    %c0_62 = arith.constant 0 : index
    %c0_63 = arith.constant 0 : index
    %150 = vector.load %arg0[%c0_62, %c0_63] : memref<64x32xf32, #tpu.memory_space<vmem>>, vector<64x32xf32>
    %151 = arith.addf %150, %149 : vector<64x32xf32>
    %c0_64 = arith.constant 0 : index
    %c0_65 = arith.constant 0 : index
    %152 = vector.load %arg7[%c0_64, %c0_65] : memref<1x32xf32, #tpu.memory_space<vmem>>, vector<1x32xf32>
    %153 = vector.shape_cast %152 : vector<1x32xf32> to vector<32xf32>
    %154 = vector.shape_cast %153 : vector<32xf32> to vector<1x32xf32>
    %155 = vector.broadcast %154 : vector<1x32xf32> to vector<64x32xf32>
    %156 = arith.addf %151, %155 : vector<64x32xf32>
    %c0_66 = arith.constant 0 : index
    %c0_67 = arith.constant 0 : index
    %157 = vector.load %arg9[%c0_66, %c0_67] : memref<1x32xf32, #tpu.memory_space<vmem>>, vector<1x32xf32>
    %158 = vector.shape_cast %157 : vector<1x32xf32> to vector<32xf32>
    %c0_68 = arith.constant 0 : index
    %c0_69 = arith.constant 0 : index
    %159 = vector.load %arg10[%c0_68, %c0_69] : memref<1x32xf32, #tpu.memory_space<vmem>>, vector<1x32xf32>
    %160 = vector.shape_cast %159 : vector<1x32xf32> to vector<32xf32>
    %cst_70 = arith.constant dense<0.000000e+00> : vector<64xf32>
    %161 = vector.multi_reduction <add>, %156, %cst_70 [1] : vector<64x32xf32> to vector<64xf32>
    %162 = vector.shape_cast %161 : vector<64xf32> to vector<64x1xf32>
    %cst_71 = arith.constant 3.200000e+01 : f32
    %163 = vector.broadcast %cst_71 : f32 to vector<64x1xf32>
    %164 = arith.divf %162, %163 : vector<64x1xf32>
    %165 = vector.broadcast %164 : vector<64x1xf32> to vector<64x32xf32>
    %166 = arith.subf %156, %165 : vector<64x32xf32>
    %167 = arith.mulf %166, %166 : vector<64x32xf32>
    %cst_72 = arith.constant dense<0.000000e+00> : vector<64xf32>
    %168 = vector.multi_reduction <add>, %167, %cst_72 [1] : vector<64x32xf32> to vector<64xf32>
    %169 = vector.shape_cast %168 : vector<64xf32> to vector<64x1xf32>
    %cst_73 = arith.constant 3.200000e+01 : f32
    %170 = vector.broadcast %cst_73 : f32 to vector<64x1xf32>
    %171 = arith.divf %169, %170 : vector<64x1xf32>
    %172 = vector.broadcast %164 : vector<64x1xf32> to vector<64x32xf32>
    %173 = arith.subf %156, %172 : vector<64x32xf32>
    %cst_74 = arith.constant 9.99999974E-6 : f32
    %174 = vector.broadcast %cst_74 : f32 to vector<64x1xf32>
    %175 = arith.addf %171, %174 : vector<64x1xf32>
    %176 = math.rsqrt %175 : vector<64x1xf32>
    %177 = vector.broadcast %176 : vector<64x1xf32> to vector<64x32xf32>
    %178 = arith.mulf %173, %177 : vector<64x32xf32>
    %179 = vector.shape_cast %158 : vector<32xf32> to vector<1x32xf32>
    %180 = vector.broadcast %179 : vector<1x32xf32> to vector<64x32xf32>
    %181 = arith.mulf %178, %180 : vector<64x32xf32>
    %182 = vector.shape_cast %160 : vector<32xf32> to vector<1x32xf32>
    %183 = vector.broadcast %182 : vector<1x32xf32> to vector<64x32xf32>
    %184 = arith.addf %181, %183 : vector<64x32xf32>
    %c0_75 = arith.constant 0 : index
    %c0_76 = arith.constant 0 : index
    %185 = vector.load %arg11[%c0_75, %c0_76] : memref<32x128xf32, #tpu.memory_space<vmem>>, vector<32x128xf32>
    %cst_77 = arith.constant dense<0.000000e+00> : vector<64x128xf32>
    %186 = tpu.matmul %184, %185, %cst_77 {dimension_numbers = #tpu.dot_dimension_numbers<[1], [0], [0], [1], [0, 0, 1, 1], [], []>} : vector<64x32xf32>, vector<32x128xf32>, vector<64x128xf32> -> vector<64x128xf32>
    %c0_78 = arith.constant 0 : index
    %c0_79 = arith.constant 0 : index
    %187 = vector.load %arg12[%c0_78, %c0_79] : memref<1x128xf32, #tpu.memory_space<vmem>>, vector<1x128xf32>
    %188 = vector.shape_cast %187 : vector<1x128xf32> to vector<128xf32>
    %189 = vector.shape_cast %188 : vector<128xf32> to vector<1x128xf32>
    %190 = vector.broadcast %189 : vector<1x128xf32> to vector<64x128xf32>
    %191 = arith.addf %186, %190 : vector<64x128xf32>
    %cst_80 = arith.constant 5.000000e-01 : f32
    %192 = vector.broadcast %cst_80 : f32 to vector<64x128xf32>
    %193 = arith.mulf %192, %191 : vector<64x128xf32>
    %cst_81 = arith.constant 0.707106769 : f32
    %194 = vector.broadcast %cst_81 : f32 to vector<64x128xf32>
    %195 = arith.mulf %191, %194 : vector<64x128xf32>
    %cst_82 = arith.constant 0.000000e+00 : f32
    %196 = vector.broadcast %cst_82 : f32 to vector<64x128xf32>
    %197 = arith.cmpf oge, %195, %196 : vector<64x128xf32>
    %cst_83 = arith.constant 1.000000e+00 : f32
    %cst_84 = arith.constant -1.000000e+00 : f32
    %198 = vector.broadcast %cst_83 : f32 to vector<64x128xf32>
    %199 = vector.broadcast %cst_84 : f32 to vector<64x128xf32>
    %200 = arith.select %197, %198, %199 : vector<64x128xi1>, vector<64x128xf32>
    %201 = math.absf %195 : vector<64x128xf32>
    %cst_85 = arith.constant 0.327591091 : f32
    %202 = vector.broadcast %cst_85 : f32 to vector<64x128xf32>
    %203 = arith.mulf %202, %201 : vector<64x128xf32>
    %cst_86 = arith.constant 1.000000e+00 : f32
    %204 = vector.broadcast %cst_86 : f32 to vector<64x128xf32>
    %205 = arith.addf %204, %203 : vector<64x128xf32>
    %cst_87 = arith.constant 1.000000e+00 : f32
    %206 = vector.broadcast %cst_87 : f32 to vector<64x128xf32>
    %207 = arith.divf %206, %205 : vector<64x128xf32>
    %cst_88 = arith.constant 1.06140542 : f32
    %208 = vector.broadcast %cst_88 : f32 to vector<64x128xf32>
    %209 = arith.mulf %208, %207 : vector<64x128xf32>
    %cst_89 = arith.constant -1.45315206 : f32
    %210 = vector.broadcast %cst_89 : f32 to vector<64x128xf32>
    %211 = arith.addf %209, %210 : vector<64x128xf32>
    %212 = arith.mulf %211, %207 : vector<64x128xf32>
    %cst_90 = arith.constant 1.42141378 : f32
    %213 = vector.broadcast %cst_90 : f32 to vector<64x128xf32>
    %214 = arith.addf %212, %213 : vector<64x128xf32>
    %215 = arith.mulf %214, %207 : vector<64x128xf32>
    %cst_91 = arith.constant -0.284496725 : f32
    %216 = vector.broadcast %cst_91 : f32 to vector<64x128xf32>
    %217 = arith.addf %215, %216 : vector<64x128xf32>
    %218 = arith.mulf %217, %207 : vector<64x128xf32>
    %cst_92 = arith.constant 0.254829586 : f32
    %219 = vector.broadcast %cst_92 : f32 to vector<64x128xf32>
    %220 = arith.addf %218, %219 : vector<64x128xf32>
    %221 = arith.mulf %220, %207 : vector<64x128xf32>
    %cst_93 = arith.constant 0.000000e+00 : f32
    %222 = vector.broadcast %cst_93 : f32 to vector<64x128xf32>
    %223 = arith.subf %222, %201 : vector<64x128xf32>
    %224 = arith.mulf %223, %201 : vector<64x128xf32>
    %225 = math.exp %224 : vector<64x128xf32>
    %226 = arith.mulf %221, %225 : vector<64x128xf32>
    %cst_94 = arith.constant 1.000000e+00 : f32
    %227 = vector.broadcast %cst_94 : f32 to vector<64x128xf32>
    %228 = arith.subf %227, %226 : vector<64x128xf32>
    %229 = arith.mulf %200, %228 : vector<64x128xf32>
    %cst_95 = arith.constant 1.000000e+00 : f32
    %230 = vector.broadcast %cst_95 : f32 to vector<64x128xf32>
    %231 = arith.addf %230, %229 : vector<64x128xf32>
    %232 = arith.mulf %193, %231 : vector<64x128xf32>
    %c0_96 = arith.constant 0 : index
    %c0_97 = arith.constant 0 : index
    %233 = vector.load %arg13[%c0_96, %c0_97] : memref<128x32xf32, #tpu.memory_space<vmem>>, vector<128x32xf32>
    %cst_98 = arith.constant dense<0.000000e+00> : vector<64x32xf32>
    %234 = tpu.matmul %232, %233, %cst_98 {dimension_numbers = #tpu.dot_dimension_numbers<[1], [0], [0], [1], [0, 0, 1, 1], [], []>} : vector<64x128xf32>, vector<128x32xf32>, vector<64x32xf32> -> vector<64x32xf32>
    %c0_99 = arith.constant 0 : index
    %c0_100 = arith.constant 0 : index
    %235 = vector.load %arg14[%c0_99, %c0_100] : memref<1x32xf32, #tpu.memory_space<vmem>>, vector<1x32xf32>
    %236 = vector.shape_cast %235 : vector<1x32xf32> to vector<32xf32>
    %237 = vector.shape_cast %236 : vector<32xf32> to vector<1x32xf32>
    %238 = vector.broadcast %237 : vector<1x32xf32> to vector<64x32xf32>
    %239 = arith.addf %234, %238 : vector<64x32xf32>
    %240 = arith.addf %156, %239 : vector<64x32xf32>
    %c0_101 = arith.constant 0 : index
    %c0_102 = arith.constant 0 : index
    %241 = vector.load %arg15[%c0_101, %c0_102] : memref<64x32xf32, #tpu.memory_space<vmem>>, vector<64x32xf32>
    tpu.vector_store %arg15[%c0_101, %c0_102], %240 {strides = array<i32>} : memref<64x32xf32, #tpu.memory_space<vmem>>, vector<64x32xf32>,
    return
  }
}

</mosaic_0001>

<bundles_post_ra>
// kernel: block2_forward.1
= control target key start
LH: loop header
LB: loop body
LE: loop exit
PB: predicated region body
PF: predicated region fallthrough
CT: control target
= control target key end

     0   :  { %20 = vsyncpa [#allocation3], 0  ;;  %s7455_s0 = inlined_call_operand.vmem [shape: f32[64,32], index: 0, kind: input, shape index: {}]   ;;  %s7456_s1 = inlined_call_operand.vmem [shape: f32[64,32], index: 1, kind: input, shape index: {}]   ;;  %s7457_s2 = inlined_call_operand.vmem [shape: f32[1,32], index: 2, kind: input, shape index: {}]   ;;  %s7458_s3 = inlined_call_operand.vmem [shape: f32[1,32], index: 3, kind: input, shape index: {}]   ;;  %s7459_s4 = inlined_call_operand.vmem [shape: f32[32,32], index: 4, kind: input, shape index: {}]   ;;  %s7460_s5 = inlined_call_operand.hbm [shape: f32[32,64], index: 5, kind: input, shape index: {}]   ;;  %s7461_s6 = inlined_call_operand.hbm [shape: f32[4,8,32], index: 6, kind: input, shape index: {}]   ;;  %s7462_s7 = inlined_call_operand.vmem [shape: f32[1,32], index: 7, kind: input, shape index: {}]   ;;  %s7463_s8 = inlined_call_operand.hbm [shape: f32[64,64], index: 8, kind: input, shape index: {}]   ;;  %s7464_s9 = inlined_call_operand.vmem [shape: f32[1,32], index: 9, kind: input, shape index: {}]   ;;  %s7465_s10 = inlined_call_operand.hbm [shape: f32[1,32], index: 10, kind: input, shape index: {}]   ;;  %s7466_s11 = inlined_call_operand.hbm [shape: f32[32,128], index: 11, kind: input, shape index: {}]   ;;  %s7467_s12 = inlined_call_operand.vmem [shape: f32[1,128], index: 12, kind: input, shape index: {}]   ;;  %s7468_s13 = inlined_call_operand.vmem [shape: f32[128,32], index: 13, kind: input, shape index: {}]   ;;  %s7469_s14 = inlined_call_operand.hbm [shape: f32[1,32], index: 14, kind: input, shape index: {}]   ;;  %s7470_s15 = inlined_call_operand.hbm [shape: f32[64,32], index: 15, kind: output, shape index: {}]  }
   0x1   :  { %21 = vsyncpa [#allocation6], 0 }
   0x2   :  { %22 = vsyncpa [#allocation9], 0 }
   0x3   :  { %23 = vsyncpa [#allocation12], 0 }
   0x4   :  { %24 = vsyncpa [#allocation4], 0  ;;  %s52_s20 = sshll.u32 %s7461_s6, 4  ;;  %s5011_s21 = smov [#allocation5]   ;;  %s53_s20 = int_to_ptr.hbm [resolvable:$true] %s52_s20 }
   0x5   :  { %s54_s22 = sshll.u32 %s5011_s21, 4  ;;  %s83_s25 = sshll.u32 %s7465_s10, 4  ;;  %s55_s22 = int_to_ptr.vmem [resolvable:$true] %s54_s22  ;;  %s84_s25 = int_to_ptr.hbm [resolvable:$true] %s83_s25 }
   0x6   :  { %s5012_s26 = smov 128   ;;  %s5013_s27 = smov 8  }
   0x7   :  { %60 = dma.hbm_to_vmem [thread:$0]  %s53_s20, 512, %s55_s22, [#allocation6], %s5012_s26, %s5012_s26, %s5013_s27  }
   0x8   :  { %s5014_s28 = smov [#allocation8]   ;;  %s39_s6 = sshll.u32 %s7460_s5, 4  ;;  %s40_s6 = int_to_ptr.hbm [resolvable:$true] %s39_s6 }
   0x9   :  { %s85_s29 = sshll.u32 %s5014_s28, 4  ;;  %s67_s10 = sshll.u32 %s7463_s8, 4  ;;  %s86_s29 = int_to_ptr.vmem [resolvable:$true] %s85_s29  ;;  %s68_s10 = int_to_ptr.hbm [resolvable:$true] %s67_s10 }
   0xa   :  { %88 = dma.hbm_to_vmem [thread:$0]  %s84_s25, 16, %s86_s29, [#allocation9]  }
   0xb   :  { %s5015_s19 = smov [#allocation2]   ;;  %s5016_s20 = smov [#allocation7]  }
   0xc   :  { %s41_s21 = sshll.u32 %s5015_s19, 4  ;;  %s69_s22 = sshll.u32 %s5016_s20, 4  ;;  %s42_s21 = int_to_ptr.vmem [resolvable:$true] %s41_s21  ;;  %s70_s22 = int_to_ptr.vmem [resolvable:$true] %s69_s22 }
   0xd   :  { %47 = dma.hbm_to_vmem [thread:$0]  %s40_s6, 512, %s42_s21, [#allocation3], %s5012_s26, %s5012_s26, %s5013_s27  }
   0xe   :  { %s93_s5 = sshll.u32 %s7466_s11, 4  ;;  %s111_s28 = sshll.u32 %s7469_s14, 4  ;;  %s94_s5 = int_to_ptr.hbm [resolvable:$true] %s93_s5  ;;  %s112_s28 = int_to_ptr.hbm [resolvable:$true] %s111_s28 }
   0xf   :  { %75 = dma.hbm_to_vmem [thread:$0]  %s68_s10, 1024, %s70_s22, [#allocation6], %s5012_s26, %s5012_s26, %s5013_s27  }
  0x10   :  { %s5017_s29 = smov [#allocation10]   ;;  %s5018_s16 = smov [#allocation11]  }
  0x11   :  { %s95_s30 = sshll.u32 %s5017_s29, 4  ;;  %s113_s11 = sshll.u32 %s5018_s16, 4  ;;  %s96_s30 = int_to_ptr.vmem [resolvable:$true] %s95_s30  ;;  %s114_s11 = int_to_ptr.vmem [resolvable:$true] %s113_s11 }
  0x12   :  { %101 = dma.hbm_to_vmem [thread:$0]  %s94_s5, 512, %s96_s30, [#allocation9], %s5012_s26, %s5012_s26, %s5013_s27  }
  0x13   :  { %116 = dma.hbm_to_vmem [thread:$0]  %s112_s28, 16, %s114_s11, [#allocation12]  }
  0x14   :  { %5001 = dma.done.wait [#allocation3], 512  }
  0x15   :  { %5002 = vsyncadd [#allocation3], 4294966784 }
  0x16   :  { %5003 = dma.done.wait [#allocation6], 1536  }
  0x17   :  { %5004 = vsyncadd [#allocation6], 4294965760 }
  0x18   :  { %5005 = dma.done.wait [#allocation9], 528  }
  0x19   :  { %5006 = vsyncadd [#allocation9], 4294966768 }
  0x1a   :  { %5007 = dma.done.wait [#allocation12], 16  }
  0x1b   :  { %5008 = vsyncadd [#allocation12], 4294967280  ;;  %vm151_vm0 = vcmask 261120   ;;  %v142_v0 = vld [vmem:[%s7455_s0 + $0x8] sm:$0xff]  ;;  %v141_v1 = vld [vmem:[%s7455_s0] sm:$0xff]  ;;  %v5019_v30 = vmov 32.0  }
  0x1c   :  { %v5145_v2 = vld [vmem:[%s7455_s0 + $0x10] sm:$0xff]  ;;  %v155_v3 = vsel %vm151_vm0, %v142_v0, 0.0  ;;  %v152_v4 = vsel %vm151_vm0, %v141_v1, 0.0  ;;  %v5154_v6 = vld [vmem:[%s7456_s1 + $0x8] sm:$0xff]  ;;  %v5159_v7 = vld [vmem:[%s7456_s1] sm:$0xff]  ;;  %4623 = vrcp.f32 %v5019_v30  ;;  %s5021_s18 = smov 120  }
  0x1d   :  { %v158_v5 = vsel %vm151_vm0, %v5145_v2, 0.0  ;;  %156 = vadd.xlane.f32.xlu1 %v155_v3  ;;  %153 = vadd.xlane.f32.xlu0 %v152_v4  ;;  %v5164_v8 = vld [vmem:[%s7456_s1 + $0x10] sm:$0xff]  ;;  %v368_v9 = vsel %vm151_vm0, %v5154_v6, 0.0  ;;  %v365_v10 = vsel %vm151_vm0, %v5159_v7, 0.0  ;;  %v5175_v12 = vld [vmem:[%s7456_s1 + $0x18] sm:$0xff]  ;;  %v5185_v14 = vld [vmem:[%s7455_s0 + $0x20] sm:$0xff] }
  0x1e   :  { %159 = vadd.xlane.f32.xlu2 %v158_v5  ;;  %v371_v11 = vsel %vm151_vm0, %v5164_v8, 0.0  ;;  %v5180_v13 = vld [vmem:[%s7455_s0 + $0x18] sm:$0xff]  ;;  %v374_v15 = vsel %vm151_vm0, %v5175_v12, 0.0  ;;  %v164_v17 = vsel %vm151_vm0, %v5185_v14, 0.0  ;;  %v5196_v18 = vld [vmem:[%s7455_s0 + $0x28] sm:$0xff]  ;;  %v5201_v19 = vld [vmem:[%s7456_s1 + $0x20] sm:$0xff] }
  0x1f   :  { %v161_v16 = vsel %vm151_vm0, %v5180_v13, 0.0  ;;  %v5206_v20 = vld [vmem:[%s7456_s1 + $0x28] sm:$0xff]  ;;  %v167_v21 = vsel %vm151_vm0, %v5196_v18, 0.0  ;;  %v377_v22 = vsel %vm151_vm0, %v5201_v19, 0.0  ;;  %v5217_v24 = vld [vmem:[%s7455_s0 + $0x30] sm:$0xff]  ;;  %v5231_v28 = vld [vmem:[%s7456_s1 + $0x38] sm:$0xff] }
  0x20   :  { %v380_v23 = vsel %vm151_vm0, %v5206_v20, 0.0  ;;  %v5222_v25 = vld [vmem:[%s7456_s1 + $0x30] sm:$0xff]  ;;  %v170_v26 = vsel %vm151_vm0, %v5217_v24, 0.0  ;;  %v386_v29 = vsel %vm151_vm0, %v5231_v28, 0.0  ;;  %v5275_v5 = vld [vmem:[%s7455_s0 + $0x38] sm:$0xff]  ;;  %s5022_s10 = smov 104  }
  0x21   :  { %v383_v27 = vsel %vm151_vm0, %v5222_v25, 0.0  ;;  %s5023_s19 = smov 96   ;;  %s4344_s23 = sshll.u32 %s7470_s15, 4  ;;  %s4345_s23 = int_to_ptr.hbm [resolvable:$true] %s4344_s23 }
  0x22   :  { %v4624_v31 = vpop.eup %4623 }
  0x23   :  { %v177_v32 = vmul.f32 32.0, %v4624_v31  ;;  %vm181_vm1 = vweird.f32 %v4624_v31 }
  0x25   :  { %369 = vadd.xlane.f32.xlu1 %v368_v9  ;;  %366 = vadd.xlane.f32.xlu0 %v365_v10  ;;  %v178_v33 = vsub.f32 1.0, %v177_v32  ;;  %v173_v10 = vsel %vm151_vm0, %v5275_v5, 0.0 }
  0x26   :  { %372 = vadd.xlane.f32.xlu2 %v371_v11 }
  0x27   :  { %v179_v34 = vmul.f32 %v4624_v31, %v178_v33 }
  0x29   :  { %v180_v35 = vadd.f32 %v4624_v31, %v179_v34 }
  0x2b   :  { %v5235_v36 = vsel %vm181_vm1, %v4624_v31, %v180_v35 }
  0x2d   :  { %375 = vadd.xlane.f32.xlu1 %v374_v15  ;;  %162 = vadd.xlane.f32.xlu0 %v161_v16 }
  0x2e   :  { %165 = vadd.xlane.f32.xlu2 %v164_v17 }
  0x35   :  { %168 = vadd.xlane.f32.xlu1 %v167_v21  ;;  %378 = vadd.xlane.f32.xlu0 %v377_v22 }
  0x36   :  { %381 = vadd.xlane.f32.xlu2 %v380_v23 }
  0x3d   :  { %171 = vadd.xlane.f32.xlu1 %v170_v26  ;;  %384 = vadd.xlane.f32.xlu0 %v383_v27 }
  0x45   :  { %387 = vadd.xlane.f32.xlu1 %v386_v29 }
  0x90   :  { %v157_v37 = vpop.xlane.xlu1 %156  ;;  %v154_v38 = vpop.xlane.xlu0 %153 }
  0x91   :  { %v184_v39 = vmul.f32 %v5235_v36, %v157_v37  ;;  %v183_v40 = vmul.f32 %v5235_v36, %v154_v38  ;;  %v160_v41 = vpop.xlane.xlu2 %159 }
  0x92   :  { %v185_v61 = vmul.f32 %v5235_v36, %v160_v41 }
  0x93   :  { %v5239_v42 = vsub.f32 %v142_v0, %v184_v39  ;;  %v5241_v43 = vsub.f32 %v141_v1, %v183_v40 }
  0x95   :  { %v200_v44 = vmul.f32 %v5239_v42, %v5239_v42  ;;  %v199_v45 = vmul.f32 %v5241_v43, %v5241_v43 }
  0x97   :  { %v210_v46 = vsel %vm151_vm0, %v200_v44, 0.0  ;;  %v207_v47 = vsel %vm151_vm0, %v199_v45, 0.0 }
  0x98   :  { %211 = vadd.xlane.f32.xlu1 %v210_v46  ;;  %v370_v48 = vpop.xlane.xlu1 %369  ;;  %208 = vadd.xlane.f32.xlu0 %v207_v47  ;;  %v367_v49 = vpop.xlane.xlu0 %366 }
  0x99   :  { %v390_v50 = vmul.f32 %v370_v48, %v5235_v36  ;;  %v389_v51 = vmul.f32 %v367_v49, %v5235_v36  ;;  %v373_v52 = vpop.xlane.xlu2 %372 }
  0x9a   :  { %v391_v53 = vmul.f32 %v373_v52, %v5235_v36 }
  0x9b   :  { %v5253_v54 = vsub.f32 %v5154_v6, %v390_v50  ;;  %v5256_v55 = vsub.f32 %v5159_v7, %v389_v51  ;;  %v5281_v7 = vsub.f32 %v5145_v2, %v185_v61 }
  0x9c   :  { %v5259_v56 = vsub.f32 %v5164_v8, %v391_v53 }
  0x9d   :  { %v406_v57 = vmul.f32 %v5253_v54, %v5253_v54  ;;  %v405_v58 = vmul.f32 %v5256_v55, %v5256_v55  ;;  %v201_v2 = vmul.f32 %v5281_v7, %v5281_v7 }
  0x9e   :  { %v407_v3 = vmul.f32 %v5259_v56, %v5259_v56 }
  0x9f   :  { %v416_v59 = vsel %vm151_vm0, %v406_v57, 0.0  ;;  %v413_v60 = vsel %vm151_vm0, %v405_v58, 0.0  ;;  %v213_v27 = vsel %vm151_vm0, %v201_v2, 0.0  ;;  %v628_v58 = vld [vmem:[#allocation2 + $0x10] sm:$0xff] }
  0xa0   :  { %v376_v62 = vpop.xlane.xlu1 %375  ;;  %417 = vadd.xlane.f32.xlu0 %v416_v59  ;;  %414 = vadd.xlane.f32.xlu2 %v413_v60  ;;  %v163_v63 = vpop.xlane.xlu0 %162  ;;  %v419_v9 = vsel %vm151_vm0, %v407_v3, 0.0  ;;  %v627_v59 = vld [vmem:[#allocation2 + $0x8] sm:$0xff]  ;;  %v626_v60 = vld [vmem:[#allocation2] sm:$0xff] }
  0xa1   :  { %v186_v0 = vmul.f32 %v5235_v36, %v163_v63  ;;  %v166_v1 = vpop.xlane.xlu2 %165 }
  0xa2   :  { %v187_v4 = vmul.f32 %v5235_v36, %v166_v1 }
  0xa3   :  { %v5278_v6 = vsub.f32 %v5180_v13, %v186_v0  ;;  %v560_v0 = vld [vmem:[%s7459_s4 + $0x18] sm:$0xff] }
  0xa4   :  { %v5284_v8 = vsub.f32 %v5185_v14, %v187_v4  ;;  %v392_v14 = vmul.f32 %v376_v62, %v5235_v36  ;;  %597 = vmatpush.msra.mxu0 %v560_v0  ;;  %v559_v4 = vld [vmem:[%s7459_s4 + $0x10] sm:$0xff] }
  0xa5   :  { %v202_v11 = vmul.f32 %v5278_v6, %v5278_v6 }
  0xa6   :  { %v203_v22 = vmul.f32 %v5284_v8, %v5284_v8  ;;  %v5304_v29 = vsub.f32 %v5175_v12, %v392_v14  ;;  %598 = vmatpush.msra.mxu0 %v559_v4 }
  0xa7   :  { %v216_v15 = vsel %vm151_vm0, %v202_v11, 0.0 }
  0xa8   :  { %v169_v16 = vpop.xlane.xlu1 %168  ;;  %420 = vadd.xlane.f32.xlu0 %v419_v9  ;;  %174 = vadd.xlane.f32.xlu2 %v173_v10  ;;  %v379_v13 = vpop.xlane.xlu0 %378  ;;  %v219_v31 = vsel %vm151_vm0, %v203_v22, 0.0  ;;  %v558_v9 = vld [vmem:[%s7459_s4 + $0x8] sm:$0xff]  ;;  %v557_v10 = vld [vmem:[%s7459_s4] sm:$0xff] }
  0xa9   :  { %217 = vadd.xlane.f32.xlu1 %v216_v15  ;;  %v393_v17 = vmul.f32 %v379_v13, %v5235_v36  ;;  %v382_v21 = vpop.xlane.xlu2 %381  ;;  %599 = vmatpush.msra.mxu0 %v558_v9 }
  0xaa   :  { %v394_v23 = vmul.f32 %v382_v21, %v5235_v36 }
  0xab   :  { %v5300_v26 = vsub.f32 %v5201_v19, %v393_v17  ;;  %v188_v19 = vmul.f32 %v5235_v36, %v169_v16  ;;  %600 = vmatpush.msra.mxu0 %v557_v10 }
  0xac   :  { %v5307_v30 = vsub.f32 %v5206_v20, %v394_v23  ;;  %v408_v20 = vmul.f32 %v5304_v29, %v5304_v29 }
  0xad   :  { %v409_v32 = vmul.f32 %v5300_v26, %v5300_v26  ;;  %v5323_v38 = vsub.f32 %v5196_v18, %v188_v19 }
  0xae   :  { %v410_v12 = vmul.f32 %v5307_v30, %v5307_v30  ;;  %v422_v40 = vsel %vm151_vm0, %v408_v20, 0.0 }
  0xaf   :  { %v425_v33 = vsel %vm151_vm0, %v409_v32, 0.0  ;;  %v204_v18 = vmul.f32 %v5323_v38, %v5323_v38 }
  0xb0   :  { %v172_v34 = vpop.xlane.xlu1 %171  ;;  %220 = vadd.xlane.f32.xlu0 %v219_v31  ;;  %214 = vadd.xlane.f32.xlu2 %v213_v27  ;;  %v428_v39 = vsel %vm151_vm0, %v410_v12, 0.0  ;;  %v385_v44 = vpop.xlane.xlu0 %384 }
  0xb1   :  { %v189_v35 = vmul.f32 %v5235_v36, %v172_v34  ;;  %426 = vadd.xlane.f32.xlu1 %v425_v33  ;;  %v222_v49 = vsel %vm151_vm0, %v204_v18, 0.0 }
  0xb3   :  { %v5320_v37 = vsub.f32 %v5217_v24, %v189_v35  ;;  %v395_v24 = vmul.f32 %v385_v44, %v5235_v36 }
  0xb5   :  { %v205_v41 = vmul.f32 %v5320_v37, %v5320_v37  ;;  %v5341_v51 = vsub.f32 %v5222_v25, %v395_v24 }
  0xb7   :  { %v225_v45 = vsel %vm151_vm0, %v205_v41, 0.0  ;;  %v411_v53 = vmul.f32 %v5341_v51, %v5341_v51 }
  0xb8   :  { %v388_v46 = vpop.xlane.xlu1 %387  ;;  %429 = vadd.xlane.f32.xlu0 %v428_v39  ;;  %423 = vadd.xlane.f32.xlu2 %v422_v40 }
  0xb9   :  { %v396_v47 = vmul.f32 %v388_v46, %v5235_v36  ;;  %226 = vadd.xlane.f32.xlu1 %v225_v45  ;;  %v431_v57 = vsel %vm151_vm0, %v411_v53, 0.0 }
  0xbb   :  { %v5335_v48 = vsub.f32 %v5231_v28, %v396_v47  ;;  %v629_v28 = vld [vmem:[#allocation2 + $0x18] sm:$0xff] }
  0xbc   :  { %666 = vmatpush.msra.mxu1 %v629_v28  ;;  %v5401_v28 = vld [vmem:[%s7457_s2] ss:$0 sm:$0xff] }
  0xbd   :  { %v412_v50 = vmul.f32 %v5335_v48, %v5335_v48 }
  0xbe   :  { %667 = vmatpush.msra.mxu1 %v628_v58 }
  0xbf   :  { %v434_v52 = vsel %vm151_vm0, %v412_v50, 0.0 }
  0xc0   :  { %223 = vadd.xlane.f32.xlu2 %v222_v49  ;;  %668 = vmatpush.msra.mxu1 %v627_v59 }
  0xc1   :  { %435 = vadd.xlane.f32.xlu1 %v434_v52 }
  0xc2   :  { %669 = vmatpush.msra.mxu1 %v626_v60 }
  0xc8   :  { %432 = vadd.xlane.f32.xlu2 %v431_v57 }
 0x10b   :  { %v212_v25 = vpop.xlane.xlu1 %211  ;;  %v209_v61 = vpop.xlane.xlu0 %208 }
 0x10c   :  { %v232_v62 = vmul.f32 %v212_v25, %v5235_v36  ;;  %v231_v63 = vmul.f32 %v209_v61, %v5235_v36 }
 0x10e   :  { %v240_v1 = vadd.f32 1e-05, %v232_v62  ;;  %v239_v3 = vadd.f32 1e-05, %v231_v63 }
 0x110   :  { %4625 = vrsqrt.f32 %v240_v1  ;;  %vm253_vm3 = vweird.f32 %v239_v3  ;;  %vm263_vm4 = vweird.f32 %v240_v1 }
 0x111   :  { %4627 = vrsqrt.f32 %v239_v3 }
 0x113   :  { %v415_v11 = vpop.xlane.xlu2 %414  ;;  %v418_v15 = vpop.xlane.xlu0 %417 }
 0x114   :  { %v437_v16 = vmul.f32 %v415_v11, %v5235_v36  ;;  %v438_v13 = vmul.f32 %v418_v15, %v5235_v36 }
 0x116   :  { %v5363_v2 = vpop.eup %4625  ;;  %v5365_v14 = vadd.f32 1e-05, %v437_v16  ;;  %v5367_v17 = vadd.f32 1e-05, %v438_v13  ;;  %v5424_v13 = vld [vmem:[%s7458_s3] ss:$0 sm:$0xff] }
 0x117   :  { %v4628_v21 = vpop.eup %4627  ;;  %v258_v22 = vmul.f32 %v5363_v2, %v240_v1  ;;  %vm264_vm5 = vweird.f32 %v5363_v2  ;;  %s5020_s3 = smov 112  }
 0x118   :  { %v248_v23 = vmul.f32 %v4628_v21, %v239_v3  ;;  %4629 = vrsqrt.f32 %v5365_v14  ;;  %vm254_vm2 = vweird.f32 %v4628_v21  ;;  %vm5405_vm7 = vmor %vm263_vm4, %vm264_vm5  ;;  %vm459_vm9 = vweird.f32 %v5365_v14 }
 0x119   :  { %v259_v27 = vmul.f32 %v5363_v2, %v258_v22  ;;  %4631 = vrsqrt.f32 %v5367_v17  ;;  %vm255_vm6 = vmor %vm253_vm3, %vm254_vm2  ;;  %vm469_vm10 = vweird.f32 %v5367_v17 }
 0x11a   :  { %v249_v31 = vmul.f32 %v4628_v21, %v248_v23 }
 0x11b   :  { %v260_v32 = vmul.f32 0.5, %v259_v27  ;;  %v175_v33 = vpop.xlane.xlu2 %174  ;;  %v421_v34 = vpop.xlane.xlu0 %420 }
 0x11c   :  { %v250_v19 = vmul.f32 0.5, %v249_v31  ;;  %v190_v35 = vmul.f32 %v5235_v36, %v175_v33  ;;  %v218_v12 = vpop.xlane.xlu1 %217  ;;  %v439_v20 = vmul.f32 %v421_v34, %v5235_v36 }
 0x11d   :  { %v234_v39 = vmul.f32 %v218_v12, %v5235_v36  ;;  %v261_v47 = vsub.f32 1.5, %v260_v32 }
 0x11e   :  { %v5376_v40 = vpop.eup %4629  ;;  %v251_v41 = vsub.f32 1.5, %v250_v19  ;;  %v5379_v44 = vsub.f32 %v5275_v5, %v190_v35  ;;  %v5381_v45 = vadd.f32 1e-05, %v439_v20 }
 0x11f   :  { %v5383_v46 = vpop.eup %4631  ;;  %v454_v18 = vmul.f32 %v5376_v40, %v5365_v14  ;;  %v5387_v24 = vadd.f32 1e-05, %v234_v39  ;;  %v262_v58 = vmul.f32 %v5363_v2, %v261_v47  ;;  %vm460_vm8 = vweird.f32 %v5376_v40 }
 0x120   :  { %v252_v49 = vmul.f32 %v4628_v21, %v251_v41  ;;  %v464_v50 = vmul.f32 %v5383_v46, %v5367_v17  ;;  %4633 = vrsqrt.f32 %v5381_v45  ;;  %v206_v53 = vmul.f32 %v5379_v44, %v5379_v44  ;;  %vm461_vm12 = vmor %vm459_vm9, %vm460_vm8 }
 0x121   :  { %v455_v5 = vmul.f32 %v5376_v40, %v454_v18  ;;  %4635 = vrsqrt.f32 %v5387_v24  ;;  %v266_v22 = vsel %vm5405_vm7, %v5363_v2, %v262_v58  ;;  %vm470_vm11 = vweird.f32 %v5383_v46 }
 0x122   :  { %v465_v52 = vmul.f32 %v5383_v46, %v464_v50  ;;  %v256_v57 = vsel %vm255_vm6, %v4628_v21, %v252_v49  ;;  %v228_v0 = vsel %vm151_vm0, %v206_v53, 0.0  ;;  %v328_v19 = vmul.f32 %v266_v22, %v5239_v42  ;;  %vm5459_vm13 = vmor %vm469_vm10, %vm470_vm11 }
 0x123   :  { %v456_v59 = vmul.f32 0.5, %v455_v5  ;;  %v215_v60 = vpop.xlane.xlu2 %214  ;;  %v221_v25 = vpop.xlane.xlu0 %220  ;;  %v327_v61 = vmul.f32 %v256_v57, %v5241_v43  ;;  %229 = vadd.xlane.f32.xlu0 %v228_v0  ;;  %vm479_vm14 = vweird.f32 %v5381_v45  ;;  %vm283_vm4 = vweird.f32 %v5387_v24 }
 0x124   :  { %v466_v63 = vmul.f32 0.5, %v465_v52  ;;  %v233_v1 = vmul.f32 %v215_v60, %v5235_v36  ;;  %v427_v3 = vpop.xlane.xlu1 %426  ;;  %v235_v4 = vmul.f32 %v221_v25, %v5235_v36  ;;  %v339_v52 = vmul.f32 %v5401_v28, %v328_v19 }
 0x125   :  { %v457_v9 = vsub.f32 1.5, %v456_v59  ;;  %v441_v10 = vmul.f32 %v427_v3, %v5235_v36  ;;  %v338_v16 = vmul.f32 %v5401_v28, %v327_v61 }
 0x126   :  { %v5413_v11 = vpop.eup %4633  ;;  %v5416_v43 = vadd.f32 1e-05, %v233_v1  ;;  %v5418_v15 = vadd.f32 1e-05, %v235_v4  ;;  %v467_v27 = vsub.f32 1.5, %v466_v63  ;;  %v350_v63 = vadd.f32 %v5424_v13, %v339_v52 }
 0x127   :  { %v5426_v21 = vpop.eup %4635  ;;  %v458_v23 = vmul.f32 %v5376_v40, %v457_v9  ;;  %v474_v31 = vmul.f32 %v5413_v11, %v5381_v45  ;;  %v5435_v32 = vadd.f32 1e-05, %v441_v10  ;;  %v349_v34 = vadd.f32 %v5424_v13, %v338_v16 }
 0x128   :  { %4637 = vrsqrt.f32 %v5416_v43  ;;  %v278_v2 = vmul.f32 %v5426_v21, %v5387_v24  ;;  %v468_v14 = vmul.f32 %v5383_v46, %v467_v27  ;;  %vm480_vm15 = vweird.f32 %v5413_v11 }
 0x129   :  { %v475_v33 = vmul.f32 %v5413_v11, %v474_v31  ;;  %4639 = vrsqrt.f32 %v5418_v15  ;;  %v462_v20 = vsel %vm461_vm12, %v5376_v40, %v458_v23  ;;  %4368 = vmatmul.msk.f32.vlgmr.msra.gmra.mxu1 %vm151_vm0, %v349_v34  ;;  %vm273_vm1 = vweird.f32 %v5416_v43  ;;  %vm5504_vm2 = vmor %vm479_vm14, %vm480_vm15 }
 0x12a   :  { %4641 = vrsqrt.f32 %v5435_v32  ;;  %v533_v47 = vmul.f32 %v462_v20, %v5256_v55  ;;  %v279_v49 = vmul.f32 %v5426_v21, %v278_v2  ;;  %v472_v58 = vsel %vm5459_vm13, %v5383_v46, %v468_v14 }
 0x12b   :  { %v424_v35 = vpop.xlane.xlu2 %423  ;;  %v430_v12 = vpop.xlane.xlu0 %429  ;;  %v476_v18 = vmul.f32 0.5, %v475_v33  ;;  %v534_v46 = vmul.f32 %v472_v58, %v5253_v54  ;;  %vm284_vm5 = vweird.f32 %v5426_v21  ;;  %vm499_vm10 = vweird.f32 %v5435_v32 }
 0x12c   :  { %v440_v39 = vmul.f32 %v424_v35, %v5235_v36  ;;  %v442_v41 = vmul.f32 %v430_v12, %v5235_v36  ;;  %v227_v5 = vpop.xlane.xlu1 %226  ;;  %v541_v57 = vmul.f32 %v5401_v28, %v533_v47  ;;  %v280_v61 = vmul.f32 0.5, %v279_v49  ;;  %vm5542_vm8 = vmor %vm283_vm4, %vm284_vm5 }
 0x12d   :  { %v477_v59 = vsub.f32 1.5, %v476_v18  ;;  %v237_v62 = vmul.f32 %v227_v5, %v5235_v36  ;;  %v542_v19 = vmul.f32 %v5401_v28, %v534_v46  ;;  %vm293_vm11 = vweird.f32 %v5418_v15 }
 0x12e   :  { %v5463_v40 = vpop.eup %4637  ;;  %v5466_v50 = vadd.f32 1e-05, %v440_v39  ;;  %v5474_v17 = vadd.f32 1e-05, %v442_v41  ;;  %v549_v4 = vadd.f32 %v5424_v13, %v541_v57  ;;  %v281_v27 = vsub.f32 1.5, %v280_v61 }
 0x12f   :  { %v268_v55 = vmul.f32 %v5463_v40, %v5416_v43  ;;  %v5471_v53 = vpop.eup %4639  ;;  %v478_v10 = vmul.f32 %v5413_v11, %v477_v59  ;;  %vm274_vm3 = vweird.f32 %v5463_v40  ;;  %v5509_v31 = vadd.f32 1e-05, %v237_v62 }
 0x130   :  { %4643 = vrsqrt.f32 %v5466_v50  ;;  %v5481_v25 = vpop.eup %4641  ;;  %v288_v1 = vmul.f32 %v5471_v53, %v5418_v15  ;;  %4360 = vmatmul.msk.f32.vlgmr.msra.gmra.mxu0 %vm151_vm0, %v549_v4  ;;  %vm5524_vm6 = vmor %vm273_vm1, %vm274_vm3  ;;  %v282_v47 = vmul.f32 %v5426_v21, %v281_v27  ;;  %vm489_vm7 = vweird.f32 %v5466_v50 }
 0x131   :  { %v269_v60 = vmul.f32 %v5463_v40, %v268_v55  ;;  %4645 = vrsqrt.f32 %v5474_v17  ;;  %4369 = vmatmul.msk.f32.gmra.mxu1 %vm151_vm0, %v350_v63  ;;  %v494_v22 = vmul.f32 %v5481_v25, %v5435_v32  ;;  %v482_v39 = vsel %vm5504_vm2, %v5413_v11, %v478_v10 }
 0x132   :  { %v289_v2 = vmul.f32 %v5471_v53, %v288_v1  ;;  %v550_v49 = vadd.f32 %v5424_v13, %v542_v19  ;;  %v535_v55 = vmul.f32 %v482_v39, %v5259_v56  ;;  %vm294_vm13 = vweird.f32 %v5471_v53 }
 0x133   :  { %v270_v0 = vmul.f32 0.5, %v269_v60  ;;  %v224_v3 = vpop.xlane.xlu2 %223  ;;  %v495_v12 = vmul.f32 %v5481_v25, %v494_v22  ;;  %vm500_vm14 = vweird.f32 %v5481_v25  ;;  %vm5598_vm15 = vmor %vm293_vm11, %vm294_vm13  ;;  %vm509_vm4 = vweird.f32 %v5474_v17 }
 0x134   :  { %v236_v9 = vmul.f32 %v224_v3, %v5235_v36  ;;  %v436_v14 = vpop.xlane.xlu1 %435  ;;  %v290_v43 = vmul.f32 0.5, %v289_v2  ;;  %vm5612_vm1 = vmor %vm499_vm10, %vm500_vm14 }
 0x135   :  { %v271_v16 = vsub.f32 1.5, %v270_v0  ;;  %v444_v18 = vmul.f32 %v436_v14, %v5235_v36  ;;  %v496_v58 = vmul.f32 0.5, %v495_v12 }
 0x136   :  { %v5498_v23 = vpop.eup %4643  ;;  %v5512_v33 = vadd.f32 1e-05, %v236_v9  ;;  %v291_v62 = vsub.f32 1.5, %v290_v43 }
 0x137   :  { %v484_v34 = vmul.f32 %v5498_v23, %v5466_v50  ;;  %v272_v45 = vmul.f32 %v5463_v40, %v271_v16  ;;  %v5533_v41 = vpop.eup %4645  ;;  %vm490_vm9 = vweird.f32 %v5498_v23  ;;  %v5578_v3 = vadd.f32 1e-05, %v444_v18 }
 0x138   :  { %4647 = vrsqrt.f32 %v5512_v33  ;;  %v504_v60 = vmul.f32 %v5533_v41, %v5474_v17  ;;  %4361 = vmatmul.msk.f32.gmra.mxu0 %vm151_vm0, %v550_v49  ;;  %vm5570_vm12 = vmor %vm489_vm7, %vm490_vm9  ;;  %v497_v4 = vsub.f32 1.5, %v496_v58  ;;  %v292_v27 = vmul.f32 %v5471_v53, %v291_v62 }
 0x139   :  { %v485_v20 = vmul.f32 %v5498_v23, %v484_v34  ;;  %4649 = vrsqrt.f32 %v5509_v31  ;;  %v276_v57 = vsel %vm5524_vm6, %v5463_v40, %v272_v45  ;;  %v286_v40 = vsel %vm5542_vm8, %v5426_v21, %v282_v47 }
 0x13a   :  { %v329_v24 = vmul.f32 %v276_v57, %v5281_v7  ;;  %v543_v21 = vmul.f32 %v5401_v28, %v535_v55  ;;  %v505_v50 = vmul.f32 %v5533_v41, %v504_v60  ;;  %v330_v22 = vmul.f32 %v286_v40, %v5278_v6 }
 0x13b   :  { %v486_v42 = vmul.f32 0.5, %v485_v20  ;;  %v433_v5 = vpop.xlane.xlu2 %432  ;;  %v498_v6 = vmul.f32 %v5481_v25, %v497_v4  ;;  %v296_v32 = vsel %vm5598_vm15, %v5471_v53, %v292_v27  ;;  %vm303_vm2 = vweird.f32 %v5512_v33 }
 0x13c   :  { %v443_v11 = vmul.f32 %v433_v5, %v5235_v36  ;;  %v340_v46 = vmul.f32 %v5401_v28, %v329_v24  ;;  %v506_v45 = vmul.f32 0.5, %v505_v50  ;;  %v341_v35 = vmul.f32 %v5401_v28, %v330_v22 }
 0x13d   :  { %v487_v59 = vsub.f32 1.5, %v486_v42  ;;  %v502_v47 = vsel %vm5612_vm1, %v5481_v25, %v498_v6  ;;  %v331_v52 = vmul.f32 %v296_v32, %v5284_v8  ;;  %vm510_vm5 = vweird.f32 %v5533_v41 }
 0x13e   :  { %v5555_v61 = vpop.eup %4647  ;;  %v5560_v56 = vadd.f32 1e-05, %v443_v11  ;;  %v351_v10 = vadd.f32 %v5424_v13, %v340_v46  ;;  %v507_v43 = vsub.f32 1.5, %v506_v45  ;;  %v352_v5 = vadd.f32 %v5424_v13, %v341_v35  ;;  %vm5645_vm7 = vmor %vm509_vm4, %vm510_vm5 }
 0x13f   :  { %v488_v63 = vmul.f32 %v5498_v23, %v487_v59  ;;  %v298_v0 = vmul.f32 %v5555_v61, %v5512_v33  ;;  %v5576_v1 = vpop.eup %4649  ;;  %vm304_vm3 = vweird.f32 %v5555_v61  ;;  %v537_v33 = vmul.f32 %v502_v47, %v5300_v26 }
 0x140   :  { %4651 = vrsqrt.f32 %v5560_v56  ;;  %v308_v54 = vmul.f32 %v5576_v1, %v5509_v31  ;;  %4370 = vmatmul.msk.f32.gmra.mxu1 %vm151_vm0, %v351_v10  ;;  %vm5637_vm6 = vmor %vm303_vm2, %vm304_vm3  ;;  %v508_v55 = vmul.f32 %v5533_v41, %v507_v43  ;;  %v342_v17 = vmul.f32 %v5401_v28, %v331_v52 }
 0x141   :  { %v299_v9 = vmul.f32 %v5555_v61, %v298_v0  ;;  %v492_v16 = vsel %vm5570_vm12, %v5498_v23, %v488_v63  ;;  %4653 = vrsqrt.f32 %v5578_v3  ;;  %v551_v23 = vadd.f32 %v5424_v13, %v543_v21 }
 0x142   :  { %v536_v34 = vmul.f32 %v492_v16, %v5304_v29  ;;  %v309_v12 = vmul.f32 %v5576_v1, %v308_v54  ;;  %vm313_vm8 = vweird.f32 %v5509_v31  ;;  %v545_v26 = vmul.f32 %v5401_v28, %v537_v33 }
 0x143   :  { %v300_v2 = vmul.f32 0.5, %v299_v9  ;;  %4362 = vmatmul.msk.f32.gmra.mxu0 %vm151_vm0, %v551_v23  ;;  %vm314_vm9 = vweird.f32 %v5576_v1  ;;  %v512_v24 = vsel %vm5645_vm7, %v5533_v41, %v508_v55  ;;  %v353_v63 = vadd.f32 %v5424_v13, %v342_v17 }
 0x144   :  { %v544_v15 = vmul.f32 %v5401_v28, %v536_v34  ;;  %v310_v11 = vmul.f32 0.5, %v309_v12  ;;  %vm519_vm10 = vweird.f32 %v5560_v56  ;;  %vm315_vm12 = vmor %vm313_vm8, %vm314_vm9  ;;  %v553_v31 = vadd.f32 %v5424_v13, %v545_v26 }
 0x145   :  { %v301_v20 = vsub.f32 1.5, %v300_v2  ;;  %vm529_vm14 = vweird.f32 %v5578_v3  ;;  %vm807_vm2 = vcmask 64512   ;;  %vm2799_vm7 = vcmask 1042434  }
 0x146   :  { %v5606_v14 = vpop.eup %4651  ;;  %v552_v49 = vadd.f32 %v5424_v13, %v544_v15  ;;  %v311_v59 = vsub.f32 1.5, %v310_v11  ;;  %vm2805_vm8 = vcmask 1044484   ;;  %vm2802_vm9 = vcmask 1043459  }
 0x147   :  { %v514_v39 = vmul.f32 %v5606_v14, %v5560_v56  ;;  %v4654_v18 = vpop.eup %4653  ;;  %v302_v53 = vmul.f32 %v5555_v61, %v301_v20  ;;  %vm520_vm11 = vweird.f32 %v5606_v14 }
 0x148   :  { %4371 = vmatmul.msk.f32.gmra.mxu1 %vm151_vm0, %v352_v5  ;;  %v524_v57 = vmul.f32 %v4654_v18, %v5578_v3  ;;  %v312_v0 = vmul.f32 %v5576_v1, %v311_v59  ;;  %vm521_vm13 = vmor %vm519_vm10, %vm520_vm11  ;;  %vm530_vm15 = vweird.f32 %v4654_v18  ;;  %vm2808_vm10 = vcmask 1045509  }
 0x149   :  { %v515_v42 = vmul.f32 %v5606_v14, %v514_v39  ;;  %v306_v60 = vsel %vm5637_vm6, %v5555_v61, %v302_v53  ;;  %v538_v61 = vmul.f32 %v512_v24, %v5307_v30  ;;  %vm531_vm1 = vmor %vm529_vm14, %vm530_vm15  ;;  %vm2796_vm6 = vcmask 1041409  }
 0x14a   :  { %v525_v40 = vmul.f32 %v4654_v18, %v524_v57  ;;  %v332_v7 = vmul.f32 %v306_v60, %v5323_v38  ;;  %v316_v46 = vsel %vm315_vm12, %v5576_v1, %v312_v0  ;;  %vm2811_vm11 = vcmask 1046534  }
 0x14b   :  { %v516_v8 = vmul.f32 0.5, %v515_v42  ;;  %4363 = vmatmul.msk.f32.gmra.mxu0 %vm151_vm0, %v552_v49  ;;  %v546_v56 = vmul.f32 %v5401_v28, %v538_v61  ;;  %v333_v10 = vmul.f32 %v316_v46, %v5320_v37  ;;  %vm2814_vm12 = vcmask 1047559  }
 0x14c   :  { %v526_v41 = vmul.f32 0.5, %v525_v40  ;;  %v343_v38 = vmul.f32 %v5401_v28, %v332_v7 }
 0x14d   :  { %v517_v62 = vsub.f32 1.5, %v516_v8  ;;  %v554_v30 = vadd.f32 %v5424_v13, %v546_v56  ;;  %v344_v1 = vmul.f32 %v5401_v28, %v333_v10 }
 0x14e   :  { %v527_v4 = vsub.f32 1.5, %v526_v41  ;;  %v354_v9 = vadd.f32 %v5424_v13, %v343_v38 }
 0x14f   :  { %v518_v21 = vmul.f32 %v5606_v14, %v517_v62  ;;  %v355_v37 = vadd.f32 %v5424_v13, %v344_v1 }
 0x150   :  { %4372 = vmatmul.msk.f32.gmra.mxu1 %vm151_vm0, %v353_v63  ;;  %v528_v22 = vmul.f32 %v4654_v18, %v527_v4 }
 0x151   :  { %v522_v50 = vsel %vm521_vm13, %v5606_v14, %v518_v21  ;;  %vm3574_vm13 = vcmask 523264  }
 0x152   :  { %v539_v16 = vmul.f32 %v522_v50, %v5341_v51  ;;  %v532_v54 = vsel %vm531_vm1, %v4654_v18, %v528_v22 }
 0x153   :  { %4364 = vmatmul.msk.f32.gmra.mxu0 %vm151_vm0, %v553_v31  ;;  %v540_v2 = vmul.f32 %v532_v54, %v5335_v48 }
 0x154   :  { %v547_v27 = vmul.f32 %v5401_v28, %v539_v16 }
 0x155   :  { %v548_v51 = vmul.f32 %v5401_v28, %v540_v2 }
 0x156   :  { %v555_v3 = vadd.f32 %v5424_v13, %v547_v27 }
 0x157   :  { %v556_v34 = vadd.f32 %v5424_v13, %v548_v51 }
 0x158   :  { %4373 = vmatmul.msk.f32.gmra.mxu1 %vm151_vm0, %v354_v9 }
 0x15b   :  { %4365 = vmatmul.msk.f32.gmra.mxu0 %vm151_vm0, %v554_v30 }
 0x160   :  { %4374 = vmatmul.msk.f32.gmra.mxu1 %vm151_vm0, %v355_v37 }
 0x163   :  { %4366 = vmatmul.msk.f32.gmra.mxu0 %vm151_vm0, %v555_v3 }
 0x16b   :  { %4367 = vmatmul.msk.f32.gmra.mxu0 %vm151_vm0, %v556_v34 }
 0x196   :  { %v230_v19 = vpop.xlane.xlu0 %229 }
 0x197   :  { %v238_v23 = vmul.f32 %v230_v19, %v5235_v36 }
 0x199   :  { %v246_v6 = vadd.f32 1e-05, %v238_v23 }
 0x19b   :  { %4655 = vrsqrt.f32 %v246_v6  ;;  %vm323_vm4 = vweird.f32 %v246_v6 }
 0x1a1   :  { %v4656_v45 = vpop.eup %4655 }
 0x1a2   :  { %v318_v14 = vmul.f32 %v4656_v45, %v246_v6  ;;  %vm324_vm3 = vweird.f32 %v4656_v45 }
 0x1a3   :  { %vm325_vm5 = vmor %vm323_vm4, %vm324_vm3 }
 0x1a4   :  { %v319_v29 = vmul.f32 %v4656_v45, %v318_v14 }
 0x1a6   :  { %v320_v15 = vmul.f32 0.5, %v319_v29  ;;  %v671_v35 = vpop.f32.mrf.mxu1 }
 0x1a7   :  { %775 = vrot.lane.b32.xlu0 %v671_v35, %s5020_s3  ;;  %759 = vrot.lane.b32.xlu2 %v671_v35, %s5021_s18 }
 0x1a8   :  { %v321_v48 = vsub.f32 1.5, %v320_v15  ;;  %4376 = vmatpush.xpose.msk.msra.mxu2 %vm807_vm2, %v671_v35 }
 0x1aa   :  { %v322_v12 = vmul.f32 %v4656_v45, %v321_v48 }
 0x1ac   :  { %v326_v20 = vsel %vm325_vm5, %v4656_v45, %v322_v12 }
 0x1ad   :  { %v334_v39 = vmul.f32 %v326_v20, %v5379_v44  ;;  %v602_v43 = vpop.f32.mrf.mxu0 }
 0x1ae   :  { %v674_v32 = vpop.f32.mrf.mxu1  ;;  %703 = vrot.lane.b32.xlu1 %v602_v43, %s5021_s18  ;;  %4377 = vmatmul.msk.f32.vlgmr.msra.gmra.mxu2 %vm807_vm2, %v602_v43 }
 0x1af   :  { %v345_v47 = vmul.f32 %v5401_v28, %v334_v39  ;;  %791 = vrot.lane.b32.xlu2 %v671_v35, %s5022_s10  ;;  %761 = vrot.lane.b32.xlu0 %v674_v32, %s5021_s18  ;;  %v4536_v49 = vpack.i.bf16 %v674_v32, %v671_v35 }
 0x1b0   :  { %4378 = vmatpush.xpose.msk.msrb.mxu1 %vm807_vm2, %v674_v32 }
 0x1b1   :  { %v356_v42 = vadd.f32 %v5424_v13, %v345_v47 }
 0x1b3   :  { %4375 = vmatmul.msk.f32.gmra.mxu1 %vm151_vm0, %v356_v42 }
 0x1b5   :  { %v605_v44 = vpop.f32.mrf.mxu0 }
 0x1b6   :  { %719 = vrot.lane.b32.xlu1 %v602_v43, %s5020_s3 }
 0x1b7   :  { %721 = vrot.lane.b32.xlu0 %v605_v44, %s5020_s3  ;;  %705 = vrot.lane.b32.xlu2 %v605_v44, %s5021_s18 }
 0x1bb   :  { %4379 = vmatmul.msk.f32.vlgmr.msrb.gmra.mxu1 %vm807_vm2, %v605_v44 }
 0x1bd   :  { %v677_v28 = vpop.f32.mrf.mxu1 }
 0x1be   :  { %4380 = vmatpush.xpose.msk.msrb.mxu2 %vm807_vm2, %v677_v28  ;;  %735 = vrot.lane.b32.xlu1 %v602_v43, %s5022_s10 }
 0x1bf   :  { %793 = vrot.lane.b32.xlu0 %v674_v32, %s5022_s10  ;;  %777 = vrot.lane.b32.xlu2 %v674_v32, %s5020_s3 }
 0x1c0   :  { %v608_v18 = vpop.f32.mrf.mxu0 }
 0x1c1   :  { %4381 = vmatmul.msk.f32.vlgmr.msrb.gmra.mxu2 %vm807_vm2, %v608_v18 }
 0x1c5   :  { %v680_v13 = vpop.f32.mrf.mxu1 }
 0x1c6   :  { %4382 = vmatpush.xpose.msk.msra.mxu1 %vm807_vm2, %v680_v13  ;;  %4537 = vrot.lane.b32.xlu1 %v4536_v49, %s5023_s19 }
 0x1c7   :  { %737 = vrot.lane.b32.xlu0 %v605_v44, %s5022_s10  ;;  %765 = vrot.lane.b32.xlu2 %v680_v13, %s5021_s18 }
 0x1c8   :  { %v611_v5 = vpop.f32.mrf.mxu0 }
 0x1c9   :  { %4383 = vmatmul.msk.f32.vlgmr.msra.gmra.mxu1 %vm807_vm2, %v611_v5 }
 0x1cd   :  { %v683_v52 = vpop.f32.mrf.mxu1 }
 0x1ce   :  { %4384 = vmatpush.xpose.msk.msra.mxu2 %vm807_vm2, %v683_v52  ;;  %707 = vrot.lane.b32.xlu1 %v608_v18, %s5021_s18  ;;  %v4541_v57 = vpack.i.bf16 %v683_v52, %v677_v28 }
 0x1cf   :  { %763 = vrot.lane.b32.xlu0 %v677_v28, %s5021_s18  ;;  %725 = vrot.lane.b32.xlu2 %v611_v5, %s5020_s3 }
 0x1d0   :  { %v614_v11 = vpop.f32.mrf.mxu0 }
 0x1d1   :  { %4385 = vmatmul.msk.f32.vlgmr.msra.gmra.mxu2 %vm807_vm2, %v614_v11 }
 0x1d5   :  { %v686_v53 = vpop.f32.mrf.mxu1 }
 0x1d6   :  { %4386 = vmatpush.xpose.msk.msra.mxu3 %vm807_vm2, %v686_v53  ;;  %779 = vrot.lane.b32.xlu1 %v677_v28, %s5020_s3  ;;  %v4546_v17 = vpack.i.bf16 %v686_v53, %v680_v13 }
 0x1d7   :  { %795 = vrot.lane.b32.xlu0 %v677_v28, %s5022_s10  ;;  %797 = vrot.lane.b32.xlu2 %v680_v13, %s5022_s10 }
 0x1d8   :  { %v617_v25 = vpop.f32.mrf.mxu0 }
 0x1d9   :  { %4387 = vmatmul.msk.f32.vlgmr.msra.gmra.mxu3 %vm807_vm2, %v617_v25 }
 0x1dd   :  { %v5728_v33 = vpop.f32.mrf.mxu1 }
 0x1de   :  { %4388 = vmatpush.xpose.msk.msrb.mxu2 %vm807_vm2, %v5728_v33  ;;  %723 = vrot.lane.b32.xlu1 %v608_v18, %s5020_s3 }
 0x1df   :  { %709 = vrot.lane.b32.xlu0 %v611_v5, %s5021_s18  ;;  %767 = vrot.lane.b32.xlu2 %v683_v52, %s5021_s18 }
 0x1e0   :  { %v620_v55 = vpop.f32.mrf.mxu0 }
 0x1e1   :  { %4389 = vmatmul.msk.f32.vlgmr.msrb.gmra.mxu2 %vm807_vm2, %v620_v55 }
 0x1e6   :  { %739 = vrot.lane.b32.xlu1 %v608_v18, %s5022_s10 }
 0x1e7   :  { %781 = vrot.lane.b32.xlu0 %v680_v13, %s5020_s3  ;;  %783 = vrot.lane.b32.xlu2 %v683_v52, %s5020_s3 }
 0x1e8   :  { %v623_v24 = vpop.f32.mrf.mxu0 }
 0x1ee   :  { %4542 = vrot.lane.b32.xlu1 %v4541_v57, %s5023_s19 }
 0x1ef   :  { %741 = vrot.lane.b32.xlu0 %v611_v5, %s5022_s10  ;;  %743 = vrot.lane.b32.xlu2 %v614_v11, %s5022_s10 }
 0x1f6   :  { %769 = vrot.lane.b32.xlu1 %v686_v53, %s5021_s18 }
 0x1f7   :  { %711 = vrot.lane.b32.xlu0 %v614_v11, %s5021_s18  ;;  %713 = vrot.lane.b32.xlu2 %v617_v25, %s5021_s18 }
 0x1fe   :  { %785 = vrot.lane.b32.xlu1 %v686_v53, %s5020_s3 }
 0x1ff   :  { %727 = vrot.lane.b32.xlu0 %v614_v11, %s5020_s3  ;;  %729 = vrot.lane.b32.xlu2 %v617_v25, %s5020_s3 }
 0x201   :  { %v760_v8 = vpop.permute.xlu2 %759 }
 0x202   :  { %4392 = vmatpush.xpose.msk.msra.mxu2 %vm807_vm2, %v760_v8  ;;  %v4551_v9 = vpack.i.bf16 %v760_v8, %v5728_v33 }
 0x206   :  { %801 = vrot.lane.b32.xlu1 %v686_v53, %s5022_s10 }
 0x207   :  { %799 = vrot.lane.b32.xlu0 %v683_v52, %s5022_s10  ;;  %715 = vrot.lane.b32.xlu2 %v620_v55, %s5021_s18 }
 0x209   :  { %v5752_v58 = vpop.permute.xlu2 %791 }
 0x20e   :  { %745 = vrot.lane.b32.xlu1 %v617_v25, %s5022_s10 }
 0x20f   :  { %4547 = vrot.lane.b32.xlu0 %v4546_v17, %s5023_s19  ;;  %787 = vrot.lane.b32.xlu2 %v5728_v33, %s5020_s3 }
 0x211   :  { %v706_v59 = vpop.permute.xlu2 %705 }
 0x216   :  { %771 = vrot.lane.b32.xlu1 %v5728_v33, %s5021_s18 }
 0x217   :  { %747 = vrot.lane.b32.xlu0 %v620_v55, %s5022_s10  ;;  %731 = vrot.lane.b32.xlu2 %v620_v55, %s5020_s3 }
 0x219   :  { %v5761_v60 = vpop.permute.xlu0 %775  ;;  %v5764_v26 = vpop.permute.xlu2 %777 }
 0x21e   :  { %717 = vrot.lane.b32.xlu1 %v623_v24, %s5021_s18 }
 0x21f   :  { %803 = vrot.lane.b32.xlu2 %v5728_v33, %s5022_s10 }
 0x220   :  { %v704_v62 = vpop.permute.xlu1 %703 }
 0x221   :  { %v762_v40 = vpop.permute.xlu0 %761  ;;  %v5769_v63 = vpop.permute.xlu2 %765  ;;  %4393 = vmatmul.msk.f32.vlgmr.msra.gmra.mxu2 %vm807_vm2, %v704_v62 }
 0x227   :  { %749 = vrot.lane.b32.xlu2 %v623_v24, %s5022_s10 }
 0x228   :  { %v5773_v7 = vpop.permute.xlu1 %719 }
 0x229   :  { %v5775_v0 = vpop.permute.xlu0 %721  ;;  %v726_v31 = vpop.permute.xlu2 %725 }
 0x230   :  { %v692_v61 = vpop.f32.mrf.mxu1  ;;  %v5782_v21 = vpop.permute.xlu1 %735 }
 0x231   :  { %789 = vrot.lane.b32.xlu1 %v692_v61, %s5020_s3  ;;  %773 = vrot.lane.b32.xlu0 %v692_v61, %s5021_s18  ;;  %v4556_v41 = vpack.i.bf16 %v762_v40, %v692_v61  ;;  %v5784_v38 = vpop.permute.xlu0 %793  ;;  %v5786_v46 = vpop.permute.xlu2 %797 }
 0x232   :  { %4390 = vmatpush.xpose.msk.msrb.mxu3 %vm807_vm2, %v692_v61  ;;  %v5810_v54 = vpop.f32.mrf.mxu2 }
 0x233   :  { %4557 = vrot.lane.b32.xlu2 %v4556_v41, %s5023_s19  ;;  %v1576_v45 = vsel %vm807_vm2, %v5810_v54, -inf }
 0x235   :  { %4391 = vmatmul.msk.f32.vlgmr.msrb.gmra.mxu3 %vm807_vm2, %v623_v24 }
 0x236   :  { %4394 = vmatpush.xpose.msk.msra.mxu3 %vm807_vm2, %v762_v40 }
 0x238   :  { %v5793_v56 = vpop.permute.xlu1 %4537  ;;  %v5828_v35 = vpop.f32.mrf.mxu1 }
 0x239   :  { %805 = vrot.lane.b32.xlu1 %v692_v61, %s5022_s10  ;;  %733 = vrot.lane.b32.xlu0 %v623_v24, %s5020_s3  ;;  %v5795_v4 = vpop.permute.xlu0 %737  ;;  %v768_v50 = vpop.permute.xlu2 %767  ;;  %v1579_v48 = vsel %vm807_vm2, %v5828_v35, -inf }
 0x23a   :  { %4398 = vmatpush.xpose.msk.msrb.mxu3 %vm807_vm2, %v5769_v63 }
 0x23d   :  { %4395 = vmatmul.msk.f32.vlgmr.msra.gmra.mxu3 %vm807_vm2, %v706_v59 }
 0x240   :  { %v708_v10 = vpop.permute.xlu1 %707 }
 0x241   :  { %4552 = vrot.lane.b32.xlu0 %v4551_v9, %s5023_s19  ;;  %v764_v30 = vpop.permute.xlu0 %763  ;;  %v5800_v16 = vpop.permute.xlu2 %783 }
 0x242   :  { %4396 = vmatpush.xpose.msk.msrb.mxu2 %vm807_vm2, %v764_v30  ;;  %v4561_v44 = vpack.i.bf16 %v768_v50, %v764_v30 }
 0x244   :  { %v5814_v51 = vpop.f32.mrf.mxu2 }
 0x245   :  { %4397 = vmatmul.msk.f32.vlgmr.msrb.gmra.mxu2 %vm807_vm2, %v708_v10  ;;  %v1582_v34 = vsel %vm807_vm2, %v5814_v51, -inf }
 0x246   :  { %4400 = vmatpush.xpose.msk.msra.mxu2 %vm807_vm2, %v768_v50  ;;  %v5884_v24 = vpop.f32.mrf.mxu1 }
 0x247   :  { %v1585_v40 = vsel %vm807_vm2, %v5884_v24, -inf }
 0x248   :  { %v780_v22 = vpop.permute.xlu1 %779 }
 0x249   :  { %v5805_v1 = vpop.permute.xlu0 %795  ;;  %v5807_v27 = vpop.permute.xlu2 %743  ;;  %4412 = vmatpush.xpose.msk.msrb.mxu0 %vm807_vm2, %v780_v22  ;;  %v4566_v13 = vpack.i.bf16 %v5800_v16, %v780_v22 }
 0x250   :  { %v724_v37 = vpop.permute.xlu1 %723 }
 0x251   :  { %v710_v3 = vpop.permute.xlu0 %709  ;;  %v714_v2 = vpop.permute.xlu2 %713  ;;  %4413 = vmatmul.msk.f32.vlgmr.msrb.gmra.mxu0 %vm807_vm2, %v724_v37 }
 0x252   :  { %4399 = vmatmul.msk.f32.vlgmr.msrb.gmra.mxu3 %vm807_vm2, %v710_v3 }
 0x254   :  { %v5897_v62 = vpop.f32.mrf.mxu2 }
 0x255   :  { %v1588_v41 = vsel %vm807_vm2, %v5897_v62, -inf }
 0x258   :  { %v740_v19 = vpop.permute.xlu1 %739 }
 0x259   :  { %v782_v23 = vpop.permute.xlu0 %781  ;;  %v5818_v6 = vpop.permute.xlu2 %729 }
 0x25a   :  { %4414 = vmatpush.xpose.msk.msrb.mxu1 %vm807_vm2, %v782_v23 }
 0x25c   :  { %1583 = vmax.xlane.f32.xlu2 %v1582_v34  ;;  %v5928_v22 = vpop.f32.mrf.mxu3 }
 0x25d   :  { %4415 = vmatmul.msk.f32.vlgmr.msrb.gmra.mxu1 %vm807_vm2, %v726_v31  ;;  %v1591_v37 = vsel %vm807_vm2, %v5928_v22, -inf }
 0x260   :  { %v5824_v14 = vpop.permute.xlu1 %4542 }
 0x261   :  { %v5826_v29 = vpop.permute.xlu0 %741  ;;  %v716_v15 = vpop.permute.xlu2 %715  ;;  %v4544_v52 = vunpack.i.l.bf16 %v5824_v14 }
 0x263   :  { %1577 = vmax.xlane.f32.xlu1 %v1576_v45 }
 0x268   :  { %v5832_v12 = vpop.permute.xlu1 %769 }
 0x269   :  { %v712_v20 = vpop.permute.xlu0 %711  ;;  %v4571_v39 = vpack.i.bf16 %v5832_v12, %v5769_v63  ;;  %v788_v32 = vpop.permute.xlu2 %787  ;;  %4402 = vmatpush.xpose.msk.msra.mxu3 %vm807_vm2, %v5832_v12 }
 0x26a   :  { %4401 = vmatmul.msk.f32.vlgmr.msra.gmra.mxu2 %vm807_vm2, %v712_v20  ;;  %4420 = vmatpush.xpose.msk.msra.mxu0 %vm807_vm2, %v788_v32  ;;  %v4586_v8 = vpack.i.bf16 %v5752_v58, %v788_v32 }
 0x26b   :  { %1580 = vmax.xlane.f32.xlu0 %v1579_v48 }
 0x26c   :  { %4403 = vmatmul.msk.f32.vlgmr.msra.gmra.mxu3 %vm807_vm2, %v714_v2 }
 0x26e   :  { %4428 = vmatpush.xpose.msk.msrb.mxu0 %vm807_vm2, %v5805_v1 }
 0x270   :  { %v786_v47 = vpop.permute.xlu1 %785 }
 0x271   :  { %v728_v43 = vpop.permute.xlu0 %727  ;;  %v732_v42 = vpop.permute.xlu2 %731  ;;  %v4576_v11 = vpack.i.bf16 %v786_v47, %v782_v23 }
 0x272   :  { %4421 = vmatmul.msk.f32.vlgmr.msra.gmra.mxu0 %vm807_vm2, %v732_v42  ;;  %v5952_v23 = vpop.f32.mrf.mxu2 }
 0x278   :  { %v5844_v28 = vpop.permute.xlu1 %801 }
 0x279   :  { %v5846_v18 = vpop.permute.xlu0 %799  ;;  %v5850_v49 = vpop.permute.xlu2 %803 }
 0x27a   :  { %v4601_v5 = vpack.i.bf16 %v5846_v18, %v5805_v1  ;;  %4429 = vmatmul.msk.f32.vlgmr.msrb.gmra.mxu0 %vm807_vm2, %v740_v19 }
 0x27b   :  { %4436 = vmatpush.xpose.msk.msra.mxu0 %vm807_vm2, %v5850_v49 }
 0x27c   :  { %4562 = vrot.lane.b32.xlu1 %v4561_v44, %s5023_s19 }
 0x27f   :  { %4567 = vrot.lane.b32.xlu0 %v4566_v13, %s5023_s19  ;;  %2001 = vmatpush.msrb.mxu0 %v4544_v52 }
 0x280   :  { %v5859_v53 = vpop.permute.xlu1 %745 }
 0x281   :  { %v5861_v25 = vpop.permute.xlu0 %4547  ;;  %v750_v50 = vpop.permute.xlu2 %749 }
 0x282   :  { %v4549_v9 = vunpack.i.l.bf16 %v5861_v25  ;;  %v4550_v34 = vunpack.i.h.bf16 %v5861_v25 }
 0x284   :  { %4577 = vrot.lane.b32.xlu1 %v4576_v11, %s5023_s19 }
 0x288   :  { %v772_v33 = vpop.permute.xlu1 %771 }
 0x289   :  { %v748_v55 = vpop.permute.xlu0 %747  ;;  %v4581_v57 = vpack.i.bf16 %v5761_v60, %v772_v33  ;;  %4404 = vmatpush.xpose.msk.msrb.mxu2 %vm807_vm2, %v772_v33 }
 0x28a   :  { %4437 = vmatmul.msk.f32.vlgmr.msra.gmra.mxu0 %vm807_vm2, %v748_v55 }
 0x28b   :  { %4582 = vrot.lane.b32.xlu2 %v4581_v57, %s5023_s19 }
 0x28c   :  { %4405 = vmatmul.msk.f32.vlgmr.msrb.gmra.mxu2 %vm807_vm2, %v716_v15 }
 0x28d   :  { %4408 = vmatpush.xpose.msk.msra.mxu2 %vm807_vm2, %v5761_v60 }
 0x290   :  { %v718_v17 = vpop.permute.xlu1 %717 }
 0x291   :  { %4416 = vmatpush.xpose.msk.msrb.mxu2 %vm807_vm2, %v5800_v16 }
 0x293   :  { %4587 = vrot.lane.b32.xlu2 %v4586_v8, %s5023_s19 }
 0x294   :  { %4409 = vmatmul.msk.f32.vlgmr.msra.gmra.mxu2 %vm807_vm2, %v5773_v7 }
 0x295   :  { %4424 = vmatpush.xpose.msk.msra.mxu2 %vm807_vm2, %v5752_v58  ;;  %v4539_v58 = vunpack.i.l.bf16 %v5793_v56 }
 0x29c   :  { %4417 = vmatmul.msk.f32.vlgmr.msrb.gmra.mxu2 %vm807_vm2, %v728_v43  ;;  %v1594_v43 = vsel %vm807_vm2, %v5952_v23, -inf }
 0x29d   :  { %4432 = vmatpush.xpose.msk.msrb.mxu2 %vm807_vm2, %v5846_v18 }
 0x2a3   :  { %v790_v59 = vpop.permute.xlu1 %789  ;;  %v774_v60 = vpop.permute.xlu0 %773 }
 0x2a4   :  { %4406 = vmatpush.xpose.msk.msrb.mxu3 %vm807_vm2, %v774_v60  ;;  %4422 = vmatpush.xpose.msk.msra.mxu1 %vm807_vm2, %v790_v59  ;;  %v4591_v2 = vpack.i.bf16 %v5764_v26, %v774_v60  ;;  %v5959_v15 = vpop.f32.mrf.mxu2 }
 0x2a5   :  { %4425 = vmatmul.msk.f32.vlgmr.msra.gmra.mxu2 %vm807_vm2, %v5782_v21  ;;  %v4545_v21 = vunpack.i.h.bf16 %v5824_v14  ;;  %v1600_v48 = vsel %vm807_vm2, %v5959_v15, -inf }
 0x2a6   :  { %1949 = vmatpush.msra.mxu2 %v4539_v58 }
 0x2a7   :  { %4407 = vmatmul.msk.f32.vlgmr.msrb.gmra.mxu3 %vm807_vm2, %v718_v17 }
 0x2a8   :  { %4410 = vmatpush.xpose.msk.msra.mxu3 %vm807_vm2, %v5764_v26  ;;  %4430 = vmatpush.xpose.msk.msrb.mxu1 %vm807_vm2, %v5786_v46 }
 0x2a9   :  { %1586 = vmax.xlane.f32.xlu0 %v1585_v40 }
 0x2ab   :  { %v5899_v7 = vpop.permute.xlu1 %805  ;;  %v734_v31 = vpop.permute.xlu0 %733 }
 0x2ac   :  { %4418 = vmatpush.xpose.msk.msrb.mxu3 %vm807_vm2, %v786_v47  ;;  %v4611_v61 = vpack.i.bf16 %v5899_v7, %v5850_v49  ;;  %4423 = vmatmul.msk.f32.vlgmr.msra.gmra.mxu1 %vm807_vm2, %v734_v31 }
 0x2ad   :  { %4438 = vmatpush.xpose.msk.msra.mxu1 %vm807_vm2, %v5899_v7  ;;  %4433 = vmatmul.msk.f32.vlgmr.msrb.gmra.mxu2 %vm807_vm2, %v5807_v27  ;;  %v4540_v27 = vunpack.i.h.bf16 %v5793_v56  ;;  %v4596_v56 = vpack.i.bf16 %v5784_v38, %v790_v59 }
 0x2ae   :  { %1589 = vmax.xlane.f32.xlu1 %v1588_v41  ;;  %2053 = vmatpush.msrb.mxu2 %v4545_v21 }
 0x2af   :  { %4411 = vmatmul.msk.f32.vlgmr.msra.gmra.mxu3 %vm807_vm2, %v5775_v0  ;;  %v5923_v0 = vpop.permute.xlu2 %4557 }
 0x2b0   :  { %4426 = vmatpush.xpose.msk.msra.mxu3 %vm807_vm2, %v5784_v38  ;;  %v4559_v16 = vunpack.i.l.bf16 %v5923_v0 }
 0x2b3   :  { %v5916_v10 = vpop.permute.xlu0 %4552 }
 0x2b4   :  { %v4554_v30 = vunpack.i.l.bf16 %v5916_v10  ;;  %4431 = vmatmul.msk.f32.vlgmr.msrb.gmra.mxu1 %vm807_vm2, %v5826_v29 }
 0x2b5   :  { %2027 = vmatpush.msrb.mxu1 %v4549_v9 }
 0x2b6   :  { %2105 = vmatpush.msra.mxu0 %v4554_v30 }
 0x2b7   :  { %4419 = vmatmul.msk.f32.vlgmr.msrb.gmra.mxu3 %vm807_vm2, %v5818_v6 }
 0x2b8   :  { %4434 = vmatpush.xpose.msk.msrb.mxu3 %vm807_vm2, %v5844_v28  ;;  %v5940_v3 = vpop.f32.mrf.mxu3 }
 0x2b9   :  { %v1597_v63 = vsel %vm807_vm2, %v5940_v3, -inf }
 0x2bc   :  { %4439 = vmatmul.msk.f32.vlgmr.msra.gmra.mxu1 %vm807_vm2, %v750_v50  ;;  %1592 = vmax.xlane.f32.xlu2 %v1591_v37 }
 0x2bd   :  { %2131 = vmatpush.msra.mxu1 %v4559_v16  ;;  %4572 = vrot.lane.b32.xlu0 %v4571_v39, %s5023_s19 }
 0x2bf   :  { %4427 = vmatmul.msk.f32.vlgmr.msra.gmra.mxu3 %vm807_vm2, %v5795_v4 }
 0x2c0   :  { %1975 = vmatpush.msra.mxu3 %v4540_v27  ;;  %v5981_v13 = vpop.f32.mrf.mxu3 }
 0x2c1   :  { %v1603_v11 = vsel %vm807_vm2, %v5981_v13, -inf }
 0x2c4   :  { %1598 = vmax.xlane.f32.xlu2 %v1597_v63 }
 0x2c7   :  { %4435 = vmatmul.msk.f32.vlgmr.msrb.gmra.mxu3 %vm807_vm2, %v5859_v53  ;;  %4592 = vrot.lane.b32.xlu1 %v4591_v2, %s5023_s19 }
 0x2c8   :  { %2079 = vmatpush.msrb.mxu3 %v4550_v34  ;;  %v5967_v20 = vpop.f32.mrf.mxu2 }
 0x2ce   :  { %v5986_v25 = vpop.f32.mrf.mxu0 }
 0x2cf   :  { %4597 = vrot.lane.b32.xlu1 %v4596_v56, %s5023_s19  ;;  %v1584_v6 = vpop.xlane.xlu2 %1583  ;;  %v1630_v33 = vsel %vm807_vm2, %v5986_v25, -inf }
 0x2d0   :  { %v1674_v14 = vsub.f32 %v5814_v51, %v1584_v6  ;;  %v1606_v51 = vsel %vm807_vm2, %v5967_v20, -inf }
 0x2d2   :  { %v1708_v38 = vmul.f32 1.442695, %v1674_v14 }
 0x2d5   :  { %v6002_v60 = vpop.f32.mrf.mxu3 }
 0x2d6   :  { %v1578_v4 = vpop.xlane.xlu1 %1577  ;;  %v1609_v58 = vsel %vm807_vm2, %v6002_v60, -inf }
 0x2d7   :  { %v1672_v19 = vsub.f32 %v5810_v54, %v1578_v4 }
 0x2d9   :  { %v1704_v26 = vmul.f32 1.442695, %v1672_v19 }
 0x2da   :  { %v5963_v54 = vpop.f32.mrf.mxu1 }
 0x2db   :  { %4657 = vpow2.f32 %v1704_v26  ;;  %v1633_v12 = vsel %vm807_vm2, %v5963_v54, -inf }
 0x2dc   :  { %4659 = vpow2.f32 %v1708_v38 }
 0x2de   :  { %v1581_v44 = vpop.xlane.xlu0 %1580 }
 0x2df   :  { %v1673_v52 = vsub.f32 %v5828_v35, %v1581_v44 }
 0x2e1   :  { %v5954_v45 = vpop.eup %4657  ;;  %v1706_v53 = vmul.f32 1.442695, %v1673_v52 }
 0x2e2   :  { %v1768_v29 = vsel %vm807_vm2, %v5954_v45, 0.0  ;;  %v5971_v39 = vpop.eup %4659 }
 0x2e3   :  { %1769 = vadd.xlane.f32.xlu2 %v1768_v29  ;;  %v1774_v32 = vsel %vm807_vm2, %v5971_v39, 0.0  ;;  %4661 = vpow2.f32 %v1706_v53 }
 0x2e5   :  { %v6009_v50 = vpop.permute.xlu2 %4582 }
 0x2e7   :  { %1601 = vmax.xlane.f32.xlu0 %v1600_v48 }
 0x2e9   :  { %v5990_v55 = vpop.eup %4661 }
 0x2ea   :  { %v1771_v8 = vsel %vm807_vm2, %v5990_v55, 0.0 }
 0x2eb   :  { %1634 = vmax.xlane.f32.xlu2 %v1633_v12 }
 0x2ed   :  { %v5975_v47 = vpop.f32.mrf.mxu2  ;;  %v6016_v2 = vpop.permute.xlu2 %4587 }
 0x2ee   :  { %v1612_v42 = vsel %vm807_vm2, %v5975_v47, -inf  ;;  %v5992_v57 = vpop.permute.xlu1 %4562 }
 0x2ef   :  { %1607 = vmax.xlane.f32.xlu0 %v1606_v51  ;;  %v6028_v4 = vpop.f32.mrf.mxu0 }
 0x2f0   :  { %v1642_v38 = vsel %vm807_vm2, %v6028_v4, -inf }
 0x2f1   :  { %v5998_v17 = vpop.permute.xlu0 %4567 }
 0x2f3   :  { %1775 = vadd.xlane.f32.xlu2 %v1774_v32 }
 0x2f6   :  { %v6006_v40 = vpop.permute.xlu1 %4577 }
 0x2f7   :  { %v6039_v12 = vpop.f32.mrf.mxu0 }
 0x2f9   :  { %1595 = vmax.xlane.f32.xlu1 %v1594_v43 }
 0x2fb   :  { %1613 = vmax.xlane.f32.xlu2 %v1612_v42  ;;  %v1654_v42 = vsel %vm807_vm2, %v6039_v12, -inf }
 0x301   :  { %1604 = vmax.xlane.f32.xlu1 %v1603_v11 }
 0x309   :  { %1631 = vmax.xlane.f32.xlu1 %v1630_v33 }
 0x30f   :  { %v5996_v35 = vpop.f32.mrf.mxu2 }
 0x310   :  { %v1618_v59 = vsel %vm807_vm2, %v5996_v35, -inf }
 0x311   :  { %1772 = vadd.xlane.f32.xlu1 %v1771_v8  ;;  %1619 = vmax.xlane.f32.xlu2 %v1618_v59 }
 0x317   :  { %v6037_v48 = vpop.f32.mrf.mxu2 }
 0x318   :  { %v1624_v51 = vsel %vm807_vm2, %v6037_v48, -inf }
 0x319   :  { %1610 = vmax.xlane.f32.xlu1 %v1609_v58  ;;  %v6065_v58 = vpop.f32.mrf.mxu0 }
 0x31c   :  { %v1587_v31 = vpop.xlane.xlu0 %1586 }
 0x31d   :  { %v1675_v41 = vsub.f32 %v5884_v24, %v1587_v31  ;;  %v6020_v24 = vpop.f32.mrf.mxu3 }
 0x31f   :  { %v1710_v21 = vmul.f32 1.442695, %v1675_v41  ;;  %v6057_v53 = vpop.f32.mrf.mxu2 }
 0x321   :  { %4663 = vpow2.f32 %v1710_v21  ;;  %v1590_v9 = vpop.xlane.xlu1 %1589 }
 0x322   :  { %v1676_v30 = vsub.f32 %v5897_v62, %v1590_v9  ;;  %v1615_v62 = vsel %vm807_vm2, %v6020_v24, -inf  ;;  %v1666_v9 = vsel %vm807_vm2, %v6065_v58, -inf }
 0x324   :  { %v1712_v16 = vmul.f32 1.442695, %v1676_v30 }
 0x326   :  { %4665 = vpow2.f32 %v1712_v16 }
 0x327   :  { %v6012_v27 = vpop.eup %4663 }
 0x328   :  { %v1777_v37 = vsel %vm807_vm2, %v6012_v27, 0.0  ;;  %v6073_v30 = vpop.f32.mrf.mxu2 }
 0x329   :  { %1778 = vadd.xlane.f32.xlu0 %v1777_v37  ;;  %v6026_v56 = vpop.f32.mrf.mxu1 }
 0x32a   :  { %v1645_v6 = vsel %vm807_vm2, %v6026_v56, -inf  ;;  %v6033_v14 = vpop.f32.mrf.mxu3 }
 0x32b   :  { %v1621_v33 = vsel %vm807_vm2, %v6033_v14, -inf }
 0x32c   :  { %v6018_v34 = vpop.eup %4665 }
 0x32d   :  { %v1780_v63 = vsel %vm807_vm2, %v6018_v34, 0.0 }
 0x32e   :  { %1781 = vadd.xlane.f32.xlu1 %v1780_v63  ;;  %v1648_v63 = vsel %vm807_vm2, %v6073_v30, -inf }
 0x32f   :  { %v1593_v19 = vpop.xlane.xlu2 %1592  ;;  %v6075_v16 = vpop.permute.xlu0 %4572 }
 0x330   :  { %v1677_v26 = vsub.f32 %v5928_v22, %v1593_v19 }
 0x331   :  { %1616 = vmax.xlane.f32.xlu0 %v1615_v62  ;;  %v6051_v44 = vpop.f32.mrf.mxu1 }
 0x332   :  { %v1714_v29 = vmul.f32 1.442695, %v1677_v26  ;;  %v6047_v43 = vpop.f32.mrf.mxu3  ;;  %v1657_v52 = vsel %vm807_vm2, %v6051_v44, -inf }
 0x333   :  { %v1627_v11 = vsel %vm807_vm2, %v6047_v43, -inf }
 0x334   :  { %4667 = vpow2.f32 %v1714_v29 }
 0x336   :  { %1646 = vmax.xlane.f32.xlu1 %v1645_v6  ;;  %v6082_v6 = vpop.f32.mrf.mxu2 }
 0x337   :  { %v1599_v41 = vpop.xlane.xlu2 %1598 }
 0x339   :  { %1643 = vmax.xlane.f32.xlu0 %v1642_v38  ;;  %v6063_v59 = vpop.f32.mrf.mxu1  ;;  %v6079_v62 = vpop.permute.xlu1 %4592 }
 0x33a   :  { %v6043_v22 = vpop.eup %4667  ;;  %v6061_v8 = vpop.f32.mrf.mxu3  ;;  %v1669_v21 = vsel %vm807_vm2, %v6063_v59, -inf }
 0x33b   :  { %v1783_v32 = vsel %vm807_vm2, %v6043_v22, 0.0  ;;  %v1639_v31 = vsel %vm807_vm2, %v6061_v8, -inf }
 0x33c   :  { %1784 = vadd.xlane.f32.xlu2 %v1783_v32 }
 0x33e   :  { %1625 = vmax.xlane.f32.xlu1 %v1624_v51 }
 0x341   :  { %1655 = vmax.xlane.f32.xlu0 %v1654_v42  ;;  %v4555_v42 = vunpack.i.h.bf16 %v5916_v10 }
 0x344   :  { %1628 = vmax.xlane.f32.xlu2 %v1627_v11  ;;  %v6089_v11 = vpop.permute.xlu1 %4597 }
 0x346   :  { %1658 = vmax.xlane.f32.xlu1 %v1657_v52  ;;  %v1660_v52 = vsel %vm807_vm2, %v6082_v6, -inf }
 0x349   :  { %1622 = vmax.xlane.f32.xlu0 %v1621_v33 }
 0x34c   :  { %1670 = vmax.xlane.f32.xlu2 %v1669_v21 }
 0x34e   :  { %1640 = vmax.xlane.f32.xlu1 %v1639_v31 }
 0x351   :  { %1667 = vmax.xlane.f32.xlu0 %v1666_v9 }
 0x354   :  { %1649 = vmax.xlane.f32.xlu2 %v1648_v63  ;;  %v4564_v63 = vunpack.i.l.bf16 %v5992_v57 }
 0x356   :  { %v1770_v37 = vpop.xlane.xlu2 %1769 }
 0x357   :  { %4669 = vrcp.f32 %v1770_v37 }
 0x35a   :  { %v1602_v19 = vpop.xlane.xlu0 %1601 }
 0x35b   :  { %v1680_v26 = vsub.f32 %v5959_v15, %v1602_v19 }
 0x35c   :  { %1661 = vmax.xlane.f32.xlu2 %v1660_v52 }
 0x35d   :  { %v4670_v29 = vpop.eup %4669  ;;  %v1720_v38 = vmul.f32 1.442695, %v1680_v26 }
 0x35e   :  { %v1896_v51 = vmul.f32 %v4670_v29, %v5954_v45  ;;  %v1635_v32 = vpop.xlane.xlu2 %1634 }
 0x35f   :  { %4671 = vpow2.f32 %v1720_v38 }
 0x360   :  { %4440 = vmatmul.msk.f32.vlgmr.msra.gmra.mxu2 %vm807_vm2, %v1896_v51  ;;  %v1679_v51 = vsub.f32 %v5940_v3, %v1599_v41  ;;  %v1691_v41 = vsub.f32 %v5963_v54, %v1635_v32 }
 0x361   :  { %2157 = vmatpush.msra.mxu2 %v4555_v42 }
 0x362   :  { %v1608_v26 = vpop.xlane.xlu0 %1607  ;;  %v1718_v52 = vmul.f32 1.442695, %v1679_v51 }
 0x365   :  { %v6091_v15 = vpop.eup %4671 }
 0x366   :  { %v1776_v33 = vpop.xlane.xlu2 %1775  ;;  %v1792_v31 = vsel %vm807_vm2, %v6091_v15, 0.0 }
 0x367   :  { %4673 = vrcp.f32 %v1776_v33  ;;  %1793 = vadd.xlane.f32.xlu2 %v1792_v31 }
 0x36c   :  { %v1596_v45 = vpop.xlane.xlu1 %1595 }
 0x36d   :  { %v1678_v10 = vsub.f32 %v5952_v23, %v1596_v45  ;;  %v4674_v21 = vpop.eup %4673  ;;  %v1682_v23 = vsub.f32 %v5967_v20, %v1608_v26  ;;  %v1636_v20 = vsel %vm807_vm2, %v6057_v53, -inf }
 0x36e   :  { %v1898_v9 = vmul.f32 %v4674_v21, %v5971_v39  ;;  %v1614_v31 = vpop.xlane.xlu2 %1613 }
 0x36f   :  { %v1716_v37 = vmul.f32 1.442695, %v1678_v10  ;;  %v1724_v33 = vmul.f32 1.442695, %v1682_v23 }
 0x370   :  { %4442 = vmatmul.msk.f32.vlgmr.msrb.gmra.mxu0 %vm807_vm2, %v1898_v9 }
 0x371   :  { %4675 = vpow2.f32 %v1716_v37  ;;  %2209 = vmatpush.msrb.mxu0 %v4564_v63 }
 0x374   :  { %v1605_v19 = vpop.xlane.xlu1 %1604 }
 0x375   :  { %v1681_v29 = vsub.f32 %v5981_v13, %v1605_v19  ;;  %v1684_v13 = vsub.f32 %v5975_v47, %v1614_v31 }
 0x377   :  { %v6100_v38 = vpop.eup %4675  ;;  %v1722_v42 = vmul.f32 1.442695, %v1681_v29  ;;  %v1728_v37 = vmul.f32 1.442695, %v1684_v13 }
 0x378   :  { %v1786_v39 = vsel %vm807_vm2, %v6100_v38, 0.0 }
 0x379   :  { %4677 = vpow2.f32 %v1722_v42  ;;  %1787 = vadd.xlane.f32.xlu0 %v1786_v39  ;;  %v6127_v42 = vpop.f32.mrf.mxu3 }
 0x37a   :  { %4679 = vpow2.f32 %v1718_v52 }
 0x37b   :  { %4681 = vpow2.f32 %v1724_v33  ;;  %v4560_v33 = vunpack.i.h.bf16 %v5923_v0 }
 0x37c   :  { %v1632_v45 = vpop.xlane.xlu1 %1631 }
 0x37d   :  { %v1690_v10 = vsub.f32 %v5986_v25, %v1632_v45  ;;  %v1742_v25 = vmul.f32 1.442695, %v1691_v41 }
 0x37f   :  { %v6107_v21 = vpop.eup %4677  ;;  %v1740_v3 = vmul.f32 1.442695, %v1690_v10 }
 0x380   :  { %v1795_v9 = vsel %vm807_vm2, %v6107_v21, 0.0  ;;  %v6115_v19 = vpop.eup %4679 }
 0x381   :  { %4683 = vpow2.f32 %v1740_v3  ;;  %1637 = vmax.xlane.f32.xlu0 %v1636_v20  ;;  %1796 = vadd.xlane.f32.xlu2 %v1795_v9  ;;  %v6117_v47 = vpop.eup %4681  ;;  %v1789_v32 = vsel %vm807_vm2, %v6115_v19, 0.0  ;;  %v1651_v3 = vsel %vm807_vm2, %v6127_v42, -inf }
 0x382   :  { %v1798_v29 = vsel %vm807_vm2, %v6117_v47, 0.0 }
 0x384   :  { %v1773_v63 = vpop.xlane.xlu1 %1772 }
 0x385   :  { %4685 = vrcp.f32 %v1773_v63 }
 0x386   :  { %4687 = vpow2.f32 %v1728_v37 }
 0x387   :  { %v6119_v26 = vpop.eup %4683  ;;  %4689 = vpow2.f32 %v1742_v25 }
 0x388   :  { %v1822_v54 = vsel %vm807_vm2, %v6119_v26, 0.0 }
 0x389   :  { %1823 = vadd.xlane.f32.xlu1 %v1822_v54  ;;  %1790 = vadd.xlane.f32.xlu0 %v1789_v32  ;;  %v4574_v32 = vunpack.i.l.bf16 %v6075_v16 }
 0x38a   :  { %1799 = vadd.xlane.f32.xlu2 %v1798_v29 }
 0x38b   :  { %v4686_v51 = vpop.eup %4685 }
 0x38c   :  { %v1897_v23 = vmul.f32 %v4686_v51, %v5990_v55  ;;  %v1611_v39 = vpop.xlane.xlu1 %1610  ;;  %v6130_v52 = vpop.eup %4687 }
 0x38d   :  { %v1683_v31 = vsub.f32 %v6002_v60, %v1611_v39  ;;  %v6134_v45 = vpop.eup %4689  ;;  %v1804_v13 = vsel %vm807_vm2, %v6130_v52, 0.0  ;;  %v6143_v55 = vpop.f32.mrf.mxu3 }
 0x38e   :  { %4441 = vmatmul.msk.f32.vlgmr.msra.gmra.mxu3 %vm807_vm2, %v1897_v23  ;;  %v1825_v0 = vsel %vm807_vm2, %v6134_v45, 0.0  ;;  %v1663_v41 = vsel %vm807_vm2, %v6143_v55, -inf }
 0x38f   :  { %v1726_v10 = vmul.f32 1.442695, %v1683_v31  ;;  %2183 = vmatpush.msra.mxu3 %v4560_v33  ;;  %v4565_v31 = vunpack.i.h.bf16 %v5992_v57 }
 0x391   :  { %4691 = vpow2.f32 %v1726_v10  ;;  %1805 = vadd.xlane.f32.xlu1 %v1804_v13  ;;  %1652 = vmax.xlane.f32.xlu0 %v1651_v3  ;;  %v1620_v10 = vpop.xlane.xlu2 %1619 }
 0x392   :  { %1826 = vadd.xlane.f32.xlu2 %v1825_v0 }
 0x397   :  { %v6145_v60 = vpop.eup %4691 }
 0x398   :  { %v1801_v20 = vsel %vm807_vm2, %v6145_v60, 0.0 }
 0x399   :  { %1664 = vmax.xlane.f32.xlu0 %v1663_v41 }
 0x39a   :  { %1802 = vadd.xlane.f32.xlu2 %v1801_v20 }
 0x39c   :  { %v1779_v9 = vpop.xlane.xlu0 %1778 }
 0x39d   :  { %4693 = vrcp.f32 %v1779_v9 }
 0x3a1   :  { %v1782_v37 = vpop.xlane.xlu1 %1781 }
 0x3a2   :  { %4695 = vrcp.f32 %v1782_v37 }
 0x3a3   :  { %v4694_v25 = vpop.eup %4693 }
 0x3a4   :  { %v1899_v63 = vmul.f32 %v4694_v25, %v6012_v27  ;;  %v1617_v54 = vpop.xlane.xlu0 %1616 }
 0x3a5   :  { %v1685_v29 = vsub.f32 %v6020_v24, %v1617_v54  ;;  %v1686_v24 = vsub.f32 %v5996_v35, %v1620_v10 }
 0x3a6   :  { %4443 = vmatmul.msk.f32.vlgmr.msrb.gmra.mxu1 %vm807_vm2, %v1899_v63 }
 0x3a7   :  { %v1730_v51 = vmul.f32 1.442695, %v1685_v29  ;;  %2235 = vmatpush.msrb.mxu1 %v4574_v32  ;;  %v1732_v20 = vmul.f32 1.442695, %v1686_v24 }
 0x3a8   :  { %v4696_v23 = vpop.eup %4695 }
 0x3a9   :  { %v1900_v39 = vmul.f32 %v4696_v23, %v6018_v34  ;;  %4697 = vpow2.f32 %v1730_v51  ;;  %v1647_v33 = vpop.xlane.xlu1 %1646 }
 0x3aa   :  { %v1695_v25 = vsub.f32 %v6026_v56, %v1647_v33  ;;  %v4575_v56 = vunpack.i.h.bf16 %v6075_v16 }
 0x3ab   :  { %4444 = vmatmul.msk.f32.vlgmr.msrb.gmra.mxu2 %vm807_vm2, %v1900_v39 }
 0x3ac   :  { %2261 = vmatpush.msrb.mxu2 %v4565_v31  ;;  %v1644_v27 = vpop.xlane.xlu0 %1643  ;;  %v1750_v51 = vmul.f32 1.442695, %v1695_v25 }
 0x3ad   :  { %v1694_v13 = vsub.f32 %v6028_v4, %v1644_v27 }
 0x3af   :  { %v6159_v3 = vpop.eup %4697  ;;  %v1748_v0 = vmul.f32 1.442695, %v1694_v13  ;;  %v1785_v57 = vpop.xlane.xlu2 %1784 }
 0x3b0   :  { %v1807_v41 = vsel %vm807_vm2, %v6159_v3, 0.0 }
 0x3b1   :  { %4699 = vpow2.f32 %v1748_v0  ;;  %v1626_v34 = vpop.xlane.xlu1 %1625  ;;  %1808 = vadd.xlane.f32.xlu2 %v1807_v41 }
 0x3b2   :  { %4701 = vrcp.f32 %v1785_v57  ;;  %v1688_v35 = vsub.f32 %v6037_v48, %v1626_v34 }
 0x3b3   :  { %4703 = vpow2.f32 %v1732_v20 }
 0x3b4   :  { %v1656_v9 = vpop.xlane.xlu0 %1655  ;;  %v1736_v39 = vmul.f32 1.442695, %v1688_v35 }
 0x3b5   :  { %v1698_v37 = vsub.f32 %v6039_v12, %v1656_v9 }
 0x3b7   :  { %v6166_v4 = vpop.eup %4699  ;;  %v1756_v63 = vmul.f32 1.442695, %v1698_v37  ;;  %v1629_v12 = vpop.xlane.xlu2 %1628 }
 0x3b8   :  { %v1834_v54 = vsel %vm807_vm2, %v6166_v4, 0.0  ;;  %v4702_v29 = vpop.eup %4701 }
 0x3b9   :  { %4705 = vpow2.f32 %v1756_v63  ;;  %v1659_v32 = vpop.xlane.xlu1 %1658  ;;  %1835 = vadd.xlane.f32.xlu0 %v1834_v54  ;;  %v1901_v23 = vmul.f32 %v4702_v29, %v6043_v22  ;;  %v6173_v31 = vpop.eup %4703  ;;  %v1689_v22 = vsub.f32 %v6047_v43, %v1629_v12 }
 0x3ba   :  { %4707 = vpow2.f32 %v1750_v51  ;;  %v1699_v10 = vsub.f32 %v6051_v44, %v1659_v32  ;;  %v1810_v16 = vsel %vm807_vm2, %v6173_v31, 0.0 }
 0x3bb   :  { %4445 = vmatmul.msk.f32.vlgmr.msrb.gmra.mxu3 %vm807_vm2, %v1901_v23  ;;  %4709 = vpow2.f32 %v1736_v39  ;;  %v1738_v41 = vmul.f32 1.442695, %v1689_v22 }
 0x3bc   :  { %v1623_v33 = vpop.xlane.xlu0 %1622  ;;  %2287 = vmatpush.msrb.mxu3 %v4575_v56 }
 0x3bd   :  { %v1687_v48 = vsub.f32 %v6033_v14, %v1623_v33  ;;  %v1758_v14 = vmul.f32 1.442695, %v1699_v10 }
 0x3bf   :  { %v6178_v27 = vpop.eup %4705  ;;  %v1734_v13 = vmul.f32 1.442695, %v1687_v48  ;;  %v6186_v34 = vpop.xlane.xlu2 %1670 }
 0x3c0   :  { %v1846_v24 = vsel %vm807_vm2, %v6178_v27, 0.0  ;;  %v6188_v20 = vpop.eup %4707 }
 0x3c1   :  { %4711 = vpow2.f32 %v1734_v13  ;;  %v1641_v0 = vpop.xlane.xlu1 %1640  ;;  %1811 = vadd.xlane.f32.xlu0 %v1810_v16  ;;  %1847 = vadd.xlane.f32.xlu1 %v1846_v24  ;;  %v6190_v57 = vpop.eup %4709  ;;  %v1837_v37 = vsel %vm807_vm2, %v6188_v20, 0.0 }
 0x3c2   :  { %v1693_v44 = vsub.f32 %v6061_v8, %v1641_v0  ;;  %4713 = vpow2.f32 %v1758_v14  ;;  %v1816_v25 = vsel %vm807_vm2, %v6190_v57, 0.0 }
 0x3c3   :  { %4715 = vpow2.f32 %v1738_v41 }
 0x3c4   :  { %v1746_v43 = vmul.f32 1.442695, %v1693_v44  ;;  %v6224_v14 = vpop.xlane.xlu0 %1667  ;;  %v4606_v44 = vpack.i.bf16 %v5844_v28, %v5786_v46 }
 0x3c6   :  { %4717 = vpow2.f32 %v1746_v43 }
 0x3c7   :  { %v6192_v9 = vpop.eup %4711  ;;  %v1650_v35 = vpop.xlane.xlu2 %1649 }
 0x3c8   :  { %v1813_v8 = vsel %vm807_vm2, %v6192_v9, 0.0  ;;  %v6200_v63 = vpop.eup %4713  ;;  %v1696_v54 = vsub.f32 %v6073_v30, %v1650_v35 }
 0x3c9   :  { %1838 = vadd.xlane.f32.xlu0 %v1837_v37  ;;  %1817 = vadd.xlane.f32.xlu1 %v1816_v25  ;;  %v6203_v32 = vpop.eup %4715  ;;  %v1849_v23 = vsel %vm807_vm2, %v6200_v63, 0.0 }
 0x3ca   :  { %1814 = vadd.xlane.f32.xlu2 %v1813_v8  ;;  %v1752_v51 = vmul.f32 1.442695, %v1696_v54  ;;  %v1819_v39 = vsel %vm807_vm2, %v6203_v32, 0.0  ;;  %v4584_v8 = vunpack.i.l.bf16 %v6009_v50 }
 0x3cc   :  { %v6205_v29 = vpop.eup %4717  ;;  %4719 = vpow2.f32 %v1752_v51 }
 0x3cd   :  { %v1831_v12 = vsel %vm807_vm2, %v6205_v29, 0.0 }
 0x3cf   :  { %v1662_v56 = vpop.xlane.xlu2 %1661 }
 0x3d0   :  { %v1700_v30 = vsub.f32 %v6082_v6, %v1662_v56  ;;  %v4585_v6 = vunpack.i.h.bf16 %v6009_v50 }
 0x3d1   :  { %1850 = vadd.xlane.f32.xlu0 %v1849_v23  ;;  %1820 = vadd.xlane.f32.xlu1 %v1819_v39 }
 0x3d2   :  { %1832 = vadd.xlane.f32.xlu2 %v1831_v12  ;;  %v6214_v33 = vpop.eup %4719  ;;  %v1760_v48 = vmul.f32 1.442695, %v1700_v30 }
 0x3d3   :  { %v1840_v10 = vsel %vm807_vm2, %v6214_v33, 0.0 }
 0x3d4   :  { %4721 = vpow2.f32 %v1760_v48  ;;  %v4569_v48 = vunpack.i.l.bf16 %v5998_v17 }
 0x3da   :  { %1841 = vadd.xlane.f32.xlu2 %v1840_v10  ;;  %v1794_v22 = vpop.xlane.xlu2 %1793  ;;  %v6218_v13 = vpop.eup %4721 }
 0x3db   :  { %4723 = vrcp.f32 %v1794_v22  ;;  %v1852_v16 = vsel %vm807_vm2, %v6218_v13, 0.0  ;;  %v4594_v22 = vunpack.i.l.bf16 %v6079_v62 }
 0x3e1   :  { %v4724_v24 = vpop.eup %4723 }
 0x3e2   :  { %1853 = vadd.xlane.f32.xlu2 %v1852_v16  ;;  %v1904_v0 = vmul.f32 %v4724_v24, %v6091_v15  ;;  %v1703_v16 = vsub.f32 %v6063_v59, %v6186_v34  ;;  %v1702_v34 = vsub.f32 %v6065_v58, %v6224_v14 }
 0x3e4   :  { %4448 = vmatmul.msk.f32.vlgmr.msra.gmra.mxu2 %vm807_vm2, %v1904_v0  ;;  %v1766_v0 = vmul.f32 1.442695, %v1703_v16 }
 0x3e5   :  { %2365 = vmatpush.msra.mxu2 %v4585_v6 }
 0x3ea   :  { %4607 = vrot.lane.b32.xlu1 %v4606_v44, %s5023_s19 }
 0x3ec   :  { %v1788_v41 = vpop.xlane.xlu0 %1787 }
 0x3ed   :  { %4725 = vrcp.f32 %v1788_v41 }
 0x3f2   :  { %4612 = vrot.lane.b32.xlu1 %v4611_v61, %s5023_s19  ;;  %v4595_v61 = vunpack.i.h.bf16 %v6079_v62 }
 0x3f3   :  { %v4726_v15 = vpop.eup %4725 }
 0x3f4   :  { %v1902_v43 = vmul.f32 %v4726_v15, %v6100_v38  ;;  %v1797_v37 = vpop.xlane.xlu2 %1796  ;;  %v1638_v25 = vpop.xlane.xlu0 %1637 }
 0x3f5   :  { %4727 = vrcp.f32 %v1797_v37  ;;  %v1692_v35 = vsub.f32 %v6057_v53, %v1638_v25  ;;  %v4579_v37 = vunpack.i.l.bf16 %v6006_v40 }
 0x3f6   :  { %4446 = vmatmul.msk.f32.vlgmr.msra.gmra.mxu0 %vm807_vm2, %v1902_v43 }
 0x3f7   :  { %v1744_v46 = vmul.f32 1.442695, %v1692_v35  ;;  %2313 = vmatpush.msra.mxu0 %v4584_v8 }
 0x3f9   :  { %4729 = vpow2.f32 %v1744_v46 }
 0x3fb   :  { %v4728_v28 = vpop.eup %4727 }
 0x3fc   :  { %v1905_v54 = vmul.f32 %v4728_v28, %v6107_v21  ;;  %v6239_v49 = vpop.xlane.xlu1 %1823  ;;  %v1791_v7 = vpop.xlane.xlu0 %1790 }
 0x3fd   :  { %v1800_v38 = vpop.xlane.xlu2 %1799  ;;  %v6285_v28 = vpop.f32.mrf.mxu2 }
 0x3fe   :  { %4731 = vrcp.f32 %v1800_v38  ;;  %4449 = vmatmul.msk.f32.vlgmr.msra.gmra.mxu3 %vm807_vm2, %v1905_v54  ;;  %v3279_v38 = vrot.slane %v6285_v28, 4 }
 0x3ff   :  { %v6243_v50 = vpop.eup %4729  ;;  %4733 = vrcp.f32 %v1791_v7  ;;  %2391 = vmatpush.msra.mxu3 %v4595_v61 }
 0x400   :  { %v1828_v53 = vsel %vm807_vm2, %v6243_v50, 0.0 }
 0x401   :  { %1829 = vadd.xlane.f32.xlu0 %v1828_v53  ;;  %v6292_v53 = vpop.f32.mrf.mxu0 }
 0x404   :  { %v4732_v51 = vpop.eup %4731  ;;  %v1806_v23 = vpop.xlane.xlu1 %1805 }
 0x405   :  { %v1653_v21 = vpop.xlane.xlu0 %1652  ;;  %v4734_v39 = vpop.eup %4733  ;;  %v1906_v12 = vmul.f32 %v4732_v51, %v6117_v47  ;;  %4735 = vrcp.f32 %v1806_v23  ;;  %v3089_v23 = vrot.slane %v6285_v28, 3 }
 0x406   :  { %v6248_v56 = vpop.xlane.xlu2 %1826  ;;  %v1697_v30 = vsub.f32 %v6127_v42, %v1653_v21  ;;  %v1903_v10 = vmul.f32 %v4734_v39, %v6115_v19  ;;  %v4570_v19 = vunpack.i.h.bf16 %v5998_v17  ;;  %v1764_v17 = vmul.f32 1.442695, %v1702_v34 }
 0x407   :  { %4450 = vmatmul.msk.f32.vlgmr.msrb.gmra.mxu0 %vm807_vm2, %v1906_v12  ;;  %v4580_v39 = vunpack.i.h.bf16 %v6006_v40  ;;  %v3469_v12 = vrot.slane %v6285_v28, 7 }
 0x408   :  { %v1754_v24 = vmul.f32 1.442695, %v1697_v30  ;;  %4447 = vmatmul.msk.f32.vlgmr.msra.gmra.mxu1 %vm807_vm2, %v1903_v10  ;;  %2417 = vmatpush.msrb.mxu0 %v4569_v48  ;;  %v3092_v10 = vrot.slane %v6292_v53, 1 }
 0x409   :  { %2339 = vmatpush.msra.mxu1 %v4594_v22  ;;  %v3282_v22 = vrot.slane %v6292_v53, 2 }
 0x40a   :  { %4737 = vpow2.f32 %v1754_v24 }
 0x40b   :  { %v4736_v47 = vpop.eup %4735 }
 0x40c   :  { %v1908_v42 = vmul.f32 %v4736_v47, %v6130_v52 }
 0x40d   :  { %v1665_v6 = vpop.xlane.xlu0 %1664 }
 0x40e   :  { %v1803_v44 = vpop.xlane.xlu2 %1802  ;;  %v1701_v62 = vsub.f32 %v6143_v55, %v1665_v6  ;;  %4452 = vmatmul.msk.f32.vlgmr.msrb.gmra.mxu2 %vm807_vm2, %v1908_v42  ;;  %v3472_v42 = vrot.slane %v6292_v53, 5 }
 0x40f   :  { %4739 = vrcp.f32 %v1803_v44  ;;  %2469 = vmatpush.msrb.mxu2 %v4570_v19 }
 0x410   :  { %v6262_v59 = vpop.eup %4737  ;;  %4741 = vpow2.f32 %v1766_v0  ;;  %v1762_v41 = vmul.f32 1.442695, %v1701_v62 }
 0x411   :  { %v1843_v52 = vsel %vm807_vm2, %v6262_v59, 0.0  ;;  %v6283_v35 = vpop.f32.mrf.mxu3 }
 0x412   :  { %4743 = vpow2.f32 %v1762_v41  ;;  %1844 = vadd.xlane.f32.xlu0 %v1843_v52  ;;  %v3280_v54 = vrot.slane %v6283_v35, 3  ;;  %v3090_v7 = vrot.slane %v6283_v35, 2  ;;  %v3470_v51 = vrot.slane %v6283_v35, 6 }
 0x413   :  { %4745 = vpow2.f32 %v1764_v17 }
 0x414   :  { %v3281_v30 = vsel %vm2796_vm6, %v3280_v54, %v3279_v38  ;;  %v3091_v47 = vsel %vm2796_vm6, %v3090_v7, %v3089_v23  ;;  %v3471_v40 = vsel %vm2796_vm6, %v3470_v51, %v3469_v12 }
 0x415   :  { %v4740_v15 = vpop.eup %4739  ;;  %v3093_v19 = vsel %vm2799_vm7, %v3092_v10, %v3091_v47 }
 0x416   :  { %v6268_v43 = vpop.eup %4741  ;;  %v1907_v55 = vmul.f32 %v4740_v15, %v6145_v60 }
 0x417   :  { %v1861_v58 = vsel %vm807_vm2, %v6268_v43, 0.0 }
 0x418   :  { %v6272_v25 = vpop.eup %4743  ;;  %4451 = vmatmul.msk.f32.vlgmr.msrb.gmra.mxu1 %vm807_vm2, %v1907_v55 }
 0x419   :  { %2443 = vmatpush.msrb.mxu1 %v4579_v37  ;;  %v1855_v14 = vsel %vm807_vm2, %v6272_v25, 0.0  ;;  %v6279_v8 = vpop.eup %4745 }
 0x41a   :  { %1862 = vadd.xlane.f32.xlu0 %v1861_v58  ;;  %1856 = vadd.xlane.f32.xlu2 %v1855_v14  ;;  %v1858_v60 = vsel %vm807_vm2, %v6279_v8, 0.0 }
 0x422   :  { %1859 = vadd.xlane.f32.xlu2 %v1858_v60 }
 0x423   :  { %v6289_v61 = vpop.f32.mrf.mxu1 }
 0x424   :  { %v1809_v46 = vpop.xlane.xlu2 %1808  ;;  %v3284_v48 = vrot.slane %v6289_v61, 1  ;;  %v3474_v0 = vrot.slane %v6289_v61, 4  ;;  %v3094_v34 = vsel %vm2802_vm9, %v6289_v61, %v3093_v19 }
 0x425   :  { %4747 = vrcp.f32 %v1809_v46  ;;  %v4589_v46 = vunpack.i.l.bf16 %v6016_v2 }
 0x42b   :  { %v4748_v21 = vpop.eup %4747 }
 0x42c   :  { %v1909_v16 = vmul.f32 %v4748_v21, %v6159_v3  ;;  %v1836_v24 = vpop.xlane.xlu0 %1835  ;;  %v3283_v3 = vsel %vm2799_vm7, %v3282_v22, %v3281_v30 }
 0x42d   :  { %v3285_v44 = vsel %vm2802_vm9, %v3284_v48, %v3283_v3 }
 0x42e   :  { %4602 = vrot.lane.b32.xlu0 %v4601_v5, %s5023_s19  ;;  %v6311_v6 = vpop.f32.mrf.mxu2  ;;  %4453 = vmatmul.msk.f32.vlgmr.msrb.gmra.mxu3 %vm807_vm2, %v1909_v16  ;;  %v3473_v5 = vsel %vm2799_vm7, %v3472_v42, %v3471_v40  ;;  %v4590_v16 = vunpack.i.h.bf16 %v6016_v2  ;;  %v4600_v42 = vunpack.i.h.bf16 %v6089_v11 }
 0x42f   :  { %2495 = vmatpush.msrb.mxu3 %v4580_v39  ;;  %v3095_v1 = vrot.slane %v6311_v6, 7  ;;  %v3286_v18 = vsel %vm2805_vm8, %v6311_v6, %v3285_v44  ;;  %v3476_v62 = vrot.slane %v6311_v6, 3  ;;  %v3475_v41 = vsel %vm2802_vm9, %v3474_v0, %v3473_v5 }
 0x431   :  { %v3096_v52 = vsel %vm2805_vm8, %v3095_v1, %v3094_v34  ;;  %v3477_v17 = vsel %vm2805_vm8, %v3476_v62, %v3475_v41 }
 0x434   :  { %v6327_v15 = vpop.xlane.xlu1 %1847  ;;  %v1812_v55 = vpop.xlane.xlu0 %1811 }
 0x435   :  { %4749 = vrcp.f32 %v1812_v55 }
 0x436   :  { %4751 = vrcp.f32 %v6239_v49 }
 0x43b   :  { %v4750_v37 = vpop.eup %4749 }
 0x43c   :  { %v1818_v58 = vpop.xlane.xlu1 %1817  ;;  %v1910_v14 = vmul.f32 %v4750_v37, %v6173_v31  ;;  %v4752_v7 = vpop.eup %4751 }
 0x43d   :  { %4753 = vrcp.f32 %v1818_v58  ;;  %v1815_v60 = vpop.xlane.xlu2 %1814  ;;  %v1914_v48 = vmul.f32 %v4752_v7, %v6119_v26 }
 0x43e   :  { %4755 = vrcp.f32 %v1815_v60  ;;  %4454 = vmatmul.msk.f32.vlgmr.msra.gmra.mxu0 %vm807_vm2, %v1910_v14  ;;  %v6333_v54 = vpop.f32.mrf.mxu3 }
 0x43f   :  { %2521 = vmatpush.msra.mxu0 %v4589_v46  ;;  %v3097_v38 = vrot.slane %v6333_v54, 6  ;;  %v3287_v51 = vrot.slane %v6333_v54, 7  ;;  %v3478_v49 = vrot.slane %v6333_v54, 2  ;;  %4757 = vrcp.f32 %v6248_v56  ;;  %v6375_v46 = vld [vmem:[#allocation5 + $0x10] sm:$0xff] }
 0x440   :  { %4759 = vrcp.f32 %v1836_v24  ;;  %v4599_v56 = vunpack.i.l.bf16 %v6089_v11 }
 0x441   :  { %v3098_v12 = vsel %vm2808_vm10, %v3097_v38, %v3096_v52  ;;  %v3288_v30 = vsel %vm2808_vm10, %v3287_v51, %v3286_v18  ;;  %v3479_v22 = vsel %vm2808_vm10, %v3478_v49, %v3477_v17 }
 0x443   :  { %v4754_v23 = vpop.eup %4753 }
 0x444   :  { %v4756_v31 = vpop.eup %4755  ;;  %v1912_v21 = vmul.f32 %v4754_v23, %v6190_v57  ;;  %v1821_v39 = vpop.xlane.xlu1 %1820 }
 0x445   :  { %v1911_v10 = vmul.f32 %v4756_v31, %v6192_v9  ;;  %4761 = vrcp.f32 %v1821_v39  ;;  %v1839_v57 = vpop.xlane.xlu0 %1838  ;;  %v1833_v24 = vpop.xlane.xlu2 %1832 }
 0x446   :  { %4456 = vmatmul.msk.f32.vlgmr.msra.gmra.mxu2 %vm807_vm2, %v1912_v21  ;;  %4458 = vmatmul.msk.f32.vlgmr.msrb.gmra.mxu0 %vm807_vm2, %v1914_v48  ;;  %v4758_v26 = vpop.eup %4757  ;;  %4763 = vrcp.f32 %v1833_v24 }
 0x447   :  { %4455 = vmatmul.msk.f32.vlgmr.msra.gmra.mxu1 %vm807_vm2, %v1911_v10  ;;  %2573 = vmatpush.msra.mxu2 %v4590_v16  ;;  %v4760_v47 = vpop.eup %4759  ;;  %4765 = vrcp.f32 %v1839_v57  ;;  %v1915_v2 = vmul.f32 %v4758_v26, %v6134_v45 }
 0x448   :  { %2547 = vmatpush.msra.mxu1 %v4599_v56  ;;  %v1918_v40 = vmul.f32 %v4760_v47, %v6166_v4 }
 0x44b   :  { %v4762_v9 = vpop.eup %4761 }
 0x44c   :  { %v1913_v0 = vmul.f32 %v4762_v9, %v6203_v32  ;;  %v4764_v3 = vpop.eup %4763 }
 0x44d   :  { %v4766_v19 = vpop.eup %4765  ;;  %v1851_v44 = vpop.xlane.xlu0 %1850  ;;  %v1917_v1 = vmul.f32 %v4764_v3, %v6205_v29 }
 0x44e   :  { %4457 = vmatmul.msk.f32.vlgmr.msra.gmra.mxu3 %vm807_vm2, %v1913_v0  ;;  %4462 = vmatmul.msk.f32.vlgmr.msra.gmra.mxu0 %vm807_vm2, %v1918_v40  ;;  %v1919_v32 = vmul.f32 %v4766_v19, %v6188_v20  ;;  %4767 = vrcp.f32 %v1851_v44  ;;  %v1842_v37 = vpop.xlane.xlu2 %1841 }
 0x44f   :  { %4459 = vmatmul.msk.f32.vlgmr.msrb.gmra.mxu1 %vm807_vm2, %v1915_v2  ;;  %2599 = vmatpush.msra.mxu3 %v4600_v42  ;;  %v2760_v42 = vld [vmem:[#allocation5] sm:$0xff] }
 0x454   :  { %v4768_v11 = vpop.eup %4767 }
 0x455   :  { %v1923_v5 = vmul.f32 %v4768_v11, %v6200_v63  ;;  %v2895_v11 = vrot.slane %v6283_v35, 7 }
 0x456   :  { %4461 = vmatmul.msk.f32.vlgmr.msrb.gmra.mxu3 %vm807_vm2, %v1917_v1  ;;  %v1854_v39 = vpop.xlane.xlu2 %1853 }
 0x457   :  { %4463 = vmatmul.msk.f32.vlgmr.msra.gmra.mxu1 %vm807_vm2, %v1919_v32 }
 0x45c   :  { %v4608_v45 = vpop.permute.xlu1 %4607 }
 0x45d   :  { %v4610_v4 = vunpack.i.h.bf16 %v4608_v45  ;;  %v4609_v18 = vunpack.i.l.bf16 %v4608_v45  ;;  %v2991_v45 = vrot.slane %v6283_v35, 1 }
 0x45f   :  { %2651 = vmatpush.msrb.mxu1 %v4609_v18  ;;  %2703 = vmatpush.msrb.mxu3 %v4610_v4  ;;  %v2990_v18 = vrot.slane %v6285_v28, 2 }
 0x460   :  { %4467 = vmatmul.msk.f32.vlgmr.msrb.gmra.mxu1 %vm807_vm2, %v1923_v5 }
 0x464   :  { %v6363_v62 = vpop.permute.xlu1 %4612 }
 0x465   :  { %v4615_v29 = vunpack.i.h.bf16 %v6363_v62 }
 0x467   :  { %2755 = vmatpush.msra.mxu1 %v4615_v29  ;;  %v6379_v7 = vpop.f32.mrf.mxu2  ;;  %v2896_v29 = vsel %vm2796_vm6, %v2895_v11, %v6285_v28 }
 0x468   :  { %v3103_v49 = vrot.slane %v6379_v7, 3  ;;  %v3483_v23 = vrot.slane %v6379_v7, 7  ;;  %v3293_v56 = vrot.slane %v6379_v7, 4 }
 0x469   :  { %3069 = vmatpush.msrb.mxu1 %v6375_v46 }
 0x473   :  { %v6366_v20 = vpop.f32.mrf.mxu0 }
 0x474   :  { %v1830_v34 = vpop.xlane.xlu0 %1829  ;;  %v3099_v41 = vrot.slane %v6366_v20, 5  ;;  %v3289_v52 = vrot.slane %v6366_v20, 6  ;;  %v3480_v55 = vrot.slane %v6366_v20, 1 }
 0x475   :  { %4769 = vrcp.f32 %v1830_v34 }
 0x476   :  { %v3100_v63 = vsel %vm2811_vm11, %v3099_v41, %v3098_v12  ;;  %v3290_v17 = vsel %vm2811_vm11, %v3289_v52, %v3288_v30  ;;  %v3481_v58 = vsel %vm2811_vm11, %v3480_v55, %v3479_v22  ;;  %4771 = vrcp.f32 %v1842_v37 }
 0x477   :  { %v2897_v41 = vrot.slane %v6292_v53, 6  ;;  %v2992_v52 = vsel %vm2796_vm6, %v2991_v45, %v2990_v18 }
 0x47b   :  { %v4770_v14 = vpop.eup %4769 }
 0x47c   :  { %v1916_v60 = vmul.f32 %v4770_v14, %v6243_v50  ;;  %v4772_v38 = vpop.eup %4771 }
 0x47d   :  { %v1920_v50 = vmul.f32 %v4772_v38, %v6214_v33  ;;  %v2994_v38 = vrot.slane %v6289_v61, 7 }
 0x47e   :  { %4460 = vmatmul.msk.f32.vlgmr.msrb.gmra.mxu2 %vm807_vm2, %v1916_v60  ;;  %v2898_v60 = vsel %vm2799_vm7, %v2897_v41, %v2896_v29  ;;  %v2795_v41 = vrot.slane %v6285_v28, 1 }
 0x481   :  { %v6381_v51 = vpop.f32.mrf.mxu3 }
 0x482   :  { %v3104_v31 = vrot.slane %v6381_v51, 2  ;;  %v3484_v21 = vrot.slane %v6381_v51, 6  ;;  %v3294_v10 = vrot.slane %v6381_v51, 3 }
 0x484   :  { %v3105_v30 = vsel %vm2796_vm6, %v3104_v31, %v3103_v49  ;;  %v3485_v48 = vsel %vm2796_vm6, %v3484_v21, %v3483_v23  ;;  %v6394_v16 = vpop.f32.mrf.mxu0  ;;  %v3295_v26 = vsel %vm2796_vm6, %v3294_v10, %v3293_v56  ;;  %v2901_v49 = vrot.slane %v6311_v6, 4 }
 0x485   :  { %v1845_v12 = vpop.xlane.xlu0 %1844  ;;  %v6392_v22 = vpop.f32.mrf.mxu1  ;;  %v3106_v24 = vrot.slane %v6394_v16, 1  ;;  %v3296_v9 = vrot.slane %v6394_v16, 2  ;;  %v2993_v23 = vsel %vm2799_vm7, %v6292_v53, %v2992_v52  ;;  %v2996_v31 = vrot.slane %v6311_v6, 6 }
 0x486   :  { %4773 = vrcp.f32 %v1845_v12  ;;  %4464 = vmatmul.msk.f32.vlgmr.msra.gmra.mxu2 %vm807_vm2, %v1920_v50  ;;  %v3101_v33 = vrot.slane %v6392_v22, 4  ;;  %v3291_v57 = vrot.slane %v6392_v22, 5  ;;  %v6413_v32 = vsel %vm2814_vm12, %v6392_v22, %v3481_v58 }
 0x487   :  { %v3107_v44 = vsel %vm2799_vm7, %v3106_v24, %v3105_v30  ;;  %v3297_v1 = vsel %vm2799_vm7, %v3296_v9, %v3295_v26  ;;  %v2899_v58 = vrot.slane %v6289_v61, 5  ;;  %v2905_v30 = vrot.slane %v6366_v20, 2 }
 0x488   :  { %v6404_v3 = vsel %vm2814_vm12, %v3101_v33, %v3100_v63  ;;  %v6407_v19 = vsel %vm2814_vm12, %v3291_v57, %v3290_v17  ;;  %v2907_v10 = vrot.slane %v6392_v22, 1  ;;  %v3000_v56 = vrot.slane %v6366_v20, 4 }
 0x489   :  { %v2900_v12 = vsel %vm2802_vm9, %v2899_v58, %v2898_v60  ;;  %v3002_v24 = vrot.slane %v6392_v22, 3  ;;  %v4614_v58 = vunpack.i.l.bf16 %v6363_v62  ;;  %v2801_v60 = vrot.slane %v6289_v61, 6 }
 0x48a   :  { %v2902_v57 = vsel %vm2805_vm8, %v2901_v49, %v2900_v12  ;;  %v2810_v49 = vrot.slane %v6366_v20, 3  ;;  %v3186_v12 = vrot.slane %v6285_v28, 5 }
 0x48c   :  { %v4774_v47 = vpop.eup %4773 }
 0x48d   :  { %v1921_v0 = vmul.f32 %v4774_v47, %v6262_v59  ;;  %v1857_v2 = vpop.xlane.xlu2 %1856  ;;  %v1863_v40 = vpop.xlane.xlu0 %1862  ;;  %v3486_v59 = vrot.slane %v6394_v16, 5 }
 0x48e   :  { %4775 = vrcp.f32 %v1857_v2 }
 0x48f   :  { %4777 = vrcp.f32 %v1863_v40  ;;  %4465 = vmatmul.msk.f32.vlgmr.msra.gmra.mxu3 %vm807_vm2, %v1921_v0  ;;  %v3487_v4 = vsel %vm2799_vm7, %v3486_v59, %v3485_v48  ;;  %v2998_v48 = vrot.slane %v6333_v54, 5 }
 0x490   :  { %2974 = vmatpush.msra.mxu3 %v2760_v42  ;;  %4779 = vrcp.f32 %v6327_v15  ;;  %v2995_v15 = vsel %vm2802_vm9, %v2994_v38, %v2993_v23  ;;  %v2798_v38 = vrot.slane %v6292_v53, 7 }
 0x491   :  { %v6421_v5 = vpop.f32.mrf.mxu2  ;;  %4781 = vrcp.f32 %v1854_v39  ;;  %v2997_v9 = vsel %vm2805_vm8, %v2996_v31, %v2995_v15  ;;  %v3187_v31 = vrot.slane %v6283_v35, 4 }
 0x492   :  { %v3109_v63 = vrot.slane %v6421_v5, 7  ;;  %v3490_v0 = vrot.slane %v6421_v5, 3  ;;  %v2999_v40 = vsel %vm2808_vm10, %v2998_v48, %v2997_v9  ;;  %v3198_v9 = vrot.slane %v6392_v22, 6 }
 0x493   :  { %v3001_v11 = vsel %vm2811_vm11, %v3000_v56, %v2999_v40  ;;  %v3188_v56 = vsel %vm2796_vm6, %v3187_v31, %v3186_v12  ;;  %v2822_v12 = vrot.slane %v6421_v5, 5 }
 0x494   :  { %v4776_v34 = vpop.eup %4775  ;;  %v3003_v29 = vsel %vm2814_vm12, %v3002_v24, %v3001_v11  ;;  %v3193_v24 = vrot.slane %v6311_v6, 1 }
 0x495   :  { %v4778_v17 = vpop.eup %4777  ;;  %v1925_v55 = vmul.f32 %v4776_v34, %v6272_v25  ;;  %v6429_v37 = vpop.f32.mrf.mxu1 }
 0x496   :  { %v1927_v14 = vmul.f32 %v4778_v17, %v6268_v43  ;;  %v3108_v25 = vsel %vm2802_vm9, %v6429_v37, %v3107_v44  ;;  %v2903_v43 = vrot.slane %v6333_v54, 3  ;;  %v3298_v50 = vrot.slane %v6429_v37, 1  ;;  %v4780_v44 = vpop.eup %4779 }
 0x497   :  { %4469 = vmatmul.msk.f32.vlgmr.msrb.gmra.mxu3 %vm807_vm2, %v1925_v55  ;;  %v6446_v21 = vsel %vm2805_vm8, %v3109_v63, %v3108_v25  ;;  %v3488_v26 = vrot.slane %v6429_v37, 4  ;;  %v4782_v18 = vpop.eup %4781  ;;  %v1922_v63 = vmul.f32 %v4780_v44, %v6178_v27  ;;  %v2762_v55 = vld [vmem:[#allocation5 + $0x8] sm:$0xff]  ;;  %v2804_v27 = vrot.slane %v6311_v6, 5 }
 0x498   :  { %4471 = vmatmul.msk.f32.vlgmr.msra.gmra.mxu1 %vm807_vm2, %v1927_v14  ;;  %3358 = vmatpush.msrb.mxu3 %v2760_v42  ;;  %v3299_v33 = vsel %vm2802_vm9, %v3298_v50, %v3297_v1  ;;  %v2904_v47 = vsel %vm2808_vm10, %v2903_v43, %v2902_v57  ;;  %v1860_v1 = vpop.xlane.xlu2 %1859  ;;  %v1924_v17 = vmul.f32 %v4782_v18, %v6218_v13  ;;  %v2807_v13 = vrot.slane %v6333_v54, 4 }
 0x499   :  { %v6460_v39 = vsel %vm2805_vm8, %v6421_v5, %v3299_v33  ;;  %v2906_v2 = vsel %vm2811_vm11, %v2905_v30, %v2904_v47  ;;  %v3489_v42 = vsel %vm2802_vm9, %v3488_v26, %v3487_v4  ;;  %4783 = vrcp.f32 %v1860_v1 }
 0x49a   :  { %v2908_v59 = vsel %vm2814_vm12, %v2907_v10, %v2906_v2  ;;  %v3491_v45 = vsel %vm2805_vm8, %v3490_v0, %v3489_v42  ;;  %v2797_v14 = vsel %vm2796_vm6, %v6283_v35, %v2795_v41  ;;  %v2813_v43 = vrot.slane %v6392_v22, 2 }
 0x49b   :  { %v2800_v62 = vsel %vm2799_vm7, %v2798_v38, %v2797_v14  ;;  %v3191_v33 = vrot.slane %v6289_v61, 2  ;;  %v3189_v57 = vrot.slane %v6292_v53, 3  ;;  %v3196_v26 = vrot.slane %v6366_v20, 7 }
 0x49c   :  { %v2803_v25 = vsel %vm2802_vm9, %v2801_v60, %v2800_v62  ;;  %v3005_v41 = vrot.slane %v6381_v51, 1  ;;  %v3205_v62 = vrot.slane %v6429_v37, 2 }
 0x49d   :  { %v2806_v50 = vsel %vm2805_vm8, %v2804_v27, %v2803_v25  ;;  %v2820_v27 = vrot.slane %v6429_v37, 6 }
 0x49e   :  { %v2809_v30 = vsel %vm2808_vm10, %v2807_v13, %v2806_v50  ;;  %v2913_v13 = vrot.slane %v6429_v37, 5 }
 0x49f   :  { %4476 = vmatmul.msk.f32.vlgmr.msra.gmra.mxu3 %vm807_vm2, %v2908_v59  ;;  %v4784_v23 = vpop.eup %4783  ;;  %v2812_v10 = vsel %vm2811_vm11, %v2810_v49, %v2809_v30 }
 0x4a0   :  { %4480 = vmatmul.msk.f32.vlgmr.msrb.gmra.mxu1 %vm807_vm2, %v3003_v29  ;;  %v4603_v34 = vpop.permute.xlu0 %4602  ;;  %v1926_v48 = vmul.f32 %v4784_v23, %v6279_v8  ;;  %v2815_v15 = vsel %vm2814_vm12, %v2813_v43, %v2812_v10  ;;  %v3190_v8 = vsel %vm2799_vm7, %v3189_v57, %v3188_v56  ;;  %v3008_v43 = vrot.slane %v6429_v37, 7 }
 0x4a1   :  { %v4605_v4 = vunpack.i.h.bf16 %v4603_v34  ;;  %v4604_v52 = vunpack.i.l.bf16 %v4603_v34  ;;  %v3192_v47 = vsel %vm2802_vm9, %v3191_v33, %v3190_v8  ;;  %v2909_v34 = vrot.slane %v6381_v51, 7 }
 0x4a2   :  { %v3194_v0 = vsel %vm2805_vm8, %v3193_v24, %v3192_v47 }
 0x4a3   :  { %2625 = vmatpush.msrb.mxu0 %v4604_v52  ;;  %2677 = vmatpush.msrb.mxu2 %v4605_v4  ;;  %v3195_v2 = vsel %vm2808_vm10, %v6333_v54, %v3194_v0  ;;  %v3201_v4 = vrot.slane %v6381_v51, 4  ;;  %v3373_v52 = vrot.slane %v6283_v35, 5  ;;  %v2910_v14 = vsel %vm2796_vm6, %v2909_v34, %v6379_v7 }
 0x4a4   :  { %4466 = vmatmul.msk.f32.vlgmr.msrb.gmra.mxu0 %vm807_vm2, %v1922_v63  ;;  %4468 = vmatmul.msk.f32.vlgmr.msrb.gmra.mxu2 %vm807_vm2, %v1924_v17  ;;  %v3197_v42 = vsel %vm2811_vm11, %v3196_v26, %v3195_v2  ;;  %v2818_v63 = vrot.slane %v6394_v16, 7  ;;  %v3004_v17 = vrot.slane %v6379_v7, 2 }
 0x4a5   :  { %2729 = vmatpush.msra.mxu0 %v4614_v58  ;;  %2881 = vmatpush.msra.mxu2 %v2762_v55  ;;  %v3199_v44 = vsel %vm2814_vm12, %v3198_v9, %v3197_v42  ;;  %v3372_v58 = vrot.slane %v6285_v28, 6  ;;  %v2915_v9 = vrot.slane %v6421_v5, 4  ;;  %v3207_v42 = vrot.slane %v6421_v5, 1 }
 0x4a6   :  { %v3006_v60 = vsel %vm2796_vm6, %v3005_v41, %v3004_v17 }
 0x4a7   :  { %3265 = vmatpush.msrb.mxu0 %v2762_v55  ;;  %4520 = vmatpush.msrb.mxu2 %v2762_v55  ;;  %v3200_v55 = vrot.slane %v6379_v7, 5  ;;  %v3374_v23 = vsel %vm2796_vm6, %v3373_v52, %v3372_v58  ;;  %v3007_v25 = vsel %vm2799_vm7, %v6394_v16, %v3006_v60 }
 0x4a8   :  { %v3009_v0 = vsel %vm2802_vm9, %v3008_v43, %v3007_v25 }
 0x4a9   :  { %v3202_v35 = vsel %vm2796_vm6, %v3201_v4, %v3200_v55 }
 0x4ac   :  { %4470 = vmatmul.msk.f32.vlgmr.msra.gmra.mxu0 %vm807_vm2, %v1926_v48  ;;  %4472 = vmatmul.msk.f32.vlgmr.msra.gmra.mxu2 %vm807_vm2, %v2815_v15 }
 0x4ad   :  { %3451 = vmatpush.msra.mxu0 %v6375_v46 }
 0x4b1   :  { %v6512_v40 = vpop.f32.mrf.mxu3 }
 0x4b2   :  { %v3111_v46 = vrot.slane %v6512_v40, 6  ;;  %v3301_v1 = vrot.slane %v6512_v40, 7  ;;  %v3492_v59 = vrot.slane %v6512_v40, 2  ;;  %v2824_v56 = vrot.slane %v6512_v40, 4 }
 0x4b3   :  { %v2917_v24 = vrot.slane %v6512_v40, 3  ;;  %v3012_v2 = vrot.slane %v6512_v40, 5 }
 0x4b4   :  { %4488 = vmatmul.msk.f32.vlgmr.msrb.gmra.mxu0 %vm807_vm2, %v3199_v44  ;;  %v3112_v11 = vsel %vm2808_vm10, %v3111_v46, %v6446_v21  ;;  %v3302_v18 = vsel %vm2808_vm10, %v3301_v1, %v6460_v39  ;;  %v3493_v29 = vsel %vm2808_vm10, %v3492_v59, %v3491_v45  ;;  %v2816_v21 = vrot.slane %v6379_v7, 1 }
 0x4b5   :  { %v2911_v39 = vrot.slane %v6394_v16, 6  ;;  %v3203_v45 = vrot.slane %v6394_v16, 3  ;;  %v3010_v1 = vrot.slane %v6421_v5, 6 }
 0x4b6   :  { %v2817_v38 = vsel %vm2796_vm6, %v6381_v51, %v2816_v21 }
 0x4b7   :  { %v2819_v28 = vsel %vm2799_vm7, %v2818_v63, %v2817_v38  ;;  %v2912_v31 = vsel %vm2799_vm7, %v2911_v39, %v2910_v14  ;;  %v3204_v50 = vsel %vm2799_vm7, %v3203_v45, %v3202_v35  ;;  %v3011_v63 = vsel %vm2805_vm8, %v3010_v1, %v3009_v0 }
 0x4b8   :  { %v2821_v15 = vsel %vm2802_vm9, %v2820_v27, %v2819_v28  ;;  %v2914_v33 = vsel %vm2802_vm9, %v2913_v13, %v2912_v31  ;;  %v3206_v57 = vsel %vm2802_vm9, %v3205_v62, %v3204_v50  ;;  %v3013_v39 = vsel %vm2808_vm10, %v3012_v2, %v3011_v63 }
 0x4b9   :  { %v3377_v31 = vrot.slane %v6289_v61, 3  ;;  %v3375_v50 = vrot.slane %v6292_v53, 4  ;;  %v3387_v61 = vrot.slane %v6381_v51, 5 }
 0x4bb   :  { %v6545_v49 = vpop.f32.mrf.mxu0 }
 0x4bc   :  { %v3113_v30 = vrot.slane %v6545_v49, 5  ;;  %v3303_v48 = vrot.slane %v6545_v49, 6  ;;  %v3494_v10 = vrot.slane %v6545_v49, 1  ;;  %v2826_v44 = vrot.slane %v6545_v49, 3 }
 0x4bd   :  { %v2919_v46 = vrot.slane %v6545_v49, 2  ;;  %v3014_v59 = vrot.slane %v6545_v49, 4  ;;  %v3210_v34 = vrot.slane %v6545_v49, 7 }
 0x4be   :  { %v3114_v8 = vsel %vm2811_vm11, %v3113_v30, %v3112_v11  ;;  %v3304_v26 = vsel %vm2811_vm11, %v3303_v48, %v3302_v18  ;;  %v3495_v47 = vsel %vm2811_vm11, %v3494_v10, %v3493_v29  ;;  %v2823_v11 = vsel %vm2805_vm8, %v2822_v12, %v2821_v15 }
 0x4bf   :  { %v2916_v18 = vsel %vm2805_vm8, %v2915_v9, %v2914_v33  ;;  %v3208_v29 = vsel %vm2805_vm8, %v3207_v42, %v3206_v57  ;;  %v2825_v4 = vsel %vm2808_vm10, %v2824_v56, %v2823_v11  ;;  %v3015_v60 = vsel %vm2811_vm11, %v3014_v59, %v3013_v39 }
 0x4c0   :  { %v2918_v52 = vsel %vm2808_vm10, %v2917_v24, %v2916_v18  ;;  %v3209_v17 = vsel %vm2808_vm10, %v6512_v40, %v3208_v29  ;;  %v2827_v58 = vsel %vm2811_vm11, %v2826_v44, %v2825_v4  ;;  %v3379_v12 = vrot.slane %v6311_v6, 2 }
 0x4c1   :  { %v2920_v14 = vsel %vm2811_vm11, %v2919_v46, %v2918_v52  ;;  %v3211_v62 = vsel %vm2811_vm11, %v3210_v34, %v3209_v17  ;;  %v3381_v48 = vrot.slane %v6333_v54, 1  ;;  %v3376_v10 = vsel %vm2799_vm7, %v3375_v50, %v3374_v23 }
 0x4c2   :  { %v3378_v53 = vsel %vm2802_vm9, %v3377_v31, %v3376_v10  ;;  %v3384_v56 = vrot.slane %v6392_v22, 7  ;;  %v3386_v33 = vrot.slane %v6379_v7, 6  ;;  %v3389_v54 = vrot.slane %v6394_v16, 4 }
 0x4c3   :  { %v3380_v57 = vsel %vm2805_vm8, %v3379_v12, %v3378_v53  ;;  %v3391_v24 = vrot.slane %v6429_v37, 3  ;;  %v3395_v37 = vrot.slane %v6512_v40, 1  ;;  %v6641_v2 = vpop.f32.mrf.mxu0  ;;  %v3088_v53 = vld [vmem:[#allocation5 + $0x18] sm:$0xff] }
 0x4c4   :  { %v6578_v41 = vpop.f32.mrf.mxu1  ;;  %v3382_v51 = vsel %vm2808_vm10, %v3381_v48, %v3380_v57  ;;  %v3388_v23 = vsel %vm2796_vm6, %v3387_v61, %v3386_v33  ;;  %v3120_v11 = vrot.slane %v6641_v2, 1  ;;  %v3310_v63 = vrot.slane %v6641_v2, 2  ;;  %3168 = vmatpush.msra.mxu1 %v3088_v53 }
 0x4c5   :  { %v2828_v55 = vrot.slane %v6578_v41, 2  ;;  %v2921_v21 = vrot.slane %v6578_v41, 1  ;;  %v3016_v45 = vrot.slane %v6578_v41, 3  ;;  %v3212_v35 = vrot.slane %v6578_v41, 6 }
 0x4c6   :  { %v3115_v25 = vrot.slane %v6578_v41, 4  ;;  %v3305_v43 = vrot.slane %v6578_v41, 5  ;;  %v6609_v30 = vsel %vm2814_vm12, %v6578_v41, %v3495_v47  ;;  %v3383_v22 = vsel %vm2811_vm11, %v6366_v20, %v3382_v51  ;;  %3548 = vmatpush.msrb.mxu1 %v3088_v53 }
 0x4c7   :  { %v2829_v38 = vsel %vm2814_vm12, %v2828_v55, %v2827_v58  ;;  %v2922_v27 = vsel %vm2814_vm12, %v2921_v21, %v2920_v14  ;;  %v3017_v13 = vsel %vm2814_vm12, %v3016_v45, %v3015_v60  ;;  %v3213_v28 = vsel %vm2814_vm12, %v3212_v35, %v3211_v62 }
 0x4c8   :  { %4473 = vmatmul.msk.f32.gmra.mxu2 %vm807_vm2, %v2829_v38  ;;  %4477 = vmatmul.msk.f32.gmra.mxu3 %vm807_vm2, %v2922_v27  ;;  %v6615_v15 = vsel %vm2814_vm12, %v3115_v25, %v3114_v8  ;;  %v6621_v6 = vsel %vm2814_vm12, %v3305_v43, %v3304_v26  ;;  %v3385_v7 = vsel %vm2814_vm12, %v3384_v56, %v3383_v22  ;;  %v3393_v20 = vrot.slane %v6421_v5, 2 }
 0x4c9   :  { %4481 = vmatmul.msk.f32.gmra.mxu1 %vm807_vm2, %v3017_v13  ;;  %4489 = vmatmul.msk.f32.gmra.mxu0 %vm807_vm2, %v3213_v28  ;;  %v6628_v8 = vpop.f32.mrf.mxu2  ;;  %v3390_v47 = vsel %vm2799_vm7, %v3389_v54, %v3388_v23  ;;  %v3398_v42 = vrot.slane %v6578_v41, 7  ;;  %v3500_v21 = vrot.slane %v6641_v2, 5  ;;  %v2832_v43 = vrot.slane %v6641_v2, 7 }
 0x4ca   :  { %v3117_v16 = vrot.slane %v6628_v8, 3  ;;  %v3392_v0 = vsel %vm2802_vm9, %v3391_v24, %v3390_v47  ;;  %v3307_v18 = vrot.slane %v6628_v8, 4  ;;  %v3497_v17 = vrot.slane %v6628_v8, 7 }
 0x4cb   :  { %v3394_v1 = vsel %vm2805_vm8, %v3393_v20, %v3392_v0  ;;  %v2830_v13 = vrot.slane %v6628_v8, 1  ;;  %v3018_v62 = vrot.slane %v6628_v8, 2  ;;  %v3400_v28 = vrot.slane %v6628_v8, 6  ;;  %v6684_v31 = vpop.f32.mrf.mxu0 }
 0x4cc   :  { %v3396_v59 = vsel %vm2808_vm10, %v3395_v37, %v3394_v1  ;;  %v6651_v29 = vpop.f32.mrf.mxu1  ;;  %v2925_v61 = vrot.slane %v6641_v2, 6  ;;  %v3403_v10 = vrot.slane %v6641_v2, 4  ;;  %v2840_v54 = vrot.slane %v6684_v31, 3 }
 0x4cd   :  { %v3397_v40 = vsel %vm2811_vm11, %v6545_v49, %v3396_v59  ;;  %v3312_v49 = vrot.slane %v6651_v29, 1  ;;  %v3502_v14 = vrot.slane %v6651_v29, 4  ;;  %v2834_v57 = vrot.slane %v6651_v29, 6 }
 0x4ce   :  { %v3399_v34 = vsel %vm2814_vm12, %v3398_v42, %v3397_v40  ;;  %v2927_v23 = vrot.slane %v6651_v29, 5  ;;  %v3022_v47 = vrot.slane %v6651_v29, 7 }
 0x4d1   :  { %4496 = vmatmul.msk.f32.vlgmr.msra.gmra.mxu0 %vm807_vm2, %v3385_v7  ;;  %v6634_v26 = vpop.f32.mrf.mxu3  ;;  %v2933_v7 = vrot.slane %v6684_v31, 2 }
 0x4d2   :  { %v3118_v9 = vrot.slane %v6634_v26, 2  ;;  %v3308_v46 = vrot.slane %v6634_v26, 3  ;;  %v3498_v5 = vrot.slane %v6634_v26, 6  ;;  %v3019_v35 = vrot.slane %v6634_v26, 1 }
 0x4d3   :  { %v3401_v38 = vrot.slane %v6634_v26, 5  ;;  %v2923_v27 = vrot.slane %v6634_v26, 7  ;;  %v2831_v25 = vsel %vm2796_vm6, %v6634_v26, %v2830_v13 }
 0x4d4   :  { %v3119_v44 = vsel %vm2796_vm6, %v3118_v9, %v3117_v16  ;;  %v3309_v52 = vsel %vm2796_vm6, %v3308_v46, %v3307_v18  ;;  %v3499_v45 = vsel %vm2796_vm6, %v3498_v5, %v3497_v17  ;;  %v3020_v12 = vsel %vm2796_vm6, %v3019_v35, %v3018_v62  ;;  %v6695_v56 = vpop.f32.mrf.mxu1 }
 0x4d5   :  { %v3121_v41 = vsel %vm2799_vm7, %v3120_v11, %v3119_v44  ;;  %v3311_v55 = vsel %vm2799_vm7, %v3310_v63, %v3309_v52  ;;  %v3501_v58 = vsel %vm2799_vm7, %v3500_v21, %v3499_v45  ;;  %v2924_v50 = vsel %vm2796_vm6, %v2923_v27, %v6628_v8 }
 0x4d6   :  { %v6661_v4 = vsel %vm2802_vm9, %v6651_v29, %v3121_v41  ;;  %v6670_v39 = vsel %vm2802_vm9, %v3312_v49, %v3311_v55  ;;  %v6676_v60 = vsel %vm2802_vm9, %v3502_v14, %v3501_v58  ;;  %v3402_v48 = vsel %vm2796_vm6, %v3401_v38, %v3400_v28 }
 0x4d7   :  { %v2833_v33 = vsel %vm2799_vm7, %v2832_v43, %v2831_v25  ;;  %v2926_v51 = vsel %vm2799_vm7, %v2925_v61, %v2924_v50  ;;  %v3021_v24 = vsel %vm2799_vm7, %v6641_v2, %v3020_v12  ;;  %v3404_v22 = vsel %vm2799_vm7, %v3403_v10, %v3402_v48 }
 0x4d8   :  { %v3028_v16 = vrot.slane %v6684_v31, 4  ;;  %v3405_v9 = vrot.slane %v6651_v29, 3  ;;  %v2835_v37 = vsel %vm2802_vm9, %v2834_v57, %v2833_v33  ;;  %v2842_v20 = vrot.slane %v6695_v56, 2 }
 0x4d9   :  { %4497 = vmatmul.msk.f32.gmra.mxu0 %vm807_vm2, %v3399_v34  ;;  %v6709_v0 = vpop.f32.mrf.mxu3  ;;  %v2935_v42 = vrot.slane %v6695_v56, 1  ;;  %v3030_v44 = vrot.slane %v6695_v56, 3  ;;  %v2928_v1 = vsel %vm2802_vm9, %v2927_v23, %v2926_v51  ;;  %v3023_v59 = vsel %vm2802_vm9, %v3022_v47, %v3021_v24 }
 0x4da   :  { %v3406_v11 = vsel %vm2802_vm9, %v3405_v9, %v3404_v22  ;;  %v3412_v18 = vrot.slane %v6695_v56, 7  ;;  %v2838_v52 = vrot.slane %v6709_v0, 4  ;;  %v2931_v63 = vrot.slane %v6709_v0, 3 }
 0x4db   :  { %v3026_v17 = vrot.slane %v6709_v0, 5  ;;  %v3409_v49 = vrot.slane %v6709_v0, 1  ;;  %v3506_v10 = vrot.slane %v6709_v0, 2  ;;  %v3508_v33 = vrot.slane %v6684_v31, 1 }
 0x4dc   :  { %v3215_v22 = vrot.slane %v6634_v26, 4 }
 0x501   :  { %v6715_v46 = vpop.f32.mrf.mxu2 }
 0x502   :  { %v2836_v40 = vrot.slane %v6715_v46, 5  ;;  %v2929_v5 = vrot.slane %v6715_v46, 4  ;;  %v3024_v34 = vrot.slane %v6715_v46, 6  ;;  %v3407_v41 = vrot.slane %v6715_v46, 2 }
 0x503   :  { %v3504_v61 = vrot.slane %v6715_v46, 3  ;;  %v3221_v26 = vrot.slane %v6715_v46, 1 }
 0x504   :  { %v2837_v55 = vsel %vm2805_vm8, %v2836_v40, %v2835_v37  ;;  %v2930_v21 = vsel %vm2805_vm8, %v2929_v5, %v2928_v1  ;;  %v3025_v45 = vsel %vm2805_vm8, %v3024_v34, %v3023_v59  ;;  %v3408_v58 = vsel %vm2805_vm8, %v3407_v41, %v3406_v11 }
 0x505   :  { %v2839_v14 = vsel %vm2808_vm10, %v2838_v52, %v2837_v55  ;;  %v2932_v35 = vsel %vm2808_vm10, %v2931_v63, %v2930_v21  ;;  %v3027_v38 = vsel %vm2808_vm10, %v3026_v17, %v3025_v45  ;;  %v3410_v27 = vsel %vm2808_vm10, %v3409_v49, %v3408_v58 }
 0x506   :  { %v2841_v13 = vsel %vm2811_vm11, %v2840_v54, %v2839_v14  ;;  %v2934_v62 = vsel %vm2811_vm11, %v2933_v7, %v2932_v35  ;;  %v3029_v28 = vsel %vm2811_vm11, %v3028_v16, %v3027_v38  ;;  %v3411_v25 = vsel %vm2811_vm11, %v6684_v31, %v3410_v27  ;;  %v6769_v16 = vpop.f32.mrf.mxu1 }
 0x507   :  { %v2843_v43 = vsel %vm2814_vm12, %v2842_v20, %v2841_v13  ;;  %v2936_v50 = vsel %vm2814_vm12, %v2935_v42, %v2934_v62  ;;  %v3031_v12 = vsel %vm2814_vm12, %v3030_v44, %v3029_v28  ;;  %v3413_v48 = vsel %vm2814_vm12, %v3412_v18, %v3411_v25 }
 0x508   :  { %4474 = vmatmul.msk.f32.gmra.mxu2 %vm807_vm2, %v2843_v43  ;;  %4478 = vmatmul.msk.f32.gmra.mxu3 %vm807_vm2, %v2936_v50  ;;  %v3505_v53 = vsel %vm2805_vm8, %v3504_v61, %v6676_v60  ;;  %v3214_v60 = vrot.slane %v6628_v8, 5  ;;  %v3217_v20 = vrot.slane %v6641_v2, 3  ;;  %v3219_v44 = vrot.slane %v6651_v29, 2 }
 0x509   :  { %4482 = vmatmul.msk.f32.gmra.mxu1 %vm807_vm2, %v3031_v12  ;;  %4498 = vmatmul.msk.f32.gmra.mxu0 %vm807_vm2, %v3413_v48  ;;  %v3507_v57 = vsel %vm2808_vm10, %v3506_v10, %v3505_v53  ;;  %v6763_v24 = vpop.f32.mrf.mxu2  ;;  %v2848_v59 = vrot.slane %v6769_v16, 6  ;;  %v2941_v18 = vrot.slane %v6769_v16, 5  ;;  %v3036_v2 = vrot.slane %v6769_v16, 7 }
 0x50a   :  { %v3509_v54 = vsel %vm2811_vm11, %v3508_v33, %v3507_v57  ;;  %v3511_v47 = vrot.slane %v6763_v24, 7  ;;  %v3216_v9 = vsel %vm2796_vm6, %v3215_v22, %v3214_v60  ;;  %v3032_v40 = vrot.slane %v6763_v24, 2 }
 0x50b   :  { %v6759_v51 = vsel %vm2814_vm12, %v6695_v56, %v3509_v54  ;;  %v3218_v42 = vsel %vm2799_vm7, %v3217_v20, %v3216_v9  ;;  %v3419_v29 = vrot.slane %v6769_v16, 3  ;;  %v3228_v41 = vrot.slane %v6763_v24, 5 }
 0x50c   :  { %v3220_v1 = vsel %vm2802_vm9, %v3219_v44, %v3218_v42  ;;  %v3414_v52 = vrot.slane %v6763_v24, 6  ;;  %v2844_v49 = vrot.slane %v6763_v24, 1 }
 0x50d   :  { %v6788_v34 = vsel %vm2805_vm8, %v3221_v26, %v3220_v1 }
 0x512   :  { %v6761_v23 = vpop.f32.mrf.mxu3 }
 0x513   :  { %v3512_v7 = vrot.slane %v6761_v23, 6  ;;  %v3033_v8 = vrot.slane %v6761_v23, 1  ;;  %v2937_v11 = vrot.slane %v6761_v23, 7  ;;  %v3415_v63 = vrot.slane %v6761_v23, 5 }
 0x514   :  { %v3229_v55 = vrot.slane %v6761_v23, 4  ;;  %v2845_v35 = vsel %vm2796_vm6, %v6761_v23, %v2844_v49 }
 0x515   :  { %v3513_v37 = vsel %vm2796_vm6, %v3512_v7, %v3511_v47  ;;  %v6783_v5 = vpop.f32.mrf.mxu1  ;;  %v2938_v27 = vsel %vm2796_vm6, %v2937_v11, %v6763_v24  ;;  %v3034_v13 = vsel %vm2796_vm6, %v3033_v8, %v3032_v40  ;;  %v3416_v48 = vsel %vm2796_vm6, %v3415_v63, %v3414_v52 }
 0x516   :  { %v2856_v38 = vrot.slane %v6783_v5, 2  ;;  %v2949_v62 = vrot.slane %v6783_v5, 1  ;;  %v3044_v25 = vrot.slane %v6783_v5, 3  ;;  %v3426_v61 = vrot.slane %v6783_v5, 7 }
 0x51a   :  { %v6797_v21 = vpop.f32.mrf.mxu3 }
 0x51b   :  { %v2852_v50 = vrot.slane %v6797_v21, 4  ;;  %v2945_v12 = vrot.slane %v6797_v21, 3  ;;  %v3040_v7 = vrot.slane %v6797_v21, 5  ;;  %v3423_v60 = vrot.slane %v6797_v21, 1 }
 0x521   :  { %v6793_v17 = vpop.f32.mrf.mxu0 }
 0x522   :  { %v2846_v45 = vrot.slane %v6793_v17, 7  ;;  %v2939_v58 = vrot.slane %v6793_v17, 6  ;;  %v3417_v14 = vrot.slane %v6793_v17, 4  ;;  %v3035_v28 = vsel %vm2799_vm7, %v6793_v17, %v3034_v13 }
 0x523   :  { %v3514_v43 = vrot.slane %v6793_v17, 5  ;;  %v3037_v22 = vsel %vm2802_vm9, %v3036_v2, %v3035_v28  ;;  %v3231_v47 = vrot.slane %v6793_v17, 3 }
 0x524   :  { %v2847_v10 = vsel %vm2799_vm7, %v2846_v45, %v2845_v35  ;;  %v2940_v53 = vsel %vm2799_vm7, %v2939_v58, %v2938_v27  ;;  %v3418_v33 = vsel %vm2799_vm7, %v3417_v14, %v3416_v48  ;;  %v3224_v48 = vrot.slane %v6684_v31, 7 }
 0x525   :  { %v3515_v57 = vsel %vm2799_vm7, %v3514_v43, %v3513_v37  ;;  %v2849_v37 = vsel %vm2802_vm9, %v2848_v59, %v2847_v10  ;;  %v2942_v1 = vsel %vm2802_vm9, %v2941_v18, %v2940_v53  ;;  %v3420_v8 = vsel %vm2802_vm9, %v3419_v29, %v3418_v33 }
 0x526   :  { %v3516_v10 = vrot.slane %v6769_v16, 4  ;;  %v3223_v33 = vsel %vm2808_vm10, %v6709_v0, %v6788_v34  ;;  %v3233_v34 = vrot.slane %v6769_v16, 2 }
 0x527   :  { %v6821_v54 = vpop.f32.mrf.mxu2 }
 0x528   :  { %v2850_v9 = vrot.slane %v6821_v54, 5  ;;  %v2943_v20 = vrot.slane %v6821_v54, 4  ;;  %v3038_v42 = vrot.slane %v6821_v54, 6  ;;  %v3421_v44 = vrot.slane %v6821_v54, 2 }
 0x529   :  { %v6831_v26 = vpop.f32.mrf.mxu0  ;;  %v3518_v11 = vrot.slane %v6821_v54, 3 }
 0x52a   :  { %v2851_v40 = vsel %vm2805_vm8, %v2850_v9, %v2849_v37  ;;  %v2854_v2 = vrot.slane %v6831_v26, 3  ;;  %v2944_v52 = vsel %vm2805_vm8, %v2943_v20, %v2942_v1  ;;  %v2947_v63 = vrot.slane %v6831_v26, 2  ;;  %v3071_v20 = vpop.f32.mrf.mxu1 }
 0x52b   :  { %v2853_v49 = vsel %vm2808_vm10, %v2852_v50, %v2851_v40  ;;  %v2946_v45 = vsel %vm2808_vm10, %v2945_v12, %v2944_v52  ;;  %v3039_v59 = vsel %vm2805_vm8, %v3038_v42, %v3037_v22  ;;  %v3042_v18 = vrot.slane %v6831_v26, 4 }
 0x52c   :  { %v2855_v29 = vsel %vm2811_vm11, %v2854_v2, %v2853_v49  ;;  %v2948_v58 = vsel %vm2811_vm11, %v2947_v63, %v2946_v45  ;;  %v3041_v14 = vsel %vm2808_vm10, %v3040_v7, %v3039_v59  ;;  %v3422_v35 = vsel %vm2805_vm8, %v3421_v44, %v3420_v8 }
 0x52d   :  { %v2857_v27 = vsel %vm2814_vm12, %v2856_v38, %v2855_v29  ;;  %v2950_v13 = vsel %vm2814_vm12, %v2949_v62, %v2948_v58  ;;  %v3043_v28 = vsel %vm2811_vm11, %v3042_v18, %v3041_v14  ;;  %v3424_v43 = vsel %vm2808_vm10, %v3423_v60, %v3422_v35  ;;  %v2976_v38 = vpop.f32.mrf.mxu3 }
 0x52e   :  { %4475 = vmatmul.msk.f32.gmra.mxu2 %vm807_vm2, %v2857_v27  ;;  %4479 = vmatmul.msk.f32.gmra.mxu3 %vm807_vm2, %v2950_v13  ;;  %v3045_v50 = vsel %vm2814_vm12, %v3044_v25, %v3043_v28  ;;  %v3425_v12 = vsel %vm2811_vm11, %v6831_v26, %v3424_v43  ;;  %v3230_v25 = vsel %vm2796_vm6, %v3229_v55, %v3228_v41  ;;  %v3520_v22 = vrot.slane %v6797_v21, 2 }
 0x52f   :  { %4483 = vmatmul.msk.f32.gmra.mxu1 %vm807_vm2, %v3045_v50  ;;  %v3427_v62 = vsel %vm2814_vm12, %v3426_v61, %v3425_v12  ;;  %v2883_v53 = vpop.f32.mrf.mxu2  ;;  %v3232_v60 = vsel %vm2799_vm7, %v3231_v47, %v3230_v25  ;;  %v3235_v61 = vrot.slane %v6821_v54, 1  ;;  %v3517_v9 = vsel %vm2802_vm9, %v3516_v10, %v3515_v57 }
 0x530   :  { %4499 = vmatmul.msk.f32.gmra.mxu0 %vm807_vm2, %v3427_v62  ;;  %v2977_v7 = vadd.f32 %v2976_v38, %v2883_v53  ;;  %v3519_v42 = vsel %vm2805_vm8, %v3518_v11, %v3517_v9  ;;  %v3225_v44 = vsel %vm2811_vm11, %v3224_v48, %v3223_v33  ;;  %v3522_v55 = vrot.slane %v6831_v26, 1 }
 0x531   :  { %v3521_v41 = vsel %vm2808_vm10, %v3520_v22, %v3519_v42  ;;  %v3226_v1 = vrot.slane %v6695_v56, 6  ;;  %v3234_v47 = vsel %vm2802_vm9, %v3233_v34, %v3232_v60  ;;  %v3238_v2 = vrot.slane %v6831_v26, 7 }
 0x532   :  { %v6880_v37 = vadd.f32 %v3071_v20, %v2977_v7  ;;  %v3236_v8 = vsel %vm2805_vm8, %v3235_v61, %v3234_v47  ;;  %v3523_v57 = vsel %vm2811_vm11, %v3522_v55, %v3521_v41  ;;  %v3123_v63 = vrot.slane %v6715_v46, 7 }
 0x533   :  { %v3227_v40 = vsel %vm2814_vm12, %v3226_v1, %v3225_v44  ;;  %v3524_v11 = vsel %vm2814_vm12, %v6783_v5, %v3523_v57  ;;  %v3237_v52 = vsel %vm2808_vm10, %v6797_v21, %v3236_v8  ;;  %v3240_v45 = vrot.slane %v6783_v5, 6 }
 0x534   :  { %v3239_v49 = vsel %vm2811_vm11, %v3238_v2, %v3237_v52  ;;  %v3132_v59 = vrot.slane %v6761_v23, 2  ;;  %v3315_v18 = vrot.slane %v6709_v0, 7  ;;  %v3322_v29 = vrot.slane %v6761_v23, 3 }
 0x535   :  { %v3124_v58 = vsel %vm2805_vm8, %v3123_v63, %v6661_v4  ;;  %v3134_v14 = vrot.slane %v6793_v17, 1  ;;  %v3131_v35 = vrot.slane %v6763_v24, 3  ;;  %v3321_v23 = vrot.slane %v6763_v24, 4 }
 0x536   :  { %4490 = vmatmul.msk.f32.vlgmr.msrb.gmra.mxu2 %vm807_vm2, %v3227_v40  ;;  %4492 = vmatmul.msk.f32.vlgmr.msrb.gmra.mxu3 %vm807_vm2, %v6407_v19  ;;  %v3314_v19 = vsel %vm2805_vm8, %v6715_v46, %v6670_v39  ;;  %v3125_v39 = vrot.slane %v6709_v0, 6  ;;  %v3324_v46 = vrot.slane %v6793_v17, 2  ;;  %v3317_v13 = vrot.slane %v6684_v31, 6  ;;  %v3267_v40 = vpop.f32.mrf.mxu0 }
 0x537   :  { %4484 = vmatmul.msk.f32.vlgmr.msra.gmra.mxu1 %vm807_vm2, %v6404_v3  ;;  %v3241_v3 = vsel %vm2814_vm12, %v3240_v45, %v3239_v49  ;;  %v3316_v4 = vsel %vm2808_vm10, %v3315_v18, %v3314_v19  ;;  %v3133_v28 = vsel %vm2796_vm6, %v3132_v59, %v3131_v35  ;;  %v3127_v43 = vrot.slane %v6684_v31, 5 }
 0x538   :  { %v3126_v27 = vsel %vm2808_vm10, %v3125_v39, %v3124_v58  ;;  %v3137_v0 = vrot.slane %v6821_v54, 7  ;;  %v3323_v17 = vsel %vm2796_vm6, %v3322_v29, %v3321_v23  ;;  %v3318_v24 = vsel %vm2811_vm11, %v3317_v13, %v3316_v4 }
 0x539   :  { %v3128_v50 = vsel %vm2811_vm11, %v3127_v43, %v3126_v27  ;;  %v3319_v12 = vrot.slane %v6695_v56, 5  ;;  %v3326_v48 = vrot.slane %v6769_v16, 1  ;;  %v3129_v10 = vrot.slane %v6695_v56, 4 }
 0x53a   :  { %v3139_v25 = vrot.slane %v6797_v21, 6  ;;  %v3331_v56 = vrot.slane %v6831_v26, 6  ;;  %v3329_v7 = vrot.slane %v6797_v21, 7  ;;  %v3333_v34 = vrot.slane %v6783_v5, 5 }
 0x53b   :  { %v3320_v38 = vsel %vm2814_vm12, %v3319_v12, %v3318_v24  ;;  %v3130_v33 = vsel %vm2814_vm12, %v3129_v10, %v3128_v50 }
 0x53e   :  { %4491 = vmatmul.msk.f32.gmra.mxu2 %vm807_vm2, %v3241_v3  ;;  %4493 = vmatmul.msk.f32.gmra.mxu3 %vm807_vm2, %v6621_v6  ;;  %v3135_v6 = vsel %vm2799_vm7, %v3134_v14, %v3133_v28 }
 0x53f   :  { %4485 = vmatmul.msk.f32.gmra.mxu1 %vm807_vm2, %v6615_v15  ;;  %v3325_v15 = vsel %vm2799_vm7, %v3324_v46, %v3323_v17  ;;  %v3136_v31 = vsel %vm2802_vm9, %v6769_v16, %v3135_v6  ;;  %v3141_v16 = vrot.slane %v6831_v26, 5 }
 0x540   :  { %v3138_v62 = vsel %vm2805_vm8, %v3137_v0, %v3136_v31  ;;  %v3327_v53 = vsel %vm2802_vm9, %v3326_v48, %v3325_v15 }
 0x541   :  { %v3328_v22 = vsel %vm2805_vm8, %v6821_v54, %v3327_v53  ;;  %v3140_v60 = vsel %vm2808_vm10, %v3139_v25, %v3138_v62  ;;  %v3143_v54 = vrot.slane %v6783_v5, 4 }
 0x542   :  { %v3330_v61 = vsel %vm2808_vm10, %v3329_v7, %v3328_v22  ;;  %v3142_v20 = vsel %vm2811_vm11, %v3141_v16, %v3140_v60  ;;  %v3566_v22 = vld [vmem:[#allocation7] sm:$0xff]  ;;  %v3568_v16 = vld [vmem:[#allocation7 + $0x10] sm:$0xff]  ;;  %v3569_v7 = vld [vmem:[#allocation7 + $0x18] sm:$0xff] }
 0x543   :  { %v3332_v9 = vsel %vm2811_vm11, %v3331_v56, %v3330_v61  ;;  %v3144_v44 = vsel %vm2814_vm12, %v3143_v54, %v3142_v20  ;;  %v3567_v56 = vld [vmem:[#allocation7 + $0x8] sm:$0xff]  ;;  %v3570_v60 = vld [vmem:[#allocation7 + $0x20] sm:$0xff]  ;;  %v3573_v20 = vld [vmem:[#allocation7 + $0x38] sm:$0xff] }
 0x544   :  { %v3334_v42 = vsel %vm2814_vm12, %v3333_v34, %v3332_v9  ;;  %v3571_v61 = vld [vmem:[#allocation7 + $0x28] sm:$0xff]  ;;  %v3572_v9 = vld [vmem:[#allocation7 + $0x30] sm:$0xff]  ;;  %v3640_v34 = vld [vmem:[%s7455_s0] sm:$0xff] }
 0x545   :  { %v4618_v54 = vld [vmem:[%s7462_s7] ss:$0 sm:$0xff] }
 0x546   :  { %4494 = vmatmul.msk.f32.gmra.mxu3 %vm807_vm2, %v3320_v38  ;;  %v3074_v5 = vpop.f32.mrf.mxu1  ;;  %v3270_v52 = vpop.f32.mrf.mxu0 }
 0x547   :  { %4486 = vmatmul.msk.f32.gmra.mxu1 %vm807_vm2, %v3130_v33 }
 0x54b   :  { %v2979_v26 = vpop.f32.mrf.mxu3 }
 0x54e   :  { %4495 = vmatmul.msk.f32.gmra.mxu3 %vm807_vm2, %v3334_v42 }
 0x54f   :  { %4487 = vmatmul.msk.f32.gmra.mxu1 %vm807_vm2, %v3144_v44 }
 0x557   :  { %4500 = vmatmul.msk.f32.vlgmr.msrb.gmra.mxu1 %vm807_vm2, %v6413_v32  ;;  %v2886_v32 = vpop.f32.mrf.mxu2 }
 0x558   :  { %v2980_v48 = vadd.f32 %v2979_v26, %v2886_v32  ;;  %v3641_v26 = vld [vmem:[%s7455_s0 + $0x8] sm:$0xff] }
 0x55a   :  { %v3084_v53 = vadd.f32 %v3074_v5, %v2980_v48 }
 0x55f   :  { %4501 = vmatmul.msk.f32.gmra.mxu1 %vm807_vm2, %v6609_v30 }
 0x567   :  { %4502 = vmatmul.msk.f32.gmra.mxu1 %vm807_vm2, %v6759_v51  ;;  %v3453_v51 = vpop.f32.mrf.mxu0 }
 0x56f   :  { %4503 = vmatmul.msk.f32.gmra.mxu1 %vm807_vm2, %v3524_v11  ;;  %v3456_v19 = vpop.f32.mrf.mxu0 }
 0x586   :  { %v3077_v21 = vpop.f32.mrf.mxu1  ;;  %v3459_v58 = vpop.f32.mrf.mxu0 }
 0x58b   :  { %v2982_v55 = vpop.f32.mrf.mxu3  ;;  %v2889_v63 = vpop.f32.mrf.mxu2 }
 0x58c   :  { %v2983_v15 = vadd.f32 %v2982_v55, %v2889_v63 }
 0x58e   :  { %v3085_v38 = vadd.f32 %v3077_v21, %v2983_v15 }
 0x5ac   :  { %v3080_v41 = vpop.f32.mrf.mxu1 }
 0x5ad   :  { %v3462_v23 = vpop.f32.mrf.mxu0 }
 0x5b1   :  { %v2985_v8 = vpop.f32.mrf.mxu3  ;;  %v2892_v11 = vpop.f32.mrf.mxu2 }
 0x5b2   :  { %v2986_v0 = vadd.f32 %v2985_v8, %v2892_v11  ;;  %v3642_v8 = vld [vmem:[%s7455_s0 + $0x10] sm:$0xff] }
 0x5b4   :  { %v3170_v1 = vpop.f32.mrf.mxu1  ;;  %v3086_v10 = vadd.f32 %v3080_v41, %v2986_v0 }
 0x5b5   :  { %v3182_v47 = vadd.f32 %v3170_v1, %v6880_v37 }
 0x5b9   :  { %v3360_v30 = vpop.f32.mrf.mxu3  ;;  %v3273_v29 = vpop.f32.mrf.mxu2 }
 0x5ba   :  { %v3361_v28 = vadd.f32 %v3360_v30, %v3267_v40 }
 0x5bc   :  { %v3173_v57 = vpop.f32.mrf.mxu1  ;;  %v3465_v50 = vadd.f32 %v3453_v51, %v3361_v28 }
 0x5bd   :  { %v3183_v25 = vadd.f32 %v3173_v57, %v3084_v53 }
 0x5c1   :  { %v3363_v45 = vpop.f32.mrf.mxu3  ;;  %v3276_v35 = vpop.f32.mrf.mxu2 }
 0x5c2   :  { %v3364_v4 = vadd.f32 %v3363_v45, %v3270_v52  ;;  %v3643_v52 = vld [vmem:[%s7455_s0 + $0x18] sm:$0xff]  ;;  %v3644_v45 = vld [vmem:[%s7455_s0 + $0x20] sm:$0xff] }
 0x5c4   :  { %v3176_v2 = vpop.f32.mrf.mxu1  ;;  %v3466_v17 = vadd.f32 %v3456_v19, %v3364_v4 }
 0x5c5   :  { %v3184_v33 = vadd.f32 %v3176_v2, %v3085_v38 }
 0x5c9   :  { %v3366_v18 = vpop.f32.mrf.mxu3 }
 0x5ca   :  { %v3367_v46 = vadd.f32 %v3366_v18, %v3273_v29  ;;  %v3645_v29 = vld [vmem:[%s7455_s0 + $0x28] sm:$0xff] }
 0x5cc   :  { %v3179_v49 = vpop.f32.mrf.mxu1  ;;  %v3467_v43 = vadd.f32 %v3459_v58, %v3367_v46 }
 0x5cd   :  { %v3185_v62 = vadd.f32 %v3179_v49, %v3086_v10 }
 0x5d1   :  { %v3369_v14 = vpop.f32.mrf.mxu3 }
 0x5d2   :  { %v3370_v39 = vadd.f32 %v3369_v14, %v3276_v35  ;;  %v3646_v35 = vld [vmem:[%s7455_s0 + $0x30] sm:$0xff] }
 0x5d4   :  { %v3550_v59 = vpop.f32.mrf.mxu1  ;;  %v3468_v27 = vadd.f32 %v3462_v23, %v3370_v39 }
 0x5d5   :  { %v3562_v31 = vadd.f32 %v3550_v59, %v3465_v50 }
 0x5dc   :  { %v3553_v3 = vpop.f32.mrf.mxu1 }
 0x5dd   :  { %v3563_v12 = vadd.f32 %v3553_v3, %v3466_v17 }
 0x5e4   :  { %v3556_v37 = vpop.f32.mrf.mxu1 }
 0x5e5   :  { %v3564_v24 = vadd.f32 %v3556_v37, %v3467_v43  ;;  %v3647_v43 = vld [vmem:[%s7455_s0 + $0x38] sm:$0xff] }
 0x5ec   :  { %v3559_v13 = vpop.f32.mrf.mxu1 }
 0x5ed   :  { %v3565_v6 = vadd.f32 %v3559_v13, %v3468_v27 }
 0x5ef   :  { %3607 = vmatpush.msra.mxu2 %v3565_v6 }
 0x5f1   :  { %3608 = vmatpush.msra.mxu2 %v3564_v24 }
 0x5f3   :  { %3609 = vmatpush.msra.mxu2 %v3563_v12 }
 0x5f5   :  { %3610 = vmatpush.msra.mxu2 %v3562_v31 }
 0x5f7   :  { %3611 = vmatpush.msra.mxu2 %v3185_v62 }
 0x5f9   :  { %3612 = vmatpush.msra.mxu2 %v3184_v33 }
 0x5fb   :  { %3613 = vmatpush.msra.mxu2 %v3183_v25 }
 0x5fd   :  { %3614 = vmatpush.msra.mxu2 %v3182_v47 }
 0x5fe   :  { %4504 = vmatmul.msk.f32.vlgmr.msra.gmra.mxu2 %vm3574_vm13, %v3566_v22 }
 0x606   :  { %4505 = vmatmul.msk.f32.gmra.mxu2 %vm3574_vm13, %v3567_v56 }
 0x60e   :  { %4506 = vmatmul.msk.f32.gmra.mxu2 %vm3574_vm13, %v3568_v16 }
 0x616   :  { %4507 = vmatmul.msk.f32.gmra.mxu2 %vm3574_vm13, %v3569_v7 }
 0x61e   :  { %4508 = vmatmul.msk.f32.gmra.mxu2 %vm3574_vm13, %v3570_v60 }
 0x626   :  { %4509 = vmatmul.msk.f32.gmra.mxu2 %vm3574_vm13, %v3571_v61 }
 0x62e   :  { %4510 = vmatmul.msk.f32.gmra.mxu2 %vm3574_vm13, %v3572_v9 }
 0x636   :  { %4511 = vmatmul.msk.f32.gmra.mxu2 %vm3574_vm13, %v3573_v20 }
 0x681   :  { %v3616_v42 = vpop.f32.mrf.mxu2 }
 0x682   :  { %v3648_v44 = vadd.f32 %v3640_v34, %v3616_v42 }
 0x684   :  { %v6979_v5 = vadd.f32 %v4618_v54, %v3648_v44 }
 0x686   :  { %v3670_v21 = vsel %vm151_vm0, %v6979_v5, 0.0 }
 0x687   :  { %3671 = vadd.xlane.f32.xlu0 %v3670_v21 }
 0x689   :  { %v3619_v41 = vpop.f32.mrf.mxu2 }
 0x68a   :  { %v3649_v55 = vadd.f32 %v3641_v26, %v3619_v41 }
 0x68c   :  { %v6986_v1 = vadd.f32 %v4618_v54, %v3649_v55 }
 0x68e   :  { %v3673_v47 = vsel %vm151_vm0, %v6986_v1, 0.0 }
 0x68f   :  { %3674 = vadd.xlane.f32.xlu1 %v3673_v47 }
 0x691   :  { %v3622_v57 = vpop.f32.mrf.mxu2 }
 0x692   :  { %v3650_v40 = vadd.f32 %v3642_v8, %v3622_v57 }
 0x694   :  { %v6993_v32 = vadd.f32 %v4618_v54, %v3650_v40 }
 0x696   :  { %v3676_v2 = vsel %vm151_vm0, %v6993_v32, 0.0 }
 0x697   :  { %3677 = vadd.xlane.f32.xlu2 %v3676_v2 }
 0x699   :  { %v3625_v30 = vpop.f32.mrf.mxu2 }
 0x69a   :  { %v3651_v63 = vadd.f32 %v3643_v52, %v3625_v30  ;;  %v3871_v52 = vld [vmem:[#allocation10 + $0x18] sm:$0xff] }
 0x69b   :  { %3912 = vmatpush.msra.mxu3 %v3871_v52 }
 0x69c   :  { %v7000_v49 = vadd.f32 %v4618_v54, %v3651_v63  ;;  %v3870_v63 = vld [vmem:[#allocation10 + $0x10] sm:$0xff] }
 0x69d   :  { %3913 = vmatpush.msra.mxu3 %v3870_v63 }
 0x69e   :  { %v3679_v51 = vsel %vm151_vm0, %v7000_v49, 0.0 }
 0x69f   :  { %3680 = vadd.xlane.f32.xlu2 %v3679_v51 }
 0x6a1   :  { %v3628_v11 = vpop.f32.mrf.mxu2 }
 0x6a2   :  { %v3652_v59 = vadd.f32 %v3644_v45, %v3628_v11  ;;  %v3869_v45 = vld [vmem:[#allocation10 + $0x8] sm:$0xff] }
 0x6a3   :  { %3914 = vmatpush.msra.mxu3 %v3869_v45 }
 0x6a4   :  { %v7007_v19 = vadd.f32 %v4618_v54, %v3652_v59  ;;  %v3868_v59 = vld [vmem:[#allocation10] sm:$0xff] }
 0x6a5   :  { %3915 = vmatpush.msra.mxu3 %v3868_v59 }
 0x6a6   :  { %v3682_v18 = vsel %vm151_vm0, %v7007_v19, 0.0 }
 0x6a7   :  { %3683 = vadd.xlane.f32.xlu2 %v3682_v18 }
 0x6a9   :  { %v3631_v3 = vpop.f32.mrf.mxu2 }
 0x6aa   :  { %v3653_v58 = vadd.f32 %v3645_v29, %v3631_v3 }
 0x6ac   :  { %v7014_v14 = vadd.f32 %v4618_v54, %v3653_v58 }
 0x6ae   :  { %v3685_v37 = vsel %vm151_vm0, %v7014_v14, 0.0 }
 0x6af   :  { %3686 = vadd.xlane.f32.xlu2 %v3685_v37 }
 0x6b1   :  { %v3634_v39 = vpop.f32.mrf.mxu2 }
 0x6b2   :  { %v3654_v46 = vadd.f32 %v3646_v35, %v3634_v39 }
 0x6b4   :  { %v7021_v23 = vadd.f32 %v4618_v54, %v3654_v46 }
 0x6b6   :  { %v3688_v4 = vsel %vm151_vm0, %v7021_v23, 0.0 }
 0x6b7   :  { %3689 = vadd.xlane.f32.xlu0 %v3688_v4 }
 0x6b9   :  { %v3637_v28 = vpop.f32.mrf.mxu2 }
 0x6ba   :  { %v3655_v17 = vadd.f32 %v3647_v43, %v3637_v28 }
 0x6bc   :  { %v7036_v12 = vadd.f32 %v4618_v54, %v3655_v17 }
 0x6be   :  { %v3691_v31 = vsel %vm151_vm0, %v7036_v12, 0.0 }
 0x6fa   :  { %v3672_v27 = vpop.xlane.xlu0 %3671 }
 0x6fb   :  { %v3694_v13 = vmul.f32 %v3672_v27, %v5235_v36 }
 0x6fd   :  { %v7030_v6 = vsub.f32 %v6979_v5, %v3694_v13 }
 0x6ff   :  { %v3710_v0 = vmul.f32 %v7030_v6, %v7030_v6 }
 0x701   :  { %v3718_v24 = vsel %vm151_vm0, %v3710_v0, 0.0 }
 0x702   :  { %v3675_v15 = vpop.xlane.xlu1 %3674  ;;  %3719 = vadd.xlane.f32.xlu2 %v3718_v24 }
 0x703   :  { %v3695_v50 = vmul.f32 %v3675_v15, %v5235_v36 }
 0x705   :  { %v7039_v48 = vsub.f32 %v6986_v1, %v3695_v50 }
 0x707   :  { %v3711_v10 = vmul.f32 %v7039_v48, %v7039_v48 }
 0x709   :  { %v3721_v38 = vsel %vm151_vm0, %v3711_v10, 0.0 }
 0x70a   :  { %3722 = vadd.xlane.f32.xlu1 %v3721_v38  ;;  %v3678_v62 = vpop.xlane.xlu2 %3677  ;;  %3692 = vadd.xlane.f32.xlu2 %v3691_v31  ;;  %v7094_v31 = vld [vmem:[%s7464_s9] ss:$0 sm:$0xff] }
 0x70b   :  { %v3696_v53 = vmul.f32 %v3678_v62, %v5235_v36 }
 0x70d   :  { %v7048_v33 = vsub.f32 %v6993_v32, %v3696_v53  ;;  %v7096_v53 = vld [vmem:[#allocation8] ss:$0 sm:$0xff] }
 0x70f   :  { %v3712_v25 = vmul.f32 %v7048_v33, %v7048_v33 }
 0x711   :  { %v3724_v22 = vsel %vm151_vm0, %v3712_v25, 0.0 }
 0x712   :  { %v3681_v56 = vpop.xlane.xlu2 %3680  ;;  %3725 = vadd.xlane.f32.xlu0 %v3724_v22 }
 0x713   :  { %v3697_v16 = vmul.f32 %v3681_v56, %v5235_v36 }
 0x715   :  { %v7055_v7 = vsub.f32 %v7000_v49, %v3697_v16 }
 0x717   :  { %v3713_v60 = vmul.f32 %v7055_v7, %v7055_v7 }
 0x719   :  { %v3727_v61 = vsel %vm151_vm0, %v3713_v60, 0.0 }
 0x71a   :  { %3728 = vadd.xlane.f32.xlu1 %v3727_v61  ;;  %v3684_v9 = vpop.xlane.xlu2 %3683 }
 0x71b   :  { %v3698_v20 = vmul.f32 %v3684_v9, %v5235_v36 }
 0x71d   :  { %v7062_v34 = vsub.f32 %v7007_v19, %v3698_v20 }
 0x71f   :  { %v3714_v54 = vmul.f32 %v7062_v34, %v7062_v34 }
 0x721   :  { %v3730_v42 = vsel %vm151_vm0, %v3714_v54, 0.0 }
 0x722   :  { %v3687_v44 = vpop.xlane.xlu2 %3686  ;;  %3731 = vadd.xlane.f32.xlu2 %v3730_v42 }
 0x723   :  { %v3699_v21 = vmul.f32 %v3687_v44, %v5235_v36 }
 0x725   :  { %v7069_v26 = vsub.f32 %v7014_v14, %v3699_v21 }
 0x727   :  { %v3715_v41 = vmul.f32 %v7069_v26, %v7069_v26 }
 0x729   :  { %v3733_v55 = vsel %vm151_vm0, %v3715_v41, 0.0 }
 0x72a   :  { %3734 = vadd.xlane.f32.xlu0 %v3733_v55  ;;  %v3690_v47 = vpop.xlane.xlu0 %3689 }
 0x72b   :  { %v3700_v8 = vmul.f32 %v3690_v47, %v5235_v36 }
 0x72d   :  { %v7076_v57 = vsub.f32 %v7021_v23, %v3700_v8 }
 0x72f   :  { %v3716_v40 = vmul.f32 %v7076_v57, %v7076_v57 }
 0x731   :  { %v3736_v2 = vsel %vm151_vm0, %v3716_v40, 0.0 }
 0x732   :  { %3737 = vadd.xlane.f32.xlu1 %v3736_v2 }
 0x775   :  { %v3720_v30 = vpop.xlane.xlu2 %3719 }
 0x776   :  { %v3742_v51 = vmul.f32 %v3720_v30, %v5235_v36 }
 0x778   :  { %v3750_v11 = vadd.f32 1e-05, %v3742_v51 }
 0x77a   :  { %4785 = vrsqrt.f32 %v3750_v11  ;;  %vm3764_vm15 = vweird.f32 %v3750_v11 }
 0x77d   :  { %v3723_v18 = vpop.xlane.xlu1 %3722  ;;  %v3693_v29 = vpop.xlane.xlu2 %3692 }
 0x77e   :  { %v3743_v3 = vmul.f32 %v3723_v18, %v5235_v36  ;;  %v3701_v58 = vmul.f32 %v3693_v29, %v5235_v36 }
 0x780   :  { %v4786_v37 = vpop.eup %4785  ;;  %v3751_v35 = vadd.f32 1e-05, %v3743_v3  ;;  %v7085_v39 = vsub.f32 %v7036_v12, %v3701_v58 }
 0x781   :  { %v3759_v46 = vmul.f32 %v4786_v37, %v3750_v11  ;;  %vm3765_vm14 = vweird.f32 %v4786_v37 }
 0x782   :  { %4787 = vrsqrt.f32 %v3751_v35  ;;  %v3717_v4 = vmul.f32 %v7085_v39, %v7085_v39  ;;  %vm3766_vm1 = vmor %vm3764_vm15, %vm3765_vm14  ;;  %vm3774_vm3 = vweird.f32 %v3751_v35 }
 0x783   :  { %v3760_v27 = vmul.f32 %v4786_v37, %v3759_v46 }
 0x784   :  { %v3739_v13 = vsel %vm151_vm0, %v3717_v4, 0.0 }
 0x785   :  { %v3761_v28 = vmul.f32 0.5, %v3760_v27  ;;  %v3726_v43 = vpop.xlane.xlu0 %3725  ;;  %3740 = vadd.xlane.f32.xlu2 %v3739_v13 }
 0x786   :  { %v3744_v0 = vmul.f32 %v3726_v43, %v5235_v36 }
 0x787   :  { %v3762_v17 = vsub.f32 1.5, %v3761_v28 }
 0x788   :  { %v4788_v24 = vpop.eup %4787  ;;  %v3752_v15 = vadd.f32 1e-05, %v3744_v0 }
 0x789   :  { %v3763_v50 = vmul.f32 %v4786_v37, %v3762_v17  ;;  %v3769_v10 = vmul.f32 %v4788_v24, %v3751_v35  ;;  %vm3775_vm2 = vweird.f32 %v4788_v24 }
 0x78a   :  { %4789 = vrsqrt.f32 %v3752_v15  ;;  %vm3776_vm4 = vmor %vm3774_vm3, %vm3775_vm2  ;;  %vm3784_vm6 = vweird.f32 %v3752_v15 }
 0x78b   :  { %v3767_v38 = vsel %vm3766_vm1, %v4786_v37, %v3763_v50  ;;  %v3770_v62 = vmul.f32 %v4788_v24, %v3769_v10 }
 0x78c   :  { %v3838_v25 = vmul.f32 %v3767_v38, %v7030_v6 }
 0x78d   :  { %v3771_v22 = vmul.f32 0.5, %v3770_v62  ;;  %v3729_v56 = vpop.xlane.xlu1 %3728 }
 0x78e   :  { %v3849_v16 = vmul.f32 %v7094_v31, %v3838_v25  ;;  %v3745_v60 = vmul.f32 %v3729_v56, %v5235_v36 }
 0x78f   :  { %v3772_v61 = vsub.f32 1.5, %v3771_v22 }
 0x790   :  { %v4790_v9 = vpop.eup %4789  ;;  %v3860_v20 = vadd.f32 %v7096_v53, %v3849_v16  ;;  %v3753_v54 = vadd.f32 1e-05, %v3745_v60 }
 0x791   :  { %v3773_v42 = vmul.f32 %v4788_v24, %v3772_v61  ;;  %v3779_v44 = vmul.f32 %v4790_v9, %v3752_v15  ;;  %vm3785_vm5 = vweird.f32 %v4790_v9 }
 0x792   :  { %4791 = vrsqrt.f32 %v3753_v54  ;;  %4512 = vmatmul.msk.f32.vlgmr.msra.gmra.mxu3 %vm151_vm0, %v3860_v20  ;;  %vm3786_vm7 = vmor %vm3784_vm6, %vm3785_vm5  ;;  %vm3794_vm9 = vweird.f32 %v3753_v54 }
 0x793   :  { %v3777_v6 = vsel %vm3776_vm4, %v4788_v24, %v3773_v42  ;;  %v3780_v21 = vmul.f32 %v4790_v9, %v3779_v44 }
 0x794   :  { %v3839_v41 = vmul.f32 %v3777_v6, %v7039_v48 }
 0x795   :  { %v3781_v55 = vmul.f32 0.5, %v3780_v21  ;;  %v3732_v47 = vpop.xlane.xlu2 %3731 }
 0x796   :  { %v3746_v8 = vmul.f32 %v3732_v47, %v5235_v36  ;;  %v3850_v40 = vmul.f32 %v7094_v31, %v3839_v41 }
 0x797   :  { %v3782_v2 = vsub.f32 1.5, %v3781_v55 }
 0x798   :  { %v4792_v52 = vpop.eup %4791  ;;  %v3754_v30 = vadd.f32 1e-05, %v3746_v8  ;;  %v3861_v63 = vadd.f32 %v7096_v53, %v3850_v40 }
 0x799   :  { %v3783_v51 = vmul.f32 %v4790_v9, %v3782_v2  ;;  %v3789_v45 = vmul.f32 %v4792_v52, %v3753_v54  ;;  %vm3795_vm8 = vweird.f32 %v4792_v52 }
 0x79a   :  { %4793 = vrsqrt.f32 %v3754_v30  ;;  %4513 = vmatmul.msk.f32.gmra.mxu3 %vm151_vm0, %v3861_v63  ;;  %vm3796_vm10 = vmor %vm3794_vm9, %vm3795_vm8  ;;  %vm3804_vm12 = vweird.f32 %v3754_v30 }
 0x79b   :  { %v3787_v48 = vsel %vm3786_vm7, %v4790_v9, %v3783_v51  ;;  %v3790_v11 = vmul.f32 %v4792_v52, %v3789_v45 }
 0x79c   :  { %v3840_v59 = vmul.f32 %v3787_v48, %v7048_v33 }
 0x79d   :  { %v3791_v18 = vmul.f32 0.5, %v3790_v11  ;;  %v3735_v29 = vpop.xlane.xlu0 %3734 }
 0x79e   :  { %v3747_v3 = vmul.f32 %v3735_v29, %v5235_v36  ;;  %v3851_v58 = vmul.f32 %v7094_v31, %v3840_v59 }
 0x79f   :  { %v3792_v37 = vsub.f32 1.5, %v3791_v18 }
 0x7a0   :  { %v4794_v35 = vpop.eup %4793  ;;  %v3755_v46 = vadd.f32 1e-05, %v3747_v3  ;;  %v3862_v4 = vadd.f32 %v7096_v53, %v3851_v58 }
 0x7a1   :  { %v3793_v27 = vmul.f32 %v4792_v52, %v3792_v37  ;;  %v3799_v13 = vmul.f32 %v4794_v35, %v3754_v30  ;;  %vm3805_vm11 = vweird.f32 %v4794_v35 }
 0x7a2   :  { %4795 = vrsqrt.f32 %v3755_v46  ;;  %4514 = vmatmul.msk.f32.gmra.mxu3 %vm151_vm0, %v3862_v4  ;;  %vm3806_vm13 = vmor %vm3804_vm12, %vm3805_vm11  ;;  %vm3814_vm15 = vweird.f32 %v3755_v46 }
 0x7a3   :  { %v3797_v33 = vsel %vm3796_vm10, %v4792_v52, %v3793_v27  ;;  %v3800_v28 = vmul.f32 %v4794_v35, %v3799_v13  ;;  %v4276_v27 = vld [vmem:[%s7468_s13 + $0x78] sm:$0xff]  ;;  %v4274_v13 = vld [vmem:[%s7468_s13 + $0x68] sm:$0xff] }
 0x7a4   :  { %v3841_v43 = vmul.f32 %v3797_v33, %v7055_v7  ;;  %4281 = vmatpush.msrb.mxu0 %v4276_v27 }
 0x7a5   :  { %v3801_v0 = vmul.f32 0.5, %v3800_v28  ;;  %v3738_v17 = vpop.xlane.xlu1 %3737  ;;  %v4273_v28 = vld [vmem:[%s7468_s13 + $0x60] sm:$0xff] }
 0x7a6   :  { %v3748_v24 = vmul.f32 %v3738_v17, %v5235_v36  ;;  %v3852_v15 = vmul.f32 %v7094_v31, %v3841_v43 }
 0x7a7   :  { %v3802_v50 = vsub.f32 1.5, %v3801_v0 }
 0x7a8   :  { %v4796_v10 = vpop.eup %4795  ;;  %v3756_v38 = vadd.f32 1e-05, %v3748_v24  ;;  %v3863_v62 = vadd.f32 %v7096_v53, %v3852_v15  ;;  %v4272_v24 = vld [vmem:[%s7468_s13 + $0x58] sm:$0xff]  ;;  %v4271_v15 = vld [vmem:[%s7468_s13 + $0x50] sm:$0xff] }
 0x7a9   :  { %v3803_v25 = vmul.f32 %v4794_v35, %v3802_v50  ;;  %v3809_v22 = vmul.f32 %v4796_v10, %v3755_v46  ;;  %vm3815_vm14 = vweird.f32 %v4796_v10 }
 0x7aa   :  { %4797 = vrsqrt.f32 %v3756_v38  ;;  %4515 = vmatmul.msk.f32.gmra.mxu3 %vm151_vm0, %v3863_v62  ;;  %vm3816_vm1 = vmor %vm3814_vm15, %vm3815_vm14  ;;  %vm3824_vm3 = vweird.f32 %v3756_v38  ;;  %v4269_v62 = vld [vmem:[%s7468_s13 + $0x40] sm:$0xff] }
 0x7ab   :  { %v3807_v7 = vsel %vm3806_vm13, %v4794_v35, %v3803_v25  ;;  %v3810_v56 = vmul.f32 %v4796_v10, %v3809_v22 }
 0x7ac   :  { %v3842_v16 = vmul.f32 %v3807_v7, %v7062_v34 }
 0x7ad   :  { %v3811_v60 = vmul.f32 0.5, %v3810_v56 }
 0x7ae   :  { %v3853_v61 = vmul.f32 %v7094_v31, %v3842_v16  ;;  %v4268_v16 = vld [vmem:[%s7468_s13 + $0x38] sm:$0xff] }
 0x7af   :  { %v3812_v9 = vsub.f32 1.5, %v3811_v60 }
 0x7b0   :  { %v4798_v20 = vpop.eup %4797  ;;  %v3864_v54 = vadd.f32 %v7096_v53, %v3853_v61 }
 0x7b1   :  { %v3813_v42 = vmul.f32 %v4796_v10, %v3812_v9  ;;  %v3819_v44 = vmul.f32 %v4798_v20, %v3756_v38  ;;  %vm3825_vm2 = vweird.f32 %v4798_v20 }
 0x7b2   :  { %4516 = vmatmul.msk.f32.gmra.mxu3 %vm151_vm0, %v3864_v54  ;;  %vm3826_vm4 = vmor %vm3824_vm3, %vm3825_vm2 }
 0x7b3   :  { %v3817_v6 = vsel %vm3816_vm1, %v4796_v10, %v3813_v42  ;;  %v3820_v21 = vmul.f32 %v4798_v20, %v3819_v44  ;;  %v4270_v10 = vld [vmem:[%s7468_s13 + $0x48] sm:$0xff] }
 0x7b4   :  { %v3843_v41 = vmul.f32 %v3817_v6, %v7069_v26  ;;  %v4266_v6 = vld [vmem:[%s7468_s13 + $0x28] sm:$0xff] }
 0x7b5   :  { %v3821_v55 = vmul.f32 0.5, %v3820_v21 }
 0x7b6   :  { %v3854_v34 = vmul.f32 %v7094_v31, %v3843_v41 }
 0x7b7   :  { %v3822_v47 = vsub.f32 1.5, %v3821_v55 }
 0x7b8   :  { %v3865_v8 = vadd.f32 %v7096_v53, %v3854_v34  ;;  %v4265_v34 = vld [vmem:[%s7468_s13 + $0x20] sm:$0xff] }
 0x7b9   :  { %v3823_v40 = vmul.f32 %v4798_v20, %v3822_v47 }
 0x7ba   :  { %4517 = vmatmul.msk.f32.gmra.mxu3 %vm151_vm0, %v3865_v8 }
 0x7bb   :  { %v3827_v2 = vsel %vm3826_vm4, %v4798_v20, %v3823_v40  ;;  %v4267_v20 = vld [vmem:[%s7468_s13 + $0x30] sm:$0xff] }
 0x7bc   :  { %v3844_v52 = vmul.f32 %v3827_v2, %v7076_v57 }
 0x7be   :  { %v3855_v30 = vmul.f32 %v7094_v31, %v3844_v52 }
 0x7c0   :  { %v3866_v63 = vadd.f32 %v7096_v53, %v3855_v30 }
 0x7c2   :  { %4518 = vmatmul.msk.f32.gmra.mxu3 %vm151_vm0, %v3866_v63  ;;  %v4264_v63 = vld [vmem:[%s7468_s13 + $0x18] sm:$0xff] }
 0x7f8   :  { %v3741_v26 = vpop.xlane.xlu2 %3740 }
 0x7f9   :  { %v3749_v51 = vmul.f32 %v3741_v26, %v5235_v36  ;;  %v7136_v36 = vld [vmem:[%s7467_s12] ss:$0 sm:$0xff] }
 0x7fb   :  { %v3757_v45 = vadd.f32 1e-05, %v3749_v51 }
 0x7fd   :  { %4799 = vrsqrt.f32 %v3757_v45  ;;  %vm3834_vm6 = vweird.f32 %v3757_v45 }
 0x803   :  { %v4800_v48 = vpop.eup %4799 }
 0x804   :  { %v3829_v11 = vmul.f32 %v4800_v48, %v3757_v45  ;;  %vm3835_vm5 = vweird.f32 %v4800_v48 }
 0x805   :  { %vm3836_vm7 = vmor %vm3834_vm6, %vm3835_vm5 }
 0x806   :  { %v3830_v59 = vmul.f32 %v4800_v48, %v3829_v11  ;;  %v4263_v11 = vld [vmem:[%s7468_s13 + $0x10] sm:$0xff] }
 0x808   :  { %v3831_v18 = vmul.f32 0.5, %v3830_v59 }
 0x80a   :  { %v3832_v29 = vsub.f32 1.5, %v3831_v18 }
 0x80c   :  { %v3833_v3 = vmul.f32 %v4800_v48, %v3832_v29 }
 0x80e   :  { %v3837_v57 = vsel %vm3836_vm7, %v4800_v48, %v3833_v3 }
 0x80f   :  { %v3845_v58 = vmul.f32 %v3837_v57, %v7085_v39  ;;  %v4262_v57 = vld [vmem:[%s7468_s13 + $0x8] sm:$0xff] }
 0x811   :  { %v3856_v37 = vmul.f32 %v7094_v31, %v3845_v58  ;;  %v4275_v31 = vld [vmem:[%s7468_s13 + $0x70] sm:$0xff] }
 0x812   :  { %4282 = vmatpush.msrb.mxu0 %v4275_v31 }
 0x813   :  { %v3867_v35 = vadd.f32 %v7096_v53, %v3856_v37 }
 0x814   :  { %4283 = vmatpush.msrb.mxu0 %v4274_v13 }
 0x815   :  { %v3917_v46 = vpop.f32.mrf.mxu3  ;;  %4519 = vmatmul.msk.f32.gmra.mxu3 %vm151_vm0, %v3867_v35 }
 0x816   :  { %v7141_v4 = vadd.f32 %v7136_v36, %v3917_v46  ;;  %4284 = vmatpush.msrb.mxu0 %v4273_v28  ;;  %v4261_v46 = vld [vmem:[%s7468_s13] sm:$0xff]  ;;  %s5025_s13 = smov [#allocation13]  }
 0x817   :  { %s4342_s21 = sshll.u32 %s5025_s13, 4  ;;  %s4343_s21 = int_to_ptr.vmem [resolvable:$true] %s4342_s21 }
 0x818   :  { %v7147_v39 = vmul.f32 0.70710677, %v7141_v4  ;;  %4285 = vmatpush.msrb.mxu0 %v4272_v24 }
 0x81a   :  { %v3973_v53 = vand.u32 2147483647, %v7147_v39  ;;  %4286 = vmatpush.msrb.mxu0 %v4271_v15  ;;  %vm3957_vm12 = vcmp.ge.f32.partialorder %v7147_v39, 0.0 }
 0x81c   :  { %v3981_v33 = vmul.f32 0.3275911, %v3973_v53  ;;  %4287 = vmatpush.msrb.mxu0 %v4270_v10  ;;  %v4189_v8 = vsub.f32 0.0, %v3973_v53 }
 0x81d   :  { %v3920_v43 = vpop.f32.mrf.mxu3 }
 0x81e   :  { %v3989_v0 = vadd.f32 1.0, %v3981_v33  ;;  %v7160_v17 = vadd.f32 %v7136_v36, %v3920_v43  ;;  %4288 = vmatpush.msrb.mxu0 %v4269_v62  ;;  %v4197_v18 = vmul.f32 %v4189_v8, %v3973_v53  ;;  %v7248_v62 = vmul.f32 0.5, %v7141_v4 }
 0x81f   :  { %v5024_v4 = vmov -1.0  }
 0x820   :  { %4801 = vrcp.f32 %v3989_v0  ;;  %v7169_v50 = vmul.f32 0.70710677, %v7160_v17  ;;  %4289 = vmatpush.msrb.mxu0 %v4268_v16  ;;  %v4008_v42 = vand.u32 2147483648, %v3989_v0  ;;  %v4006_v41 = vand.u32 2147483647, %v3989_v0 }
 0x821   :  { %vm4002_vm9 = vweird.f32 %v3989_v0  ;;  %v4205_v31 = vmul.f32 1.442695, %v4197_v18 }
 0x822   :  { %v7175_v38 = vand.u32 2147483647, %v7169_v50  ;;  %4290 = vmatpush.msrb.mxu0 %v4267_v20  ;;  %v4009_v2 = vor.u32 1.1754944e-38, %v4008_v42  ;;  %vm4007_vm11 = vcmp.eq.f32.partialorder %v4006_v41, 8.507059e+37  ;;  %v7267_v42 = vmul.f32 0.5, %v7160_v17 }
 0x823   :  { %vm3958_vm2 = vcmp.ge.f32.partialorder %v7169_v50, 0.0 }
 0x824   :  { %v3982_v25 = vmul.f32 0.3275911, %v7175_v38  ;;  %4291 = vmatpush.msrb.mxu0 %v4266_v6 }
 0x825   :  { %v3923_v22 = vpop.f32.mrf.mxu3 }
 0x826   :  { %v4802_v7 = vpop.eup %4801  ;;  %v7182_v56 = vadd.f32 %v7136_v36, %v3923_v22  ;;  %v7187_v61 = vadd.f32 1.0, %v3982_v25  ;;  %4292 = vmatpush.msrb.mxu0 %v4265_v34  ;;  %v4190_v25 = vsub.f32 0.0, %v7175_v38 }
 0x827   :  { %v3998_v60 = vmul.f32 %v4802_v7, %v3989_v0  ;;  %vm4003_vm8 = vweird.f32 %v4802_v7 }
 0x828   :  { %v7190_v9 = vmul.f32 0.70710677, %v7182_v56  ;;  %4803 = vrcp.f32 %v7187_v61  ;;  %vm4004_vm10 = vmor %vm4002_vm9, %vm4003_vm8  ;;  %4293 = vmatpush.msrb.mxu0 %v4264_v63  ;;  %v4023_v33 = vand.u32 2147483648, %v7187_v61  ;;  %vm4017_vm14 = vweird.f32 %v7187_v61 }
 0x829   :  { %v3999_v54 = vsub.f32 1.0, %v3998_v60  ;;  %v4021_v10 = vand.u32 2147483647, %v7187_v61  ;;  %v4198_v34 = vmul.f32 %v4190_v25, %v7175_v38 }
 0x82a   :  { %v7197_v44 = vand.u32 2147483647, %v7190_v9  ;;  %4294 = vmatpush.msrb.mxu0 %v4263_v11  ;;  %v4024_v6 = vor.u32 1.1754944e-38, %v4023_v33  ;;  %vm3959_vm5 = vcmp.ge.f32.partialorder %v7190_v9, 0.0 }
 0x82b   :  { %v4000_v21 = vmul.f32 %v4802_v7, %v3999_v54  ;;  %v3965_v54 = vsel %vm3957_vm12, 1.0, %v5024_v4  ;;  %vm4022_vm1 = vcmp.eq.f32.partialorder %v4021_v10, 8.507059e+37 }
 0x82c   :  { %v3983_v55 = vmul.f32 0.3275911, %v7197_v44  ;;  %4295 = vmatpush.msrb.mxu0 %v4262_v57  ;;  %v4191_v39 = vsub.f32 0.0, %v7197_v44  ;;  %v7295_v57 = vsel %vm3958_vm2, 1.0, %v5024_v4 }
 0x82d   :  { %v4001_v47 = vadd.f32 %v4802_v7, %v4000_v21  ;;  %v3926_v40 = vpop.f32.mrf.mxu3 }
 0x82e   :  { %v7206_v52 = vadd.f32 1.0, %v3983_v55  ;;  %v7209_v30 = vadd.f32 %v7136_v36, %v3926_v40  ;;  %v4804_v26 = vpop.eup %4803  ;;  %4296 = vmatpush.msrb.mxu0 %v4261_v46 }
 0x82f   :  { %v4005_v51 = vsel %vm4004_vm10, %v4802_v7, %v4001_v47  ;;  %v4013_v48 = vmul.f32 %v4804_v26, %v7187_v61  ;;  %vm4018_vm13 = vweird.f32 %v4804_v26 }
 0x830   :  { %v7214_v45 = vsel %vm4007_vm11, %v4009_v2, %v4005_v51  ;;  %4805 = vrcp.f32 %v7206_v52  ;;  %v7223_v3 = vmul.f32 0.70710677, %v7209_v30  ;;  %vm7256_vm15 = vmor %vm4017_vm14, %vm4018_vm13  ;;  %v4038_v63 = vand.u32 2147483648, %v7206_v52 }
 0x831   :  { %v4117_v59 = vmul.f32 1.0614054, %v7214_v45  ;;  %v4014_v29 = vsub.f32 1.0, %v4013_v48  ;;  %4807 = vpow2.f32 %v4205_v31  ;;  %v4036_v51 = vand.u32 2147483647, %v7206_v52 }
 0x832   :  { %v7229_v35 = vand.u32 2147483647, %v7223_v3  ;;  %vm4032_vm4 = vweird.f32 %v7206_v52  ;;  %v7315_v31 = vmul.f32 0.5, %v7182_v56  ;;  %v4039_v33 = vor.u32 1.1754944e-38, %v4038_v63 }
 0x833   :  { %v4125_v58 = vadd.f32 -1.4531521, %v4117_v59  ;;  %v4015_v37 = vmul.f32 %v4804_v26, %v4014_v29  ;;  %vm4037_vm7 = vcmp.eq.f32.partialorder %v4036_v51, 8.507059e+37 }
 0x834   :  { %v3984_v28 = vmul.f32 0.3275911, %v7229_v35  ;;  %v4192_v63 = vsub.f32 0.0, %v7229_v35 }
 0x835   :  { %v4133_v27 = vmul.f32 %v4125_v58, %v7214_v45  ;;  %v3929_v53 = vpop.f32.mrf.mxu3  ;;  %v4016_v0 = vadd.f32 %v4804_v26, %v4015_v37  ;;  %v4199_v58 = vmul.f32 %v4191_v39, %v7197_v44  ;;  %v4207_v44 = vmul.f32 1.442695, %v4198_v34 }
 0x836   :  { %v7236_v13 = vpop.eup %4805  ;;  %v7241_v43 = vadd.f32 %v7136_v36, %v3929_v53  ;;  %v7251_v22 = vadd.f32 1.0, %v3984_v28 }
 0x837   :  { %v4141_v24 = vadd.f32 1.4214138, %v4133_v27  ;;  %v4028_v15 = vmul.f32 %v7236_v13, %v7206_v52  ;;  %v4020_v61 = vsel %vm7256_vm15, %v4804_v26, %v4016_v0  ;;  %vm4033_vm3 = vweird.f32 %v7236_v13  ;;  %v4808_v48 = vpop.eup %4807 }
 0x838   :  { %v7254_v7 = vmul.f32 0.70710677, %v7241_v43  ;;  %4809 = vrcp.f32 %v7251_v22  ;;  %v7277_v47 = vsel %vm4022_vm1, %v4024_v6, %v4020_v61  ;;  %vm7304_vm6 = vmor %vm4032_vm4, %vm4033_vm3  ;;  %v4053_v61 = vand.u32 2147483648, %v7251_v22 }
 0x839   :  { %v4149_v60 = vmul.f32 %v4141_v24, %v7214_v45  ;;  %v4029_v20 = vsub.f32 1.0, %v4028_v15  ;;  %v4118_v2 = vmul.f32 1.0614054, %v7277_v47  ;;  %v7324_v24 = vsel %vm3959_vm5, 1.0, %v5024_v4 }
 0x83a   :  { %v7272_v55 = vand.u32 2147483647, %v7254_v7  ;;  %v4209_v15 = vmul.f32 1.442695, %v4199_v58  ;;  %vm4047_vm9 = vweird.f32 %v7251_v22  ;;  %v4054_v52 = vor.u32 1.1754944e-38, %v4053_v61 }
 0x83b   :  { %v4157_v21 = vadd.f32 -0.28449672, %v4149_v60  ;;  %v4030_v41 = vmul.f32 %v7236_v13, %v4029_v20  ;;  %v4126_v18 = vadd.f32 -1.4531521, %v4118_v2 }
 0x83c   :  { %v3985_v8 = vmul.f32 0.3275911, %v7272_v55 }
 0x83d   :  { %v4165_v17 = vmul.f32 %v4157_v21, %v7214_v45  ;;  %v3932_v40 = vpop.f32.mrf.mxu3  ;;  %v4031_v38 = vadd.f32 %v7236_v13, %v4030_v41 }
 0x83e   :  { %v7285_v26 = vadd.f32 %v7136_v36, %v3932_v40  ;;  %v7290_v59 = vadd.f32 1.0, %v3985_v8  ;;  %v4810_v29 = vpop.eup %4809  ;;  %v4051_v40 = vand.u32 2147483647, %v7251_v22 }
 0x83f   :  { %v4173_v11 = vadd.f32 0.2548296, %v4165_v17  ;;  %v4043_v27 = vmul.f32 %v4810_v29, %v7251_v22  ;;  %v4035_v50 = vsel %vm7304_vm6, %v7236_v13, %v4031_v38  ;;  %vm4048_vm8 = vweird.f32 %v4810_v29 }
 0x840   :  { %v7300_v37 = vmul.f32 0.70710677, %v7285_v26  ;;  %4811 = vrcp.f32 %v7290_v59  ;;  %v7327_v10 = vsel %vm4037_vm7, %v4039_v33, %v4035_v50  ;;  %vm7348_vm10 = vmor %vm4047_vm9, %vm4048_vm8  ;;  %vm4052_vm11 = vcmp.eq.f32.partialorder %v4051_v40, 8.507059e+37 }
 0x841   :  { %v4181_v46 = vmul.f32 %v4173_v11, %v7214_v45  ;;  %v4044_v0 = vsub.f32 1.0, %v4043_v27  ;;  %v4134_v45 = vmul.f32 %v4126_v18, %v7277_v47  ;;  %v4119_v20 = vmul.f32 1.0614054, %v7327_v10 }
 0x842   :  { %v7318_v53 = vand.u32 2147483647, %v7300_v37  ;;  %vm4062_vm13 = vweird.f32 %v7290_v59  ;;  %v4066_v61 = vand.u32 2147483647, %v7290_v59  ;;  %vm3960_vm7 = vcmp.ge.f32.partialorder %v7223_v3, 0.0 }
 0x843   :  { %v4221_v28 = vmul.f32 %v4808_v48, %v4181_v46  ;;  %v4045_v25 = vmul.f32 %v4810_v29, %v4044_v0  ;;  %v4142_v60 = vadd.f32 1.4214138, %v4134_v45  ;;  %v4127_v39 = vadd.f32 -1.4531521, %v4119_v20 }
 0x844   :  { %v3986_v13 = vmul.f32 0.3275911, %v7318_v53  ;;  %vm4067_vm1 = vcmp.eq.f32.partialorder %v4066_v61, 8.507059e+37 }
 0x845   :  { %v4229_v56 = vsub.f32 1.0, %v4221_v28  ;;  %v3935_v16 = vpop.f32.mrf.mxu3  ;;  %v4150_v34 = vmul.f32 %v4142_v60, %v7277_v47  ;;  %v4046_v17 = vadd.f32 %v4810_v29, %v4045_v25  ;;  %v4135_v11 = vmul.f32 %v4127_v39, %v7327_v10 }
 0x846   :  { %v7331_v6 = vadd.f32 1.0, %v3986_v13  ;;  %v7334_v21 = vadd.f32 %v7136_v36, %v3935_v16  ;;  %v7336_v9 = vpop.eup %4811  ;;  %v4193_v39 = vsub.f32 0.0, %v7272_v55 }
 0x847   :  { %v4237_v41 = vmul.f32 %v4229_v56, %v3965_v54  ;;  %v4058_v8 = vmul.f32 %v7336_v9, %v7290_v59  ;;  %v4158_v48 = vadd.f32 -0.28449672, %v4150_v34  ;;  %v4050_v18 = vsel %vm7348_vm10, %v4810_v29, %v4046_v17 }
 0x848   :  { %4813 = vrcp.f32 %v7331_v6  ;;  %v7346_v38 = vmul.f32 0.70710677, %v7334_v21  ;;  %v4143_v50 = vadd.f32 1.4214138, %v4135_v11  ;;  %v7363_v28 = vsel %vm4052_vm11, %v4054_v52, %v4050_v18 }
 0x849   :  { %v4245_v2 = vadd.f32 1.0, %v4237_v41  ;;  %4815 = vpow2.f32 %v4207_v44  ;;  %v4059_v51 = vsub.f32 1.0, %v4058_v8  ;;  %v4166_v27 = vmul.f32 %v4158_v48, %v7277_v47 }
 0x84a   :  { %4817 = vpow2.f32 %v4209_v15  ;;  %v7357_v58 = vand.u32 2147483647, %v7346_v38  ;;  %v4200_v44 = vmul.f32 %v4192_v63, %v7229_v35  ;;  %vm4063_vm12 = vweird.f32 %v7336_v9 }
 0x84b   :  { %v4253_v22 = vmul.f32 %v4245_v2, %v7248_v62  ;;  %v4060_v46 = vmul.f32 %v7336_v9, %v4059_v51  ;;  %v4174_v29 = vadd.f32 0.2548296, %v4166_v27  ;;  %v4151_v0 = vmul.f32 %v4143_v50, %v7327_v10  ;;  %vm4064_vm14 = vmor %vm4062_vm13, %vm4063_vm12 }
 0x84c   :  { %v3987_v33 = vmul.f32 0.3275911, %v7357_v58  ;;  %v4120_v45 = vmul.f32 1.0614054, %v7363_v28  ;;  %v4068_v35 = vand.u32 2147483648, %v7290_v59  ;;  %v4083_v59 = vand.u32 2147483648, %v7331_v6 }
 0x84d   :  { %4297 = vmatmul.f32.vlgmr.msrb.gmra.mxu0 %v4253_v22  ;;  %v4061_v15 = vadd.f32 %v7336_v9, %v4060_v46  ;;  %v4182_v16 = vmul.f32 %v4174_v29, %v7277_v47  ;;  %v4159_v60 = vadd.f32 -0.28449672, %v4151_v0  ;;  %v4211_v34 = vmul.f32 1.442695, %v4200_v44 }
 0x84e   :  { %v4814_v62 = vpop.eup %4813  ;;  %v7372_v25 = vadd.f32 1.0, %v3987_v33  ;;  %v4128_v20 = vadd.f32 -1.4531521, %v4120_v45  ;;  %v4069_v54 = vor.u32 1.1754944e-38, %v4068_v35  ;;  %vm4077_vm2 = vweird.f32 %v7331_v6 }
 0x84f   :  { %v4816_v13 = vpop.eup %4815  ;;  %v4073_v56 = vmul.f32 %v4814_v62, %v7331_v6  ;;  %v4167_v40 = vmul.f32 %v4159_v60, %v7327_v10  ;;  %v4065_v47 = vsel %vm4064_vm14, %v7336_v9, %v4061_v15  ;;  %vm4078_vm15 = vweird.f32 %v4814_v62 }
 0x850   :  { %v4818_v41 = vpop.eup %4817  ;;  %4819 = vrcp.f32 %v7372_v25  ;;  %v4222_v8 = vmul.f32 %v4816_v13, %v4182_v16  ;;  %v4136_v2 = vmul.f32 %v4128_v20, %v7363_v28  ;;  %v7385_v18 = vsel %vm4067_vm1, %v4069_v54, %v4065_v47  ;;  %vm4079_vm3 = vmor %vm4077_vm2, %vm4078_vm15 }
 0x851   :  { %v4074_v17 = vsub.f32 1.0, %v4073_v56  ;;  %v4175_v48 = vadd.f32 0.2548296, %v4167_v40  ;;  %v4081_v52 = vand.u32 2147483647, %v7331_v6  ;;  %4821 = vpow2.f32 %v4211_v34 }
 0x852   :  { %v4230_v51 = vsub.f32 1.0, %v4222_v8  ;;  %v4144_v11 = vadd.f32 1.4214138, %v4136_v2  ;;  %v4121_v50 = vmul.f32 1.0614054, %v7385_v18  ;;  %v4084_v29 = vor.u32 1.1754944e-38, %v4083_v59 }
 0x853   :  { %v4075_v63 = vmul.f32 %v4814_v62, %v4074_v17  ;;  %v4183_v9 = vmul.f32 %v4175_v48, %v7327_v10  ;;  %vm4082_vm4 = vcmp.eq.f32.partialorder %v4081_v52, 8.507059e+37  ;;  %v4201_v6 = vmul.f32 %v4193_v39, %v7272_v55 }
 0x854   :  { %v4238_v46 = vmul.f32 %v4230_v51, %v7295_v57  ;;  %v4152_v27 = vmul.f32 %v4144_v11, %v7363_v28  ;;  %v4194_v57 = vsub.f32 0.0, %v7318_v53  ;;  %v4129_v10 = vadd.f32 -1.4531521, %v4121_v50 }
 0x855   :  { %v4076_v22 = vadd.f32 %v4814_v62, %v4075_v63  ;;  %v4223_v15 = vmul.f32 %v4818_v41, %v4183_v9  ;;  %v4098_v20 = vand.u32 2147483648, %v7372_v25  ;;  %v4096_v34 = vand.u32 2147483647, %v7372_v25 }
 0x856   :  { %v4820_v44 = vpop.eup %4819  ;;  %v4246_v45 = vadd.f32 1.0, %v4238_v46  ;;  %v4160_v13 = vadd.f32 -0.28449672, %v4152_v27  ;;  %v4137_v61 = vmul.f32 %v4129_v10, %v7385_v18  ;;  %v4213_v40 = vmul.f32 1.442695, %v4201_v6 }
 0x857   :  { %v4080_v33 = vsel %vm4079_vm3, %v4814_v62, %v4076_v22  ;;  %v4088_v0 = vmul.f32 %v4820_v44, %v7372_v25  ;;  %v4231_v60 = vsub.f32 1.0, %v4223_v15  ;;  %vm4093_vm5 = vweird.f32 %v4820_v44  ;;  %v4822_v8 = vpop.eup %4821 }
 0x858   :  { %v7395_v35 = vsel %vm4082_vm4, %v4084_v29, %v4080_v33  ;;  %v4254_v16 = vmul.f32 %v4246_v45, %v7267_v42  ;;  %v4168_v62 = vmul.f32 %v4160_v13, %v7363_v28  ;;  %v4202_v42 = vmul.f32 %v4194_v57, %v7318_v53 }
 0x859   :  { %v4089_v56 = vsub.f32 1.0, %v4088_v0  ;;  %v4122_v41 = vmul.f32 1.0614054, %v7395_v35  ;;  %v4239_v39 = vmul.f32 %v4231_v60, %v7324_v24  ;;  %v4145_v2 = vadd.f32 1.4214138, %v4137_v61 }
 0x85a   :  { %4300 = vmatmul.f32.gmra.mxu0 %v4254_v16  ;;  %v4176_v17 = vadd.f32 0.2548296, %v4168_v62  ;;  %vm4092_vm6 = vweird.f32 %v7372_v25  ;;  %v4099_v48 = vor.u32 1.1754944e-38, %v4098_v20  ;;  %vm4097_vm9 = vcmp.eq.f32.partialorder %v4096_v34, 8.507059e+37 }
 0x85b   :  { %v4090_v55 = vmul.f32 %v4820_v44, %v4089_v56  ;;  %v4130_v47 = vadd.f32 -1.4531521, %v4122_v41  ;;  %v4247_v63 = vadd.f32 1.0, %v4239_v39  ;;  %v4153_v51 = vmul.f32 %v4145_v2, %v7385_v18  ;;  %vm4094_vm8 = vmor %vm4092_vm6, %vm4093_vm5 }
 0x85c   :  { %v4184_v59 = vmul.f32 %v4176_v17, %v7363_v28  ;;  %v4195_v52 = vsub.f32 0.0, %v7357_v58  ;;  %4823 = vpow2.f32 %v4213_v40  ;;  %v4215_v28 = vmul.f32 1.442695, %v4202_v42 }
 0x85d   :  { %v4091_v54 = vadd.f32 %v4820_v44, %v4090_v55  ;;  %v4138_v24 = vmul.f32 %v4130_v47, %v7395_v35  ;;  %v4255_v11 = vmul.f32 %v4247_v63, %v7315_v31  ;;  %v4161_v25 = vadd.f32 -0.28449672, %v4153_v51 }
 0x85e   :  { %v4224_v22 = vmul.f32 %v4822_v8, %v4184_v59  ;;  %v3968_v33 = vsel %vm3960_vm7, 1.0, %v5024_v4  ;;  %v4203_v45 = vmul.f32 %v4195_v52, %v7357_v58  ;;  %v3944_v6 = vmul.f32 0.5, %v7209_v30 }
 0x85f   :  { %v4095_v53 = vsel %vm4094_vm8, %v4820_v44, %v4091_v54  ;;  %v4146_v46 = vadd.f32 1.4214138, %v4138_v24  ;;  %v4169_v29 = vmul.f32 %v4161_v25, %v7385_v18  ;;  %4825 = vpow2.f32 %v4215_v28 }
 0x860   :  { %v4100_v9 = vsel %vm4097_vm9, %v4099_v48, %v4095_v53  ;;  %v4232_v27 = vsub.f32 1.0, %v4224_v22  ;;  %vm3961_vm10 = vcmp.ge.f32.partialorder %v7254_v7, 0.0  ;;  %v4217_v20 = vmul.f32 1.442695, %v4203_v45 }
 0x861   :  { %v4123_v50 = vmul.f32 1.0614054, %v4100_v9  ;;  %v4154_v31 = vmul.f32 %v4146_v46, %v7395_v35  ;;  %v4177_v15 = vadd.f32 0.2548296, %v4169_v29  ;;  %v3969_v39 = vsel %vm3961_vm10, 1.0, %v5024_v4 }
 0x862   :  { %4303 = vmatmul.f32.gmra.mxu0 %v4255_v11  ;;  %v4240_v44 = vmul.f32 %v4232_v27, %v3968_v33  ;;  %v4824_v16 = vpop.eup %4823  ;;  %vm3962_vm11 = vcmp.ge.f32.partialorder %v7300_v37, 0.0  ;;  %4827 = vpow2.f32 %v4217_v20  ;;  %v3945_v7 = vmul.f32 0.5, %v7241_v43 }
 0x863   :  { %v4131_v0 = vadd.f32 -1.4531521, %v4123_v50  ;;  %v4162_v13 = vadd.f32 -0.28449672, %v4154_v31  ;;  %v4185_v56 = vmul.f32 %v4177_v15, %v7385_v18  ;;  %v3970_v47 = vsel %vm3962_vm11, 1.0, %v5024_v4 }
 0x864   :  { %v4248_v57 = vadd.f32 1.0, %v4240_v44  ;;  %vm3963_vm12 = vcmp.ge.f32.partialorder %v7346_v38, 0.0  ;;  %v3946_v48 = vmul.f32 0.5, %v7285_v26  ;;  %v3947_v25 = vmul.f32 0.5, %v7334_v21 }
 0x865   :  { %v4139_v10 = vmul.f32 %v4131_v0, %v4100_v9  ;;  %v4170_v3 = vmul.f32 %v4162_v13, %v7395_v35  ;;  %v4225_v61 = vmul.f32 %v4824_v16, %v4185_v56  ;;  %v4826_v30 = vpop.eup %4825  ;;  %v3971_v22 = vsel %vm3963_vm12, 1.0, %v5024_v4 }
 0x866   :  { %v4256_v60 = vmul.f32 %v4248_v57, %v3944_v6 }
 0x867   :  { %v4147_v62 = vadd.f32 1.4214138, %v4139_v10  ;;  %v4178_v41 = vadd.f32 0.2548296, %v4170_v3  ;;  %v4233_v34 = vsub.f32 1.0, %v4225_v61 }
 0x868   :  { %v4828_v51 = vpop.eup %4827 }
 0x869   :  { %v4155_v58 = vmul.f32 %v4147_v62, %v4100_v9  ;;  %v4186_v55 = vmul.f32 %v4178_v41, %v7395_v35  ;;  %v4241_v18 = vmul.f32 %v4233_v34, %v3969_v39 }
 0x86a   :  { %4306 = vmatmul.f32.gmra.mxu0 %v4256_v60 }
 0x86b   :  { %v4163_v17 = vadd.f32 -0.28449672, %v4155_v58  ;;  %v4226_v8 = vmul.f32 %v4826_v30, %v4186_v55  ;;  %v4249_v42 = vadd.f32 1.0, %v4241_v18  ;;  %v4622_v30 = vld [vmem:[#allocation11] ss:$0 sm:$0xff] }
 0x86d   :  { %v4171_v40 = vmul.f32 %v4163_v17, %v4100_v9  ;;  %v4234_v2 = vsub.f32 1.0, %v4226_v8  ;;  %v4257_v59 = vmul.f32 %v4249_v42, %v3945_v7 }
 0x86f   :  { %v4179_v63 = vadd.f32 0.2548296, %v4171_v40  ;;  %v4242_v35 = vmul.f32 %v4234_v2, %v3970_v47 }
 0x871   :  { %v4187_v54 = vmul.f32 %v4179_v63, %v4100_v9  ;;  %v4250_v24 = vadd.f32 1.0, %v4242_v35 }
 0x872   :  { %4309 = vmatmul.f32.gmra.mxu0 %v4257_v59 }
 0x873   :  { %v4227_v37 = vmul.f32 %v4828_v51, %v4187_v54  ;;  %v4258_v43 = vmul.f32 %v4250_v24, %v3946_v48 }
 0x875   :  { %v4235_v11 = vsub.f32 1.0, %v4227_v37 }
 0x877   :  { %v4243_v53 = vmul.f32 %v4235_v11, %v3971_v22 }
 0x879   :  { %v4251_v52 = vadd.f32 1.0, %v4243_v53 }
 0x87a   :  { %4312 = vmatmul.f32.gmra.mxu0 %v4258_v43 }
 0x87b   :  { %v4259_v46 = vmul.f32 %v4251_v52, %v3947_v25 }
 0x882   :  { %4315 = vmatmul.f32.gmra.mxu0 %v4259_v46 }
 0x898   :  { %v3938_v9 = vpop.f32.mrf.mxu3 }
 0x899   :  { %v3939_v28 = vadd.f32 %v7136_v36, %v3938_v9 }
 0x89b   :  { %v3956_v38 = vmul.f32 0.70710677, %v3939_v28  ;;  %v3948_v7 = vmul.f32 0.5, %v3939_v28 }
 0x89d   :  { %v3980_v27 = vand.u32 2147483647, %v3956_v38  ;;  %vm3964_vm2 = vcmp.ge.f32.partialorder %v3956_v38, 0.0 }
 0x89e   :  { %v3972_v17 = vsel %vm3964_vm2, 1.0, %v5024_v4 }
 0x89f   :  { %v3988_v50 = vmul.f32 0.3275911, %v3980_v27  ;;  %v4196_v6 = vsub.f32 0.0, %v3980_v27 }
 0x8a1   :  { %v3996_v33 = vadd.f32 1.0, %v3988_v50  ;;  %v4204_v56 = vmul.f32 %v4196_v6, %v3980_v27 }
 0x8a3   :  { %4829 = vrcp.f32 %v3996_v33  ;;  %v4113_v44 = vand.u32 2147483648, %v3996_v33  ;;  %v4111_v45 = vand.u32 2147483647, %v3996_v33  ;;  %vm4107_vm14 = vweird.f32 %v3996_v33 }
 0x8a4   :  { %v4219_v60 = vmul.f32 1.442695, %v4204_v56 }
 0x8a5   :  { %v4114_v21 = vor.u32 1.1754944e-38, %v4113_v44  ;;  %vm4112_vm1 = vcmp.eq.f32.partialorder %v4111_v45, 8.507059e+37 }
 0x8a6   :  { %4831 = vpow2.f32 %v4219_v60 }
 0x8a9   :  { %v4830_v26 = vpop.eup %4829 }
 0x8aa   :  { %v4103_v29 = vmul.f32 %v4830_v26, %v3996_v33  ;;  %vm4108_vm13 = vweird.f32 %v4830_v26 }
 0x8ab   :  { %vm4109_vm15 = vmor %vm4107_vm14, %vm4108_vm13 }
 0x8ac   :  { %v4104_v31 = vsub.f32 1.0, %v4103_v29  ;;  %v4832_v34 = vpop.eup %4831 }
 0x8ae   :  { %v4105_v0 = vmul.f32 %v4830_v26, %v4104_v31 }
 0x8b0   :  { %v4106_v15 = vadd.f32 %v4830_v26, %v4105_v0 }
 0x8b2   :  { %v4110_v13 = vsel %vm4109_vm15, %v4830_v26, %v4106_v15 }
 0x8b3   :  { %v4115_v36 = vsel %vm4112_vm1, %v4114_v21, %v4110_v13 }
 0x8b4   :  { %v4124_v57 = vmul.f32 1.0614054, %v4115_v36 }
 0x8b6   :  { %v4132_v10 = vadd.f32 -1.4531521, %v4124_v57 }
 0x8b8   :  { %v4140_v3 = vmul.f32 %v4132_v10, %v4115_v36 }
 0x8ba   :  { %v4148_v16 = vadd.f32 1.4214138, %v4140_v3 }
 0x8bc   :  { %v4156_v62 = vmul.f32 %v4148_v16, %v4115_v36 }
 0x8be   :  { %v4164_v20 = vadd.f32 -0.28449672, %v4156_v62 }
 0x8c0   :  { %v4172_v61 = vmul.f32 %v4164_v20, %v4115_v36 }
 0x8c2   :  { %v4180_v41 = vadd.f32 0.2548296, %v4172_v61 }
 0x8c4   :  { %v4188_v58 = vmul.f32 %v4180_v41, %v4115_v36 }
 0x8c6   :  { %v4228_v55 = vmul.f32 %v4832_v34, %v4188_v58 }
 0x8c8   :  { %v4236_v39 = vsub.f32 1.0, %v4228_v55 }
 0x8ca   :  { %v4298_v18 = vpop.f32.mrf.mxu0  ;;  %v4244_v8 = vmul.f32 %v4236_v39, %v3972_v17 }
 0x8cb   :  { %v4299_v40 = vadd.f32 %v4622_v30, %v4298_v18 }
 0x8cc   :  { %v4252_v42 = vadd.f32 1.0, %v4244_v8 }
 0x8cd   :  { %v4322_v2 = vadd.f32 %v4299_v40, %v6979_v5 }
 0x8ce   :  { %v4260_v47 = vmul.f32 %v4252_v42, %v3948_v7 }
 0x8cf   :  { %4330 = vst.msk [vmem:[#allocation13] sm:$0xff] %vm151_vm0, %v4322_v2 }
 0x8d0   :  { %4318 = vmatmul.f32.gmra.mxu0 %v4260_v47 }
 0x8d7   :  { %v4301_v63 = vpop.f32.mrf.mxu0 }
 0x8d8   :  { %v4302_v59 = vadd.f32 %v4622_v30, %v4301_v63 }
 0x8da   :  { %v4323_v35 = vadd.f32 %v4302_v59, %v6986_v1 }
 0x8dc   :  { %4331 = vst.msk [vmem:[#allocation13 + $0x8] sm:$0xff] %vm151_vm0, %v4323_v35 }
 0x8df   :  { %v4304_v54 = vpop.f32.mrf.mxu0 }
 0x8e0   :  { %v4305_v51 = vadd.f32 %v4622_v30, %v4304_v54 }
 0x8e2   :  { %v4324_v4 = vadd.f32 %v4305_v51, %v6993_v32 }
 0x8e4   :  { %4332 = vst.msk [vmem:[#allocation13 + $0x10] sm:$0xff] %vm151_vm0, %v4324_v4 }
 0x8e7   :  { %v4307_v24 = vpop.f32.mrf.mxu0 }
 0x8e8   :  { %v4308_v37 = vadd.f32 %v4622_v30, %v4307_v24 }
 0x8ea   :  { %v4325_v5 = vadd.f32 %v4308_v37, %v7000_v49 }
 0x8ec   :  { %4333 = vst.msk [vmem:[#allocation13 + $0x18] sm:$0xff] %vm151_vm0, %v4325_v5 }
 0x8ef   :  { %v4310_v48 = vpop.f32.mrf.mxu0 }
 0x8f0   :  { %v4311_v11 = vadd.f32 %v4622_v30, %v4310_v48 }
 0x8f2   :  { %v4326_v22 = vadd.f32 %v4311_v11, %v7007_v19 }
 0x8f4   :  { %4334 = vst.msk [vmem:[#allocation13 + $0x20] sm:$0xff] %vm151_vm0, %v4326_v22 }
 0x8f7   :  { %v4313_v1 = vpop.f32.mrf.mxu0 }
 0x8f8   :  { %v4314_v43 = vadd.f32 %v4622_v30, %v4313_v1 }
 0x8fa   :  { %v4327_v53 = vadd.f32 %v4314_v43, %v7014_v14 }
 0x8fc   :  { %4335 = vst.msk [vmem:[#allocation13 + $0x28] sm:$0xff] %vm151_vm0, %v4327_v53 }
 0x8ff   :  { %v4316_v32 = vpop.f32.mrf.mxu0 }
 0x900   :  { %v4317_v52 = vadd.f32 %v4622_v30, %v4316_v32 }
 0x902   :  { %v4328_v25 = vadd.f32 %v4317_v52, %v7021_v23 }
 0x904   :  { %4336 = vst.msk [vmem:[#allocation13 + $0x30] sm:$0xff] %vm151_vm0, %v4328_v25 }
 0x94d   :  { %v4319_v49 = vpop.f32.mrf.mxu0 }
 0x94e   :  { %v4320_v19 = vadd.f32 %v4622_v30, %v4319_v49 }
 0x950   :  { %v4329_v46 = vadd.f32 %v4320_v19, %v7036_v12 }
 0x952   :  { %4337 = vst.msk [vmem:[#allocation13 + $0x38] sm:$0xff] %vm151_vm0, %v4329_v46 }
 0x953   :  { %4350 = dma.vmem_to_hbm [thread:$0]  %s4343_s21, 1024, %s4345_s23, [#allocation4], %s5012_s26, %s5012_s26, %s5013_s27  }
 0x954   :  { %5009 = dma.done.wait [#allocation4], 1024  }
 0x955   :  { %5010 = vsyncadd [#allocation4], 4294966272 }
 0x956   :  { %4355 = vsyncpa [#allocation3], 1 }
 0x957   :  { %4356 = vsyncpa [#allocation6], 1 }
 0x958   :  { %4357 = vsyncpa [#allocation9], 1 }
 0x959   :  { %4358 = vsyncpa [#allocation12], 1 }
 0x95a   :  { %4359 = vsyncpa [#allocation4], 1 }

</bundles_post_ra>
